<compile_context>
chip_gen: v5e
topology: v5e:2x2
jax: 0.10.0
libtpu: 0.0.40
codegen_flags: <defaults>
</compile_context>

<pallas_src>
import functools

import jax
import jax.numpy as jnp
import numpy as np
from jax.experimental import pallas as pl
from jax.experimental.pallas import tpu as pltpu


# ----------------------------------------------------------------------------
# Helpers
# ----------------------------------------------------------------------------
def _round_up(x, m):
    return (x + m - 1) // m * m


# ----------------------------------------------------------------------------
# Fused kernel: encoders -> precomputed input gates -> LSTM recurrence -> decoder
# ----------------------------------------------------------------------------
def fused_kernel(x_ref,
                 w1, b1, w2, b2,
                 we1, be1, we2, be2,
                 wih, bl, whh,
                 wd1, bd1, wmv, bmv,
                 out_ref,
                 gx_scr, z_scr,
                 *, T, Bc, lod, H5P, tgt):
    f32 = jnp.float32
    eps2 = 1e-24  # (torch F.normalize eps = 1e-12) ** 2

    # ---- fused obs/act encoders (block-diagonal weights); rows independent ----
    x = x_ref[...]                                                     # (T*Bc, obs+act)
    h1 = jnp.maximum(jnp.dot(x, w1[...], preferred_element_type=f32) + b1[...], 0.0)
    pre2 = jnp.dot(h1, w2[...], preferred_element_type=f32) + b2[...]  # (rows, 2*lod)

    # per-half L2 normalize: obs half = lanes [0, lod), act half = lanes [lod, 2*lod)
    lane = jax.lax.broadcasted_iota(jnp.int32, pre2.shape, 1)
    is_obs = lane < lod
    sq = pre2 * pre2
    ss_o = jnp.sum(jnp.where(is_obs, sq, 0.0), axis=-1, keepdims=True)
    ss_a = jnp.sum(jnp.where(is_obs, 0.0, sq), axis=-1, keepdims=True)
    inv = jnp.where(is_obs,
                    jax.lax.rsqrt(jnp.maximum(ss_o, eps2)),
                    jax.lax.rsqrt(jnp.maximum(ss_a, eps2)))
    w_cat = pre2 * inv                       # == concat([normalize(obs), normalize(act)])

    # ---- joint encoder ----
    h_e = jnp.maximum(jnp.dot(w_cat, we1[...], preferred_element_type=f32) + be1[...], 0.0)
    pre_w = jnp.dot(h_e, we2[...], preferred_element_type=f32) + be2[...]
    ss_w = jnp.sum(pre_w * pre_w, axis=-1, keepdims=True)
    w_lstm = pre_w * jax.lax.rsqrt(jnp.maximum(ss_w, eps2))            # (rows, lsd)

    # ---- input-gate projection hoisted out of the serial loop (one big matmul) ----
    gx_scr[...] = jnp.dot(w_lstm, wih[...], preferred_element_type=f32) + bl[...]

    # ---- sequential LSTM; whh streamed from VMEM every step (no vreg-resident RHS) ----
    def step(t, carry):
        h, c = carry
        row = pl.multiple_of(t * Bc, Bc)     # Bc is a multiple of 8 (sublane-aligned)
        gates = (gx_scr[pl.ds(row, Bc), :]
                 + jnp.dot(h, whh[...], preferred_element_type=f32))   # (Bc, 4*H5P)
        # PyTorch gate order: i, f, g, o ; each gate is a 128-lane-aligned slice.
        i_g = jax.nn.sigmoid(gates[:, 0 * H5P:1 * H5P])
        f_g = jax.nn.sigmoid(gates[:, 1 * H5P:2 * H5P])
        g_g = jnp.tanh(gates[:, 2 * H5P:3 * H5P])
        o_g = jax.nn.sigmoid(gates[:, 3 * H5P:4 * H5P])
        c_new = f_g * c + i_g * g_g
        h_new = o_g * jnp.tanh(c_new)
        z_scr[pl.ds(row, Bc), :] = h_new
        return h_new, c_new

    h0 = jnp.zeros((Bc, H5P), f32)
    c0 = jnp.zeros((Bc, H5P), f32)
    jax.lax.fori_loop(0, T, step, (h0, c0), unroll=min(T, 8))

    # ---- decoder: fused mean||var head, one lane-dense 128-wide output store ----
    z = z_scr[...]                                                     # (rows, H5P)
    hd = jnp.maximum(jnp.dot(z, wd1[...], preferred_element_type=f32) + bd1[...], 0.0)
    raw = jnp.dot(hd, wmv[...], preferred_element_type=f32) + bmv[...]  # (rows, OUT_P)
    lane_o = jax.lax.broadcasted_iota(jnp.int32, raw.shape, 1)
    var_mask = (lane_o >= tgt) & (lane_o < 2 * tgt)
    out_ref[...] = jnp.where(var_mask, jax.nn.softplus(raw), raw)


# ----------------------------------------------------------------------------
# Wrapper
# ----------------------------------------------------------------------------
@functools.partial(jax.jit, static_argnames=("lod", "tgt"))
def lstm_baseline_forward(obs, act, obs_valid, kp, *, lod, tgt):
    B, T, obs_dim = obs.shape
    act_dim = act.shape[-1]
    in_dim = obs_dim + act_dim
    H5P = kp["whh_p"].shape[0]
    OUT_P = kp["wmv_p"].shape[1]

    # Batch padding / split: per-chunk batch Bc must be a multiple of 8 so the
    # per-timestep scratch slices are sublane-aligned; two chunks feed both v7x TCs.
    Bp8 = _round_up(B, 8)
    nsplit = 2 if Bp8 >= 16 else 1
    Bp = _round_up(B, 8 * nsplit)
    Bc = Bp // nsplit

    obs_m = obs.astype(jnp.float32) * obs_valid.astype(jnp.float32)
    x = jnp.concatenate([obs_m, act.astype(jnp.float32)], axis=-1)     # (B, T, in_dim)
    if Bp != B:
        x = jnp.pad(x, ((0, Bp - B), (0, 0), (0, 0)))
    # rows ordered (chunk, t, b): contiguous per-chunk grid blocks AND contiguous
    # per-timestep sub-blocks inside each chunk.
    x_slab = (x.reshape(nsplit, Bc, T, in_dim)
               .transpose(0, 2, 1, 3)
               .reshape(nsplit * T * Bc, in_dim))

    weight_args = (kp["w1"], kp["b1"], kp["w2"], kp["b2"],
                   kp["we1"], kp["be1"], kp["we2"], kp["be2"],
                   kp["wih_p"], kp["b_p"], kp["whh_p"],
                   kp["wd1_p"], kp["bd1"], kp["wmv_p"], kp["bmv_p"])

    in_specs = [pl.BlockSpec((T * Bc, in_dim), lambda i: (i, 0))]
    in_specs += [pl.BlockSpec(w.shape, lambda i: (0, 0)) for w in weight_args]
    out_spec = pl.BlockSpec((T * Bc, OUT_P), lambda i: (i, 0))

    # VMEM budget from the actual footprint (double-buffered I/O + weights + scratch).
    wbytes = sum(int(np.prod(w.shape)) * 4 for w in weight_args)
    sbytes = (T * Bc) * (4 * H5P + H5P) * 4
    iobytes = (T * Bc) * (in_dim + OUT_P) * 4
    need = 2 * iobytes + 2 * wbytes + sbytes + (4 << 20)
    vmem_limit = int(min(128 << 20, max(32 << 20, need)))
    # TODO(synk): for very large T*B (where the gate slab no longer fits VMEM,
    # esp. v7x's 64 MiB) add a T-chunk "arbitrary" grid axis carrying h/c.

    kernel = functools.partial(fused_kernel, T=T, Bc=Bc, lod=lod, H5P=H5P, tgt=tgt)
    out_slab = pl.pallas_call(
        kernel,
        out_shape=jax.ShapeDtypeStruct((nsplit * T * Bc, OUT_P), jnp.float32),
        grid=(nsplit,),
        in_specs=in_specs,
        out_specs=out_spec,
        scratch_shapes=[pltpu.VMEM((T * Bc, 4 * H5P), jnp.float32),   # precomputed gates
                        pltpu.VMEM((T * Bc, H5P), jnp.float32)],      # hidden-state slab
        compiler_params=pltpu.CompilerParams(
            dimension_semantics=("parallel",),
            vmem_limit_bytes=vmem_limit),
    )(x_slab, *weight_args)

    out = (out_slab.reshape(nsplit, T, Bc, OUT_P)
                   .transpose(0, 2, 1, 3)
                   .reshape(Bp, T, OUT_P))
    mean = out[:B, :, :tgt]
    var = out[:B, :, tgt:2 * tgt]
    return mean, var
    # TODO(synk): c.get_latent branch returns prior_mean/prior_cov which are
    # undefined in the PyTorch source; only the (mean, var) path is implemented.
    # TODO(synk): c.gru=True (GRU recurrence) variant not implemented; the chosen
    # configuration uses the nn.LSTM branch.


# ----------------------------------------------------------------------------
# Deterministic parameter init (PyTorch-style uniform(-1/sqrt(fan_in), ...))
# ----------------------------------------------------------------------------
def _linear(key, fan_in, fan_out):
    k = 1.0 / np.sqrt(fan_in)
    kw, kb = jax.random.split(key)
    w = jax.random.uniform(kw, (fan_in, fan_out), jnp.float32, -k, k)
    b = jax.random.uniform(kb, (1, fan_out), jnp.float32, -k, k)
    return w, b


def init_params(key, obs_dim, act_dim, lod, hidden, target_dim):
    lsd = 2 * lod
    H5 = 5 * lod
    keys = jax.random.split(key, 12)
    p = {}
    p["wo1"], p["bo1"] = _linear(keys[0], obs_dim, hidden)
    p["wo2"], p["bo2"] = _linear(keys[1], hidden, lod)
    p["wa1"], p["ba1"] = _linear(keys[2], act_dim, hidden)
    p["wa2"], p["ba2"] = _linear(keys[3], hidden, lod)
    p["we1"], p["be1"] = _linear(keys[4], lsd, hidden)
    p["we2"], p["be2"] = _linear(keys[5], hidden, lsd)
    # LSTM params stored gate-concatenated in PyTorch order (i, f, g, o):
    # wih (lsd, 4*H5), whh (H5, 4*H5), bias (1, 4*H5) = b_ih + b_hh.
    kk = 1.0 / np.sqrt(H5)
    p["wih"] = jax.random.uniform(keys[6], (lsd, 4 * H5), jnp.float32, -kk, kk)
    p["whh"] = jax.random.uniform(keys[7], (H5, 4 * H5), jnp.float32, -kk, kk)
    b_ih = jax.random.uniform(keys[8], (1, 4 * H5), jnp.float32, -kk, kk)
    b_hh = jax.random.uniform(keys[9], (1, 4 * H5), jnp.float32, -kk, kk)
    p["b_lstm"] = b_ih + b_hh
    p["wd1"], p["bd1"] = _linear(keys[10], H5, hidden)
    kmv = jax.random.split(keys[11])
    p["wm"], p["bm"] = _linear(kmv[0], hidden, target_dim)
    p["wv"], p["bv"] = _linear(kmv[1], hidden, target_dim)
    return p


def pack_params(p, obs_dim, act_dim, lod, hidden, target_dim):
    """Pack weights for the fused kernel.

    * obs/act encoders fused as block-diagonal matmuls.
    * LSTM hidden width padded per gate (H5 -> H5P=128-aligned); padded gate
      lanes stay exactly zero through the recurrence (zero weights + zero bias
      => i=f=o=0.5, g=0 => padded c,h stay 0), so results match unpadded math.
    * mean||var heads fused and padded to a lane-dense OUT_P-wide output slab.
    """
    H5 = 5 * lod
    H5P = _round_up(H5, 128)
    OUT_P = max(128, _round_up(2 * target_dim, 128))
    in_dim = obs_dim + act_dim
    kp = {}

    # fused block-diagonal obs/act encoder
    w1 = jnp.zeros((in_dim, 2 * hidden), jnp.float32)
    w1 = w1.at[:obs_dim, :hidden].set(p["wo1"]).at[obs_dim:, hidden:].set(p["wa1"])
    kp["w1"] = w1
    kp["b1"] = jnp.concatenate([p["bo1"], p["ba1"]], axis=1)
    w2 = jnp.zeros((2 * hidden, 2 * lod), jnp.float32)
    w2 = w2.at[:hidden, :lod].set(p["wo2"]).at[hidden:, lod:].set(p["wa2"])
    kp["w2"] = w2
    kp["b2"] = jnp.concatenate([p["bo2"], p["ba2"]], axis=1)
    kp["we1"], kp["be1"] = p["we1"], p["be1"]
    kp["we2"], kp["be2"] = p["we2"], p["be2"]

    # LSTM: per-gate hidden width padded H5 -> H5P (cheap 128-aligned gate slices)
    wih_p = jnp.zeros((2 * lod, 4 * H5P), jnp.float32)
    whh_p = jnp.zeros((H5P, 4 * H5P), jnp.float32)
    b_p = jnp.zeros((1, 4 * H5P), jnp.float32)
    for k in range(4):
        wih_p = wih_p.at[:, k * H5P:k * H5P + H5].set(p["wih"][:, k * H5:(k + 1) * H5])
        whh_p = whh_p.at[:H5, k * H5P:k * H5P + H5].set(p["whh"][:, k * H5:(k + 1) * H5])
        b_p = b_p.at[:, k * H5P:k * H5P + H5].set(p["b_lstm"][:, k * H5:(k + 1) * H5])
    kp["wih_p"], kp["whh_p"], kp["b_p"] = wih_p, whh_p, b_p
    kp["wd1_p"] = jnp.zeros((H5P, hidden), jnp.float32).at[:H5].set(p["wd1"])
    kp["bd1"] = p["bd1"]

    # fused mean||var head, padded lane-dense
    wmv = jnp.concatenate([p["wm"], p["wv"]], axis=1)
    bmv = jnp.concatenate([p["bm"], p["bv"]], axis=1)
    kp["wmv_p"] = jnp.zeros((hidden, OUT_P), jnp.float32).at[:, :2 * target_dim].set(wmv)
    kp["bmv_p"] = jnp.zeros((1, OUT_P), jnp.float32).at[:, :2 * target_dim].set(bmv)

    # padding invariant: every padded lane / row must stay exactly zero
    for k in range(4):
        assert not np.asarray(wih_p[:, k * H5P + H5:(k + 1) * H5P]).any()
        assert not np.asarray(whh_p[:, k * H5P + H5:(k + 1) * H5P]).any()
        assert not np.asarray(b_p[:, k * H5P + H5:(k + 1) * H5P]).any()
    assert not np.asarray(whh_p[H5:]).any()
    assert not np.asarray(kp["wd1_p"][H5:]).any()
    assert not np.asarray(kp["wmv_p"][:, 2 * target_dim:]).any()
    return kp


# ----------------------------------------------------------------------------
# Pure-JAX reference (for numerical verification)
# ----------------------------------------------------------------------------
def reference_forward(obs, act, obs_valid, p, lod):
    H5 = 5 * lod

    def enc(x, w1, b1, w2, b2):
        h = jnp.maximum(x @ w1 + b1, 0.0)
        y = h @ w2 + b2
        n = jnp.sqrt(jnp.sum(y * y, axis=-1, keepdims=True))
        return y / jnp.maximum(n, 1e-12)

    obs_m = obs * obs_valid.astype(obs.dtype)
    w_obs = enc(obs_m, p["wo1"], p["bo1"], p["wo2"], p["bo2"])
    w_act = enc(act, p["wa1"], p["ba1"], p["wa2"], p["ba2"])
    x = jnp.concatenate([w_obs, w_act], axis=-1)
    w = enc(x, p["we1"], p["be1"], p["we2"], p["be2"])

    B = w.shape[0]

    def step(carry, x_t):
        h, c = carry
        gates = x_t @ p["wih"] + h @ p["whh"] + p["b_lstm"]
        i = jax.nn.sigmoid(gates[:, 0 * H5:1 * H5])
        f = jax.nn.sigmoid(gates[:, 1 * H5:2 * H5])
        g = jnp.tanh(gates[:, 2 * H5:3 * H5])
        o = jax.nn.sigmoid(gates[:, 3 * H5:4 * H5])
        c2 = f * c + i * g
        h2 = o * jnp.tanh(c2)
        return (h2, c2), h2

    _, hs = jax.lax.scan(step, (jnp.zeros((B, H5)), jnp.zeros((B, H5))),
                         jnp.transpose(w, (1, 0, 2)))
    z = jnp.transpose(hs, (1, 0, 2))
    h = jnp.maximum(z @ p["wd1"] + p["bd1"], 0.0)
    mean = h @ p["wm"] + p["bm"]
    var = jax.nn.softplus(h @ p["wv"] + p["bv"])
    return mean, var


# ----------------------------------------------------------------------------
if __name__ == "__main__":
    B, T = 16, 8
    obs_dim, act_dim = 16, 4
    lod, hidden, target_dim = 16, 32, 8

    key = jax.random.PRNGKey(0)
    k_obs, k_act, k_valid, k_params = jax.random.split(key, 4)
    obs = jax.random.normal(k_obs, (B, T, obs_dim), jnp.float32)
    act = jax.random.normal(k_act, (B, T, act_dim), jnp.float32)
    obs_valid = jax.random.bernoulli(k_valid, 0.8, (B, T, 1))

    params = init_params(k_params, obs_dim, act_dim, lod, hidden, target_dim)
    kparams = pack_params(params, obs_dim, act_dim, lod, hidden, target_dim)

    out_mean, out_var = lstm_baseline_forward(obs, act, obs_valid, kparams,
                                              lod=lod, tgt=target_dim)
    jax.block_until_ready((out_mean, out_var))

    ref_mean, ref_var = reference_forward(obs, act, obs_valid, params, lod)
    np.testing.assert_allclose(np.asarray(out_mean), np.asarray(ref_mean),
                               rtol=1e-4, atol=1e-5)
    np.testing.assert_allclose(np.asarray(out_var), np.asarray(ref_var),
                               rtol=1e-4, atol=1e-5)

    print("KERNEL_OK")
</pallas_src>

<mosaic_0001>
module attributes {stable_mosaic.version = 11 : i64} {
  func.func @fused_kernel(%arg0: i32, %arg1: memref<64x20xf32, #tpu.memory_space<vmem>>, %arg2: memref<20x64xf32, #tpu.memory_space<vmem>>, %arg3: memref<1x64xf32, #tpu.memory_space<vmem>>, %arg4: memref<64x32xf32, #tpu.memory_space<vmem>>, %arg5: memref<1x32xf32, #tpu.memory_space<vmem>>, %arg6: memref<32x32xf32, #tpu.memory_space<vmem>>, %arg7: memref<1x32xf32, #tpu.memory_space<vmem>>, %arg8: memref<32x32xf32, #tpu.memory_space<vmem>>, %arg9: memref<1x32xf32, #tpu.memory_space<vmem>>, %arg10: memref<32x512xf32, #tpu.memory_space<vmem>>, %arg11: memref<1x512xf32, #tpu.memory_space<vmem>>, %arg12: memref<128x512xf32, #tpu.memory_space<vmem>>, %arg13: memref<128x32xf32, #tpu.memory_space<vmem>>, %arg14: memref<1x32xf32, #tpu.memory_space<vmem>>, %arg15: memref<32x128xf32, #tpu.memory_space<vmem>>, %arg16: memref<1x128xf32, #tpu.memory_space<vmem>>, %arg17: memref<64x128xf32, #tpu.memory_space<vmem>>, %arg18: memref<64x512xf32, #tpu.memory_space<vmem>>, %arg19: memref<64x128xf32, #tpu.memory_space<vmem>>) attributes {dimension_semantics = [#tpu.dimension_semantics<parallel>], iteration_bounds = array<i64: 2>, scalar_prefetch = 0 : i64, scratch_operands = 2 : i64, tpu.core_type = #tpu.core_type<tc>, window_params = [{transform_indices = @transform_0, window_bounds = array<i64: 64, 20>}, {pipeline_mode = #tpu.pipeline_mode<synchronous>, transform_indices = @transform_1, window_bounds = array<i64: 20, 64>}, {pipeline_mode = #tpu.pipeline_mode<synchronous>, transform_indices = @transform_2, window_bounds = array<i64: 1, 64>}, {pipeline_mode = #tpu.pipeline_mode<synchronous>, transform_indices = @transform_3, window_bounds = array<i64: 64, 32>}, {pipeline_mode = #tpu.pipeline_mode<synchronous>, transform_indices = @transform_4, window_bounds = array<i64: 1, 32>}, {pipeline_mode = #tpu.pipeline_mode<synchronous>, transform_indices = @transform_5, window_bounds = array<i64: 32, 32>}, {pipeline_mode = #tpu.pipeline_mode<synchronous>, transform_indices = @transform_6, window_bounds = array<i64: 1, 32>}, {pipeline_mode = #tpu.pipeline_mode<synchronous>, transform_indices = @transform_7, window_bounds = array<i64: 32, 32>}, {pipeline_mode = #tpu.pipeline_mode<synchronous>, transform_indices = @transform_8, window_bounds = array<i64: 1, 32>}, {pipeline_mode = #tpu.pipeline_mode<synchronous>, transform_indices = @transform_9, window_bounds = array<i64: 32, 512>}, {pipeline_mode = #tpu.pipeline_mode<synchronous>, transform_indices = @transform_10, window_bounds = array<i64: 1, 512>}, {pipeline_mode = #tpu.pipeline_mode<synchronous>, transform_indices = @transform_11, window_bounds = array<i64: 128, 512>}, {pipeline_mode = #tpu.pipeline_mode<synchronous>, transform_indices = @transform_12, window_bounds = array<i64: 128, 32>}, {pipeline_mode = #tpu.pipeline_mode<synchronous>, transform_indices = @transform_13, window_bounds = array<i64: 1, 32>}, {pipeline_mode = #tpu.pipeline_mode<synchronous>, transform_indices = @transform_14, window_bounds = array<i64: 32, 128>}, {pipeline_mode = #tpu.pipeline_mode<synchronous>, transform_indices = @transform_15, window_bounds = array<i64: 1, 128>}, {transform_indices = @transform_16, window_bounds = array<i64: 64, 128>}]} {
    %c0 = arith.constant 0 : index
    %c0_0 = arith.constant 0 : index
    %0 = vector.load %arg1[%c0, %c0_0] : memref<64x20xf32, #tpu.memory_space<vmem>>, vector<64x20xf32>
    %c0_1 = arith.constant 0 : index
    %c0_2 = arith.constant 0 : index
    %1 = vector.load %arg2[%c0_1, %c0_2] : memref<20x64xf32, #tpu.memory_space<vmem>>, vector<20x64xf32>
    %cst = arith.constant dense<0.000000e+00> : vector<64x64xf32>
    %2 = tpu.matmul %0, %1, %cst {dimension_numbers = #tpu.dot_dimension_numbers<[1], [0], [0], [1], [0, 0, 1, 1], [], []>} : vector<64x20xf32>, vector<20x64xf32>, vector<64x64xf32> -> vector<64x64xf32>
    %c0_3 = arith.constant 0 : index
    %c0_4 = arith.constant 0 : index
    %3 = vector.load %arg3[%c0_3, %c0_4] : memref<1x64xf32, #tpu.memory_space<vmem>>, vector<1x64xf32>
    %4 = vector.broadcast %3 : vector<1x64xf32> to vector<64x64xf32>
    %5 = arith.addf %2, %4 : vector<64x64xf32>
    %cst_5 = arith.constant 0.000000e+00 : f32
    %6 = vector.broadcast %cst_5 : f32 to vector<64x64xf32>
    %7 = arith.maximumf %5, %6 : vector<64x64xf32>
    %c0_6 = arith.constant 0 : index
    %c0_7 = arith.constant 0 : index
    %8 = vector.load %arg4[%c0_6, %c0_7] : memref<64x32xf32, #tpu.memory_space<vmem>>, vector<64x32xf32>
    %cst_8 = arith.constant dense<0.000000e+00> : vector<64x32xf32>
    %9 = tpu.matmul %7, %8, %cst_8 {dimension_numbers = #tpu.dot_dimension_numbers<[1], [0], [0], [1], [0, 0, 1, 1], [], []>} : vector<64x64xf32>, vector<64x32xf32>, vector<64x32xf32> -> vector<64x32xf32>
    %c0_9 = arith.constant 0 : index
    %c0_10 = arith.constant 0 : index
    %10 = vector.load %arg5[%c0_9, %c0_10] : memref<1x32xf32, #tpu.memory_space<vmem>>, vector<1x32xf32>
    %11 = vector.broadcast %10 : vector<1x32xf32> to vector<64x32xf32>
    %12 = arith.addf %9, %11 : vector<64x32xf32>
    %13 = tpu.iota {dimensions = array<i32: 1>} : vector<64x32xi32>
    %c16_i32 = arith.constant 16 : i32
    %14 = vector.broadcast %c16_i32 : i32 to vector<64x32xi32>
    %15 = arith.cmpi slt, %13, %14 : vector<64x32xi32>
    %16 = arith.mulf %12, %12 : vector<64x32xf32>
    %cst_11 = arith.constant 0.000000e+00 : f32
    %17 = vector.broadcast %cst_11 : f32 to vector<64x32xf32>
    %18 = arith.select %15, %16, %17 : vector<64x32xi1>, vector<64x32xf32>
    %cst_12 = arith.constant dense<0.000000e+00> : vector<64xf32>
    %19 = vector.multi_reduction <add>, %18, %cst_12 [1] : vector<64x32xf32> to vector<64xf32>
    %20 = vector.shape_cast %19 : vector<64xf32> to vector<64x1xf32>
    %cst_13 = arith.constant 0.000000e+00 : f32
    %21 = vector.broadcast %cst_13 : f32 to vector<64x32xf32>
    %22 = arith.select %15, %21, %16 : vector<64x32xi1>, vector<64x32xf32>
    %cst_14 = arith.constant dense<0.000000e+00> : vector<64xf32>
    %23 = vector.multi_reduction <add>, %22, %cst_14 [1] : vector<64x32xf32> to vector<64xf32>
    %24 = vector.shape_cast %23 : vector<64xf32> to vector<64x1xf32>
    %cst_15 = arith.constant 1.000000e-24 : f32
    %25 = vector.broadcast %cst_15 : f32 to vector<64x1xf32>
    %26 = arith.maximumf %20, %25 : vector<64x1xf32>
    %27 = math.rsqrt %26 : vector<64x1xf32>
    %cst_16 = arith.constant 1.000000e-24 : f32
    %28 = vector.broadcast %cst_16 : f32 to vector<64x1xf32>
    %29 = arith.maximumf %24, %28 : vector<64x1xf32>
    %30 = math.rsqrt %29 : vector<64x1xf32>
    %31 = vector.shape_cast %27 : vector<64x1xf32> to vector<64x1xf32>
    %32 = vector.broadcast %31 : vector<64x1xf32> to vector<64x32xf32>
    %33 = vector.shape_cast %30 : vector<64x1xf32> to vector<64x1xf32>
    %34 = vector.broadcast %33 : vector<64x1xf32> to vector<64x32xf32>
    %35 = arith.select %15, %32, %34 : vector<64x32xi1>, vector<64x32xf32>
    %36 = arith.mulf %12, %35 : vector<64x32xf32>
    %c0_17 = arith.constant 0 : index
    %c0_18 = arith.constant 0 : index
    %37 = vector.load %arg6[%c0_17, %c0_18] : memref<32x32xf32, #tpu.memory_space<vmem>>, vector<32x32xf32>
    %cst_19 = arith.constant dense<0.000000e+00> : vector<64x32xf32>
    %38 = tpu.matmul %36, %37, %cst_19 {dimension_numbers = #tpu.dot_dimension_numbers<[1], [0], [0], [1], [0, 0, 1, 1], [], []>} : vector<64x32xf32>, vector<32x32xf32>, vector<64x32xf32> -> vector<64x32xf32>
    %c0_20 = arith.constant 0 : index
    %c0_21 = arith.constant 0 : index
    %39 = vector.load %arg7[%c0_20, %c0_21] : memref<1x32xf32, #tpu.memory_space<vmem>>, vector<1x32xf32>
    %40 = vector.broadcast %39 : vector<1x32xf32> to vector<64x32xf32>
    %41 = arith.addf %38, %40 : vector<64x32xf32>
    %cst_22 = arith.constant 0.000000e+00 : f32
    %42 = vector.broadcast %cst_22 : f32 to vector<64x32xf32>
    %43 = arith.maximumf %41, %42 : vector<64x32xf32>
    %c0_23 = arith.constant 0 : index
    %c0_24 = arith.constant 0 : index
    %44 = vector.load %arg8[%c0_23, %c0_24] : memref<32x32xf32, #tpu.memory_space<vmem>>, vector<32x32xf32>
    %cst_25 = arith.constant dense<0.000000e+00> : vector<64x32xf32>
    %45 = tpu.matmul %43, %44, %cst_25 {dimension_numbers = #tpu.dot_dimension_numbers<[1], [0], [0], [1], [0, 0, 1, 1], [], []>} : vector<64x32xf32>, vector<32x32xf32>, vector<64x32xf32> -> vector<64x32xf32>
    %c0_26 = arith.constant 0 : index
    %c0_27 = arith.constant 0 : index
    %46 = vector.load %arg9[%c0_26, %c0_27] : memref<1x32xf32, #tpu.memory_space<vmem>>, vector<1x32xf32>
    %47 = vector.broadcast %46 : vector<1x32xf32> to vector<64x32xf32>
    %48 = arith.addf %45, %47 : vector<64x32xf32>
    %49 = arith.mulf %48, %48 : vector<64x32xf32>
    %cst_28 = arith.constant dense<0.000000e+00> : vector<64xf32>
    %50 = vector.multi_reduction <add>, %49, %cst_28 [1] : vector<64x32xf32> to vector<64xf32>
    %51 = vector.shape_cast %50 : vector<64xf32> to vector<64x1xf32>
    %cst_29 = arith.constant 1.000000e-24 : f32
    %52 = vector.broadcast %cst_29 : f32 to vector<64x1xf32>
    %53 = arith.maximumf %51, %52 : vector<64x1xf32>
    %54 = math.rsqrt %53 : vector<64x1xf32>
    %55 = vector.broadcast %54 : vector<64x1xf32> to vector<64x32xf32>
    %56 = arith.mulf %48, %55 : vector<64x32xf32>
    %c0_30 = arith.constant 0 : index
    %c0_31 = arith.constant 0 : index
    %57 = vector.load %arg10[%c0_30, %c0_31] : memref<32x512xf32, #tpu.memory_space<vmem>>, vector<32x512xf32>
    %cst_32 = arith.constant dense<0.000000e+00> : vector<64x512xf32>
    %58 = tpu.matmul %56, %57, %cst_32 {dimension_numbers = #tpu.dot_dimension_numbers<[1], [0], [0], [1], [0, 0, 1, 1], [], []>} : vector<64x32xf32>, vector<32x512xf32>, vector<64x512xf32> -> vector<64x512xf32>
    %c0_33 = arith.constant 0 : index
    %c0_34 = arith.constant 0 : index
    %59 = vector.load %arg11[%c0_33, %c0_34] : memref<1x512xf32, #tpu.memory_space<vmem>>, vector<1x512xf32>
    %60 = vector.broadcast %59 : vector<1x512xf32> to vector<64x512xf32>
    %61 = arith.addf %58, %60 : vector<64x512xf32>
    %c0_35 = arith.constant 0 : index
    %c0_36 = arith.constant 0 : index
    %62 = vector.load %arg18[%c0_35, %c0_36] : memref<64x512xf32, #tpu.memory_space<vmem>>, vector<64x512xf32>
    tpu.vector_store %arg18[%c0_35, %c0_36], %61 {strides = array<i32>} : memref<64x512xf32, #tpu.memory_space<vmem>>, vector<64x512xf32>,
    %cst_37 = arith.constant 0.000000e+00 : f32
    %63 = vector.broadcast %cst_37 : f32 to vector<8x128xf32>
    %cst_38 = arith.constant 0.000000e+00 : f32
    %64 = vector.broadcast %cst_38 : f32 to vector<8x128xf32>
    %c0_i32 = arith.constant 0 : i32
    %c8_i32 = arith.constant 8 : i32
    %65 = arith.muli %c0_i32, %c8_i32 : i32
    %66 = tpu.assume_multiple %65, 8 : i32
    %67 = arith.index_cast %66 : i32 to index
    %c0_39 = arith.constant 0 : index
    %68 = vector.load %arg18[%67, %c0_39] : memref<64x512xf32, #tpu.memory_space<vmem>>, vector<8x512xf32>
    %c0_40 = arith.constant 0 : index
    %c0_41 = arith.constant 0 : index
    %69 = vector.load %arg12[%c0_40, %c0_41] : memref<128x512xf32, #tpu.memory_space<vmem>>, vector<128x512xf32>
    %cst_42 = arith.constant dense<0.000000e+00> : vector<8x512xf32>
    %70 = tpu.matmul %63, %69, %cst_42 {dimension_numbers = #tpu.dot_dimension_numbers<[1], [0], [0], [1], [0, 0, 1, 1], [], []>} : vector<8x128xf32>, vector<128x512xf32>, vector<8x512xf32> -> vector<8x512xf32>
    %71 = arith.addf %68, %70 : vector<8x512xf32>
    %72 = vector.extract_strided_slice %71 {offsets = [0, 0], sizes = [8, 128], strides = [1, 1]} : vector<8x512xf32> to vector<8x128xf32>
    %73 = arith.negf %72 : vector<8x128xf32>
    %74 = math.exp %73 : vector<8x128xf32>
    %cst_43 = arith.constant 1.000000e+00 : f32
    %75 = vector.broadcast %cst_43 : f32 to vector<8x128xf32>
    %76 = arith.addf %75, %74 : vector<8x128xf32>
    %77 = arith.divf %75, %76 : vector<8x128xf32>
    %78 = vector.extract_strided_slice %71 {offsets = [0, 128], sizes = [8, 128], strides = [1, 1]} : vector<8x512xf32> to vector<8x128xf32>
    %79 = arith.negf %78 : vector<8x128xf32>
    %80 = math.exp %79 : vector<8x128xf32>
    %cst_44 = arith.constant 1.000000e+00 : f32
    %81 = vector.broadcast %cst_44 : f32 to vector<8x128xf32>
    %82 = arith.addf %81, %80 : vector<8x128xf32>
    %83 = arith.divf %81, %82 : vector<8x128xf32>
    %84 = vector.extract_strided_slice %71 {offsets = [0, 256], sizes = [8, 128], strides = [1, 1]} : vector<8x512xf32> to vector<8x128xf32>
    %85 = math.tanh %84 : vector<8x128xf32>
    %86 = vector.extract_strided_slice %71 {offsets = [0, 384], sizes = [8, 128], strides = [1, 1]} : vector<8x512xf32> to vector<8x128xf32>
    %87 = arith.negf %86 : vector<8x128xf32>
    %88 = math.exp %87 : vector<8x128xf32>
    %cst_45 = arith.constant 1.000000e+00 : f32
    %89 = vector.broadcast %cst_45 : f32 to vector<8x128xf32>
    %90 = arith.addf %89, %88 : vector<8x128xf32>
    %91 = arith.divf %89, %90 : vector<8x128xf32>
    %92 = arith.mulf %83, %64 : vector<8x128xf32>
    %93 = arith.mulf %77, %85 : vector<8x128xf32>
    %94 = arith.addf %92, %93 : vector<8x128xf32>
    %95 = math.tanh %94 : vector<8x128xf32>
    %96 = arith.mulf %91, %95 : vector<8x128xf32>
    %97 = arith.index_cast %66 : i32 to index
    %c0_46 = arith.constant 0 : index
    %98 = vector.load %arg19[%97, %c0_46] : memref<64x128xf32, #tpu.memory_space<vmem>>, vector<8x128xf32>
    tpu.vector_store %arg19[%97, %c0_46], %96 {strides = array<i32>} : memref<64x128xf32, #tpu.memory_space<vmem>>, vector<8x128xf32>,
    %c1_i32 = arith.constant 1 : i32
    %c8_i32_47 = arith.constant 8 : i32
    %99 = arith.muli %c1_i32, %c8_i32_47 : i32
    %100 = tpu.assume_multiple %99, 8 : i32
    %101 = arith.index_cast %100 : i32 to index
    %c0_48 = arith.constant 0 : index
    %102 = vector.load %arg18[%101, %c0_48] : memref<64x512xf32, #tpu.memory_space<vmem>>, vector<8x512xf32>
    %c0_49 = arith.constant 0 : index
    %c0_50 = arith.constant 0 : index
    %103 = vector.load %arg12[%c0_49, %c0_50] : memref<128x512xf32, #tpu.memory_space<vmem>>, vector<128x512xf32>
    %cst_51 = arith.constant dense<0.000000e+00> : vector<8x512xf32>
    %104 = tpu.matmul %96, %103, %cst_51 {dimension_numbers = #tpu.dot_dimension_numbers<[1], [0], [0], [1], [0, 0, 1, 1], [], []>} : vector<8x128xf32>, vector<128x512xf32>, vector<8x512xf32> -> vector<8x512xf32>
    %105 = arith.addf %102, %104 : vector<8x512xf32>
    %106 = vector.extract_strided_slice %105 {offsets = [0, 0], sizes = [8, 128], strides = [1, 1]} : vector<8x512xf32> to vector<8x128xf32>
    %107 = arith.negf %106 : vector<8x128xf32>
    %108 = math.exp %107 : vector<8x128xf32>
    %cst_52 = arith.constant 1.000000e+00 : f32
    %109 = vector.broadcast %cst_52 : f32 to vector<8x128xf32>
    %110 = arith.addf %109, %108 : vector<8x128xf32>
    %111 = arith.divf %109, %110 : vector<8x128xf32>
    %112 = vector.extract_strided_slice %105 {offsets = [0, 128], sizes = [8, 128], strides = [1, 1]} : vector<8x512xf32> to vector<8x128xf32>
    %113 = arith.negf %112 : vector<8x128xf32>
    %114 = math.exp %113 : vector<8x128xf32>
    %cst_53 = arith.constant 1.000000e+00 : f32
    %115 = vector.broadcast %cst_53 : f32 to vector<8x128xf32>
    %116 = arith.addf %115, %114 : vector<8x128xf32>
    %117 = arith.divf %115, %116 : vector<8x128xf32>
    %118 = vector.extract_strided_slice %105 {offsets = [0, 256], sizes = [8, 128], strides = [1, 1]} : vector<8x512xf32> to vector<8x128xf32>
    %119 = math.tanh %118 : vector<8x128xf32>
    %120 = vector.extract_strided_slice %105 {offsets = [0, 384], sizes = [8, 128], strides = [1, 1]} : vector<8x512xf32> to vector<8x128xf32>
    %121 = arith.negf %120 : vector<8x128xf32>
    %122 = math.exp %121 : vector<8x128xf32>
    %cst_54 = arith.constant 1.000000e+00 : f32
    %123 = vector.broadcast %cst_54 : f32 to vector<8x128xf32>
    %124 = arith.addf %123, %122 : vector<8x128xf32>
    %125 = arith.divf %123, %124 : vector<8x128xf32>
    %126 = arith.mulf %117, %94 : vector<8x128xf32>
    %127 = arith.mulf %111, %119 : vector<8x128xf32>
    %128 = arith.addf %126, %127 : vector<8x128xf32>
    %129 = math.tanh %128 : vector<8x128xf32>
    %130 = arith.mulf %125, %129 : vector<8x128xf32>
    %131 = arith.index_cast %100 : i32 to index
    %c0_55 = arith.constant 0 : index
    %132 = vector.load %arg19[%131, %c0_55] : memref<64x128xf32, #tpu.memory_space<vmem>>, vector<8x128xf32>
    tpu.vector_store %arg19[%131, %c0_55], %130 {strides = array<i32>} : memref<64x128xf32, #tpu.memory_space<vmem>>, vector<8x128xf32>,
    %c2_i32 = arith.constant 2 : i32
    %c8_i32_56 = arith.constant 8 : i32
    %133 = arith.muli %c2_i32, %c8_i32_56 : i32
    %134 = tpu.assume_multiple %133, 8 : i32
    %135 = arith.index_cast %134 : i32 to index
    %c0_57 = arith.constant 0 : index
    %136 = vector.load %arg18[%135, %c0_57] : memref<64x512xf32, #tpu.memory_space<vmem>>, vector<8x512xf32>
    %c0_58 = arith.constant 0 : index
    %c0_59 = arith.constant 0 : index
    %137 = vector.load %arg12[%c0_58, %c0_59] : memref<128x512xf32, #tpu.memory_space<vmem>>, vector<128x512xf32>
    %cst_60 = arith.constant dense<0.000000e+00> : vector<8x512xf32>
    %138 = tpu.matmul %130, %137, %cst_60 {dimension_numbers = #tpu.dot_dimension_numbers<[1], [0], [0], [1], [0, 0, 1, 1], [], []>} : vector<8x128xf32>, vector<128x512xf32>, vector<8x512xf32> -> vector<8x512xf32>
    %139 = arith.addf %136, %138 : vector<8x512xf32>
    %140 = vector.extract_strided_slice %139 {offsets = [0, 0], sizes = [8, 128], strides = [1, 1]} : vector<8x512xf32> to vector<8x128xf32>
    %141 = arith.negf %140 : vector<8x128xf32>
    %142 = math.exp %141 : vector<8x128xf32>
    %cst_61 = arith.constant 1.000000e+00 : f32
    %143 = vector.broadcast %cst_61 : f32 to vector<8x128xf32>
    %144 = arith.addf %143, %142 : vector<8x128xf32>
    %145 = arith.divf %143, %144 : vector<8x128xf32>
    %146 = vector.extract_strided_slice %139 {offsets = [0, 128], sizes = [8, 128], strides = [1, 1]} : vector<8x512xf32> to vector<8x128xf32>
    %147 = arith.negf %146 : vector<8x128xf32>
    %148 = math.exp %147 : vector<8x128xf32>
    %cst_62 = arith.constant 1.000000e+00 : f32
    %149 = vector.broadcast %cst_62 : f32 to vector<8x128xf32>
    %150 = arith.addf %149, %148 : vector<8x128xf32>
    %151 = arith.divf %149, %150 : vector<8x128xf32>
    %152 = vector.extract_strided_slice %139 {offsets = [0, 256], sizes = [8, 128], strides = [1, 1]} : vector<8x512xf32> to vector<8x128xf32>
    %153 = math.tanh %152 : vector<8x128xf32>
    %154 = vector.extract_strided_slice %139 {offsets = [0, 384], sizes = [8, 128], strides = [1, 1]} : vector<8x512xf32> to vector<8x128xf32>
    %155 = arith.negf %154 : vector<8x128xf32>
    %156 = math.exp %155 : vector<8x128xf32>
    %cst_63 = arith.constant 1.000000e+00 : f32
    %157 = vector.broadcast %cst_63 : f32 to vector<8x128xf32>
    %158 = arith.addf %157, %156 : vector<8x128xf32>
    %159 = arith.divf %157, %158 : vector<8x128xf32>
    %160 = arith.mulf %151, %128 : vector<8x128xf32>
    %161 = arith.mulf %145, %153 : vector<8x128xf32>
    %162 = arith.addf %160, %161 : vector<8x128xf32>
    %163 = math.tanh %162 : vector<8x128xf32>
    %164 = arith.mulf %159, %163 : vector<8x128xf32>
    %165 = arith.index_cast %134 : i32 to index
    %c0_64 = arith.constant 0 : index
    %166 = vector.load %arg19[%165, %c0_64] : memref<64x128xf32, #tpu.memory_space<vmem>>, vector<8x128xf32>
    tpu.vector_store %arg19[%165, %c0_64], %164 {strides = array<i32>} : memref<64x128xf32, #tpu.memory_space<vmem>>, vector<8x128xf32>,
    %c3_i32 = arith.constant 3 : i32
    %c8_i32_65 = arith.constant 8 : i32
    %167 = arith.muli %c3_i32, %c8_i32_65 : i32
    %168 = tpu.assume_multiple %167, 8 : i32
    %169 = arith.index_cast %168 : i32 to index
    %c0_66 = arith.constant 0 : index
    %170 = vector.load %arg18[%169, %c0_66] : memref<64x512xf32, #tpu.memory_space<vmem>>, vector<8x512xf32>
    %c0_67 = arith.constant 0 : index
    %c0_68 = arith.constant 0 : index
    %171 = vector.load %arg12[%c0_67, %c0_68] : memref<128x512xf32, #tpu.memory_space<vmem>>, vector<128x512xf32>
    %cst_69 = arith.constant dense<0.000000e+00> : vector<8x512xf32>
    %172 = tpu.matmul %164, %171, %cst_69 {dimension_numbers = #tpu.dot_dimension_numbers<[1], [0], [0], [1], [0, 0, 1, 1], [], []>} : vector<8x128xf32>, vector<128x512xf32>, vector<8x512xf32> -> vector<8x512xf32>
    %173 = arith.addf %170, %172 : vector<8x512xf32>
    %174 = vector.extract_strided_slice %173 {offsets = [0, 0], sizes = [8, 128], strides = [1, 1]} : vector<8x512xf32> to vector<8x128xf32>
    %175 = arith.negf %174 : vector<8x128xf32>
    %176 = math.exp %175 : vector<8x128xf32>
    %cst_70 = arith.constant 1.000000e+00 : f32
    %177 = vector.broadcast %cst_70 : f32 to vector<8x128xf32>
    %178 = arith.addf %177, %176 : vector<8x128xf32>
    %179 = arith.divf %177, %178 : vector<8x128xf32>
    %180 = vector.extract_strided_slice %173 {offsets = [0, 128], sizes = [8, 128], strides = [1, 1]} : vector<8x512xf32> to vector<8x128xf32>
    %181 = arith.negf %180 : vector<8x128xf32>
    %182 = math.exp %181 : vector<8x128xf32>
    %cst_71 = arith.constant 1.000000e+00 : f32
    %183 = vector.broadcast %cst_71 : f32 to vector<8x128xf32>
    %184 = arith.addf %183, %182 : vector<8x128xf32>
    %185 = arith.divf %183, %184 : vector<8x128xf32>
    %186 = vector.extract_strided_slice %173 {offsets = [0, 256], sizes = [8, 128], strides = [1, 1]} : vector<8x512xf32> to vector<8x128xf32>
    %187 = math.tanh %186 : vector<8x128xf32>
    %188 = vector.extract_strided_slice %173 {offsets = [0, 384], sizes = [8, 128], strides = [1, 1]} : vector<8x512xf32> to vector<8x128xf32>
    %189 = arith.negf %188 : vector<8x128xf32>
    %190 = math.exp %189 : vector<8x128xf32>
    %cst_72 = arith.constant 1.000000e+00 : f32
    %191 = vector.broadcast %cst_72 : f32 to vector<8x128xf32>
    %192 = arith.addf %191, %190 : vector<8x128xf32>
    %193 = arith.divf %191, %192 : vector<8x128xf32>
    %194 = arith.mulf %185, %162 : vector<8x128xf32>
    %195 = arith.mulf %179, %187 : vector<8x128xf32>
    %196 = arith.addf %194, %195 : vector<8x128xf32>
    %197 = math.tanh %196 : vector<8x128xf32>
    %198 = arith.mulf %193, %197 : vector<8x128xf32>
    %199 = arith.index_cast %168 : i32 to index
    %c0_73 = arith.constant 0 : index
    %200 = vector.load %arg19[%199, %c0_73] : memref<64x128xf32, #tpu.memory_space<vmem>>, vector<8x128xf32>
    tpu.vector_store %arg19[%199, %c0_73], %198 {strides = array<i32>} : memref<64x128xf32, #tpu.memory_space<vmem>>, vector<8x128xf32>,
    %c4_i32 = arith.constant 4 : i32
    %c8_i32_74 = arith.constant 8 : i32
    %201 = arith.muli %c4_i32, %c8_i32_74 : i32
    %202 = tpu.assume_multiple %201, 8 : i32
    %203 = arith.index_cast %202 : i32 to index
    %c0_75 = arith.constant 0 : index
    %204 = vector.load %arg18[%203, %c0_75] : memref<64x512xf32, #tpu.memory_space<vmem>>, vector<8x512xf32>
    %c0_76 = arith.constant 0 : index
    %c0_77 = arith.constant 0 : index
    %205 = vector.load %arg12[%c0_76, %c0_77] : memref<128x512xf32, #tpu.memory_space<vmem>>, vector<128x512xf32>
    %cst_78 = arith.constant dense<0.000000e+00> : vector<8x512xf32>
    %206 = tpu.matmul %198, %205, %cst_78 {dimension_numbers = #tpu.dot_dimension_numbers<[1], [0], [0], [1], [0, 0, 1, 1], [], []>} : vector<8x128xf32>, vector<128x512xf32>, vector<8x512xf32> -> vector<8x512xf32>
    %207 = arith.addf %204, %206 : vector<8x512xf32>
    %208 = vector.extract_strided_slice %207 {offsets = [0, 0], sizes = [8, 128], strides = [1, 1]} : vector<8x512xf32> to vector<8x128xf32>
    %209 = arith.negf %208 : vector<8x128xf32>
    %210 = math.exp %209 : vector<8x128xf32>
    %cst_79 = arith.constant 1.000000e+00 : f32
    %211 = vector.broadcast %cst_79 : f32 to vector<8x128xf32>
    %212 = arith.addf %211, %210 : vector<8x128xf32>
    %213 = arith.divf %211, %212 : vector<8x128xf32>
    %214 = vector.extract_strided_slice %207 {offsets = [0, 128], sizes = [8, 128], strides = [1, 1]} : vector<8x512xf32> to vector<8x128xf32>
    %215 = arith.negf %214 : vector<8x128xf32>
    %216 = math.exp %215 : vector<8x128xf32>
    %cst_80 = arith.constant 1.000000e+00 : f32
    %217 = vector.broadcast %cst_80 : f32 to vector<8x128xf32>
    %218 = arith.addf %217, %216 : vector<8x128xf32>
    %219 = arith.divf %217, %218 : vector<8x128xf32>
    %220 = vector.extract_strided_slice %207 {offsets = [0, 256], sizes = [8, 128], strides = [1, 1]} : vector<8x512xf32> to vector<8x128xf32>
    %221 = math.tanh %220 : vector<8x128xf32>
    %222 = vector.extract_strided_slice %207 {offsets = [0, 384], sizes = [8, 128], strides = [1, 1]} : vector<8x512xf32> to vector<8x128xf32>
    %223 = arith.negf %222 : vector<8x128xf32>
    %224 = math.exp %223 : vector<8x128xf32>
    %cst_81 = arith.constant 1.000000e+00 : f32
    %225 = vector.broadcast %cst_81 : f32 to vector<8x128xf32>
    %226 = arith.addf %225, %224 : vector<8x128xf32>
    %227 = arith.divf %225, %226 : vector<8x128xf32>
    %228 = arith.mulf %219, %196 : vector<8x128xf32>
    %229 = arith.mulf %213, %221 : vector<8x128xf32>
    %230 = arith.addf %228, %229 : vector<8x128xf32>
    %231 = math.tanh %230 : vector<8x128xf32>
    %232 = arith.mulf %227, %231 : vector<8x128xf32>
    %233 = arith.index_cast %202 : i32 to index
    %c0_82 = arith.constant 0 : index
    %234 = vector.load %arg19[%233, %c0_82] : memref<64x128xf32, #tpu.memory_space<vmem>>, vector<8x128xf32>
    tpu.vector_store %arg19[%233, %c0_82], %232 {strides = array<i32>} : memref<64x128xf32, #tpu.memory_space<vmem>>, vector<8x128xf32>,
    %c5_i32 = arith.constant 5 : i32
    %c8_i32_83 = arith.constant 8 : i32
    %235 = arith.muli %c5_i32, %c8_i32_83 : i32
    %236 = tpu.assume_multiple %235, 8 : i32
    %237 = arith.index_cast %236 : i32 to index
    %c0_84 = arith.constant 0 : index
    %238 = vector.load %arg18[%237, %c0_84] : memref<64x512xf32, #tpu.memory_space<vmem>>, vector<8x512xf32>
    %c0_85 = arith.constant 0 : index
    %c0_86 = arith.constant 0 : index
    %239 = vector.load %arg12[%c0_85, %c0_86] : memref<128x512xf32, #tpu.memory_space<vmem>>, vector<128x512xf32>
    %cst_87 = arith.constant dense<0.000000e+00> : vector<8x512xf32>
    %240 = tpu.matmul %232, %239, %cst_87 {dimension_numbers = #tpu.dot_dimension_numbers<[1], [0], [0], [1], [0, 0, 1, 1], [], []>} : vector<8x128xf32>, vector<128x512xf32>, vector<8x512xf32> -> vector<8x512xf32>
    %241 = arith.addf %238, %240 : vector<8x512xf32>
    %242 = vector.extract_strided_slice %241 {offsets = [0, 0], sizes = [8, 128], strides = [1, 1]} : vector<8x512xf32> to vector<8x128xf32>
    %243 = arith.negf %242 : vector<8x128xf32>
    %244 = math.exp %243 : vector<8x128xf32>
    %cst_88 = arith.constant 1.000000e+00 : f32
    %245 = vector.broadcast %cst_88 : f32 to vector<8x128xf32>
    %246 = arith.addf %245, %244 : vector<8x128xf32>
    %247 = arith.divf %245, %246 : vector<8x128xf32>
    %248 = vector.extract_strided_slice %241 {offsets = [0, 128], sizes = [8, 128], strides = [1, 1]} : vector<8x512xf32> to vector<8x128xf32>
    %249 = arith.negf %248 : vector<8x128xf32>
    %250 = math.exp %249 : vector<8x128xf32>
    %cst_89 = arith.constant 1.000000e+00 : f32
    %251 = vector.broadcast %cst_89 : f32 to vector<8x128xf32>
    %252 = arith.addf %251, %250 : vector<8x128xf32>
    %253 = arith.divf %251, %252 : vector<8x128xf32>
    %254 = vector.extract_strided_slice %241 {offsets = [0, 256], sizes = [8, 128], strides = [1, 1]} : vector<8x512xf32> to vector<8x128xf32>
    %255 = math.tanh %254 : vector<8x128xf32>
    %256 = vector.extract_strided_slice %241 {offsets = [0, 384], sizes = [8, 128], strides = [1, 1]} : vector<8x512xf32> to vector<8x128xf32>
    %257 = arith.negf %256 : vector<8x128xf32>
    %258 = math.exp %257 : vector<8x128xf32>
    %cst_90 = arith.constant 1.000000e+00 : f32
    %259 = vector.broadcast %cst_90 : f32 to vector<8x128xf32>
    %260 = arith.addf %259, %258 : vector<8x128xf32>
    %261 = arith.divf %259, %260 : vector<8x128xf32>
    %262 = arith.mulf %253, %230 : vector<8x128xf32>
    %263 = arith.mulf %247, %255 : vector<8x128xf32>
    %264 = arith.addf %262, %263 : vector<8x128xf32>
    %265 = math.tanh %264 : vector<8x128xf32>
    %266 = arith.mulf %261, %265 : vector<8x128xf32>
    %267 = arith.index_cast %236 : i32 to index
    %c0_91 = arith.constant 0 : index
    %268 = vector.load %arg19[%267, %c0_91] : memref<64x128xf32, #tpu.memory_space<vmem>>, vector<8x128xf32>
    tpu.vector_store %arg19[%267, %c0_91], %266 {strides = array<i32>} : memref<64x128xf32, #tpu.memory_space<vmem>>, vector<8x128xf32>,
    %c6_i32 = arith.constant 6 : i32
    %c8_i32_92 = arith.constant 8 : i32
    %269 = arith.muli %c6_i32, %c8_i32_92 : i32
    %270 = tpu.assume_multiple %269, 8 : i32
    %271 = arith.index_cast %270 : i32 to index
    %c0_93 = arith.constant 0 : index
    %272 = vector.load %arg18[%271, %c0_93] : memref<64x512xf32, #tpu.memory_space<vmem>>, vector<8x512xf32>
    %c0_94 = arith.constant 0 : index
    %c0_95 = arith.constant 0 : index
    %273 = vector.load %arg12[%c0_94, %c0_95] : memref<128x512xf32, #tpu.memory_space<vmem>>, vector<128x512xf32>
    %cst_96 = arith.constant dense<0.000000e+00> : vector<8x512xf32>
    %274 = tpu.matmul %266, %273, %cst_96 {dimension_numbers = #tpu.dot_dimension_numbers<[1], [0], [0], [1], [0, 0, 1, 1], [], []>} : vector<8x128xf32>, vector<128x512xf32>, vector<8x512xf32> -> vector<8x512xf32>
    %275 = arith.addf %272, %274 : vector<8x512xf32>
    %276 = vector.extract_strided_slice %275 {offsets = [0, 0], sizes = [8, 128], strides = [1, 1]} : vector<8x512xf32> to vector<8x128xf32>
    %277 = arith.negf %276 : vector<8x128xf32>
    %278 = math.exp %277 : vector<8x128xf32>
    %cst_97 = arith.constant 1.000000e+00 : f32
    %279 = vector.broadcast %cst_97 : f32 to vector<8x128xf32>
    %280 = arith.addf %279, %278 : vector<8x128xf32>
    %281 = arith.divf %279, %280 : vector<8x128xf32>
    %282 = vector.extract_strided_slice %275 {offsets = [0, 128], sizes = [8, 128], strides = [1, 1]} : vector<8x512xf32> to vector<8x128xf32>
    %283 = arith.negf %282 : vector<8x128xf32>
    %284 = math.exp %283 : vector<8x128xf32>
    %cst_98 = arith.constant 1.000000e+00 : f32
    %285 = vector.broadcast %cst_98 : f32 to vector<8x128xf32>
    %286 = arith.addf %285, %284 : vector<8x128xf32>
    %287 = arith.divf %285, %286 : vector<8x128xf32>
    %288 = vector.extract_strided_slice %275 {offsets = [0, 256], sizes = [8, 128], strides = [1, 1]} : vector<8x512xf32> to vector<8x128xf32>
    %289 = math.tanh %288 : vector<8x128xf32>
    %290 = vector.extract_strided_slice %275 {offsets = [0, 384], sizes = [8, 128], strides = [1, 1]} : vector<8x512xf32> to vector<8x128xf32>
    %291 = arith.negf %290 : vector<8x128xf32>
    %292 = math.exp %291 : vector<8x128xf32>
    %cst_99 = arith.constant 1.000000e+00 : f32
    %293 = vector.broadcast %cst_99 : f32 to vector<8x128xf32>
    %294 = arith.addf %293, %292 : vector<8x128xf32>
    %295 = arith.divf %293, %294 : vector<8x128xf32>
    %296 = arith.mulf %287, %264 : vector<8x128xf32>
    %297 = arith.mulf %281, %289 : vector<8x128xf32>
    %298 = arith.addf %296, %297 : vector<8x128xf32>
    %299 = math.tanh %298 : vector<8x128xf32>
    %300 = arith.mulf %295, %299 : vector<8x128xf32>
    %301 = arith.index_cast %270 : i32 to index
    %c0_100 = arith.constant 0 : index
    %302 = vector.load %arg19[%301, %c0_100] : memref<64x128xf32, #tpu.memory_space<vmem>>, vector<8x128xf32>
    tpu.vector_store %arg19[%301, %c0_100], %300 {strides = array<i32>} : memref<64x128xf32, #tpu.memory_space<vmem>>, vector<8x128xf32>,
    %c7_i32 = arith.constant 7 : i32
    %c8_i32_101 = arith.constant 8 : i32
    %303 = arith.muli %c7_i32, %c8_i32_101 : i32
    %304 = tpu.assume_multiple %303, 8 : i32
    %305 = arith.index_cast %304 : i32 to index
    %c0_102 = arith.constant 0 : index
    %306 = vector.load %arg18[%305, %c0_102] : memref<64x512xf32, #tpu.memory_space<vmem>>, vector<8x512xf32>
    %c0_103 = arith.constant 0 : index
    %c0_104 = arith.constant 0 : index
    %307 = vector.load %arg12[%c0_103, %c0_104] : memref<128x512xf32, #tpu.memory_space<vmem>>, vector<128x512xf32>
    %cst_105 = arith.constant dense<0.000000e+00> : vector<8x512xf32>
    %308 = tpu.matmul %300, %307, %cst_105 {dimension_numbers = #tpu.dot_dimension_numbers<[1], [0], [0], [1], [0, 0, 1, 1], [], []>} : vector<8x128xf32>, vector<128x512xf32>, vector<8x512xf32> -> vector<8x512xf32>
    %309 = arith.addf %306, %308 : vector<8x512xf32>
    %310 = vector.extract_strided_slice %309 {offsets = [0, 0], sizes = [8, 128], strides = [1, 1]} : vector<8x512xf32> to vector<8x128xf32>
    %311 = arith.negf %310 : vector<8x128xf32>
    %312 = math.exp %311 : vector<8x128xf32>
    %cst_106 = arith.constant 1.000000e+00 : f32
    %313 = vector.broadcast %cst_106 : f32 to vector<8x128xf32>
    %314 = arith.addf %313, %312 : vector<8x128xf32>
    %315 = arith.divf %313, %314 : vector<8x128xf32>
    %316 = vector.extract_strided_slice %309 {offsets = [0, 128], sizes = [8, 128], strides = [1, 1]} : vector<8x512xf32> to vector<8x128xf32>
    %317 = arith.negf %316 : vector<8x128xf32>
    %318 = math.exp %317 : vector<8x128xf32>
    %cst_107 = arith.constant 1.000000e+00 : f32
    %319 = vector.broadcast %cst_107 : f32 to vector<8x128xf32>
    %320 = arith.addf %319, %318 : vector<8x128xf32>
    %321 = arith.divf %319, %320 : vector<8x128xf32>
    %322 = vector.extract_strided_slice %309 {offsets = [0, 256], sizes = [8, 128], strides = [1, 1]} : vector<8x512xf32> to vector<8x128xf32>
    %323 = math.tanh %322 : vector<8x128xf32>
    %324 = vector.extract_strided_slice %309 {offsets = [0, 384], sizes = [8, 128], strides = [1, 1]} : vector<8x512xf32> to vector<8x128xf32>
    %325 = arith.negf %324 : vector<8x128xf32>
    %326 = math.exp %325 : vector<8x128xf32>
    %cst_108 = arith.constant 1.000000e+00 : f32
    %327 = vector.broadcast %cst_108 : f32 to vector<8x128xf32>
    %328 = arith.addf %327, %326 : vector<8x128xf32>
    %329 = arith.divf %327, %328 : vector<8x128xf32>
    %330 = arith.mulf %321, %298 : vector<8x128xf32>
    %331 = arith.mulf %315, %323 : vector<8x128xf32>
    %332 = arith.addf %330, %331 : vector<8x128xf32>
    %333 = math.tanh %332 : vector<8x128xf32>
    %334 = arith.mulf %329, %333 : vector<8x128xf32>
    %335 = arith.index_cast %304 : i32 to index
    %c0_109 = arith.constant 0 : index
    %336 = vector.load %arg19[%335, %c0_109] : memref<64x128xf32, #tpu.memory_space<vmem>>, vector<8x128xf32>
    tpu.vector_store %arg19[%335, %c0_109], %334 {strides = array<i32>} : memref<64x128xf32, #tpu.memory_space<vmem>>, vector<8x128xf32>,
    %c8_i32_110 = arith.constant 8 : i32
    %c0_111 = arith.constant 0 : index
    %c0_112 = arith.constant 0 : index
    %337 = vector.load %arg19[%c0_111, %c0_112] : memref<64x128xf32, #tpu.memory_space<vmem>>, vector<64x128xf32>
    %c0_113 = arith.constant 0 : index
    %c0_114 = arith.constant 0 : index
    %338 = vector.load %arg13[%c0_113, %c0_114] : memref<128x32xf32, #tpu.memory_space<vmem>>, vector<128x32xf32>
    %cst_115 = arith.constant dense<0.000000e+00> : vector<64x32xf32>
    %339 = tpu.matmul %337, %338, %cst_115 {dimension_numbers = #tpu.dot_dimension_numbers<[1], [0], [0], [1], [0, 0, 1, 1], [], []>} : vector<64x128xf32>, vector<128x32xf32>, vector<64x32xf32> -> vector<64x32xf32>
    %c0_116 = arith.constant 0 : index
    %c0_117 = arith.constant 0 : index
    %340 = vector.load %arg14[%c0_116, %c0_117] : memref<1x32xf32, #tpu.memory_space<vmem>>, vector<1x32xf32>
    %341 = vector.broadcast %340 : vector<1x32xf32> to vector<64x32xf32>
    %342 = arith.addf %339, %341 : vector<64x32xf32>
    %cst_118 = arith.constant 0.000000e+00 : f32
    %343 = vector.broadcast %cst_118 : f32 to vector<64x32xf32>
    %344 = arith.maximumf %342, %343 : vector<64x32xf32>
    %c0_119 = arith.constant 0 : index
    %c0_120 = arith.constant 0 : index
    %345 = vector.load %arg15[%c0_119, %c0_120] : memref<32x128xf32, #tpu.memory_space<vmem>>, vector<32x128xf32>
    %cst_121 = arith.constant dense<0.000000e+00> : vector<64x128xf32>
    %346 = tpu.matmul %344, %345, %cst_121 {dimension_numbers = #tpu.dot_dimension_numbers<[1], [0], [0], [1], [0, 0, 1, 1], [], []>} : vector<64x32xf32>, vector<32x128xf32>, vector<64x128xf32> -> vector<64x128xf32>
    %c0_122 = arith.constant 0 : index
    %c0_123 = arith.constant 0 : index
    %347 = vector.load %arg16[%c0_122, %c0_123] : memref<1x128xf32, #tpu.memory_space<vmem>>, vector<1x128xf32>
    %348 = vector.broadcast %347 : vector<1x128xf32> to vector<64x128xf32>
    %349 = arith.addf %346, %348 : vector<64x128xf32>
    %350 = tpu.iota {dimensions = array<i32: 1>} : vector<64x128xi32>
    %c8_i32_124 = arith.constant 8 : i32
    %351 = vector.broadcast %c8_i32_124 : i32 to vector<64x128xi32>
    %352 = arith.cmpi sge, %350, %351 : vector<64x128xi32>
    %c16_i32_125 = arith.constant 16 : i32
    %353 = vector.broadcast %c16_i32_125 : i32 to vector<64x128xi32>
    %354 = arith.cmpi slt, %350, %353 : vector<64x128xi32>
    %355 = arith.andi %352, %354 : vector<64x128xi1>
    %cst_126 = arith.constant 0.000000e+00 : f32
    %356 = vector.broadcast %cst_126 : f32 to vector<64x128xf32>
    %357 = arith.maximumf %349, %356 : vector<64x128xf32>
    %358 = vector.broadcast %cst_126 : f32 to vector<64x128xf32>
    %359 = arith.subf %349, %358 : vector<64x128xf32>
    %360 = arith.cmpf one, %359, %359 : vector<64x128xf32>
    %361 = vector.broadcast %cst_126 : f32 to vector<64x128xf32>
    %362 = arith.addf %349, %361 : vector<64x128xf32>
    %363 = math.absf %359 : vector<64x128xf32>
    %cst_127 = arith.constant 0.000000e+00 : f32
    %364 = vector.broadcast %cst_127 : f32 to vector<64x128xf32>
    %365 = arith.subf %364, %363 : vector<64x128xf32>
    %366 = math.exp %365 : vector<64x128xf32>
    %367 = math.log1p %366 : vector<64x128xf32>
    %368 = arith.addf %357, %367 : vector<64x128xf32>
    %369 = arith.select %360, %362, %368 : vector<64x128xi1>, vector<64x128xf32>
    %370 = arith.select %355, %369, %349 : vector<64x128xi1>, vector<64x128xf32>
    %c0_128 = arith.constant 0 : index
    %c0_129 = arith.constant 0 : index
    %371 = vector.load %arg17[%c0_128, %c0_129] : memref<64x128xf32, #tpu.memory_space<vmem>>, vector<64x128xf32>
    tpu.vector_store %arg17[%c0_128, %c0_129], %370 {strides = array<i32>} : memref<64x128xf32, #tpu.memory_space<vmem>>, vector<64x128xf32>,
    return
  }
  func.func @transform_0(%arg0: i32) -> (i32, i32) {
    %c0_i32 = arith.constant 0 : i32
    %c0_i32_0 = arith.constant 0 : i32
    return %arg0, %c0_i32 : i32, i32
  }
  func.func @transform_1(%arg0: i32) -> (i32, i32) {
    %c0_i32 = arith.constant 0 : i32
    %c0_i32_0 = arith.constant 0 : i32
    %c0_i32_1 = arith.constant 0 : i32
    return %c0_i32, %c0_i32_0 : i32, i32
  }
  func.func @transform_2(%arg0: i32) -> (i32, i32) {
    %c0_i32 = arith.constant 0 : i32
    %c0_i32_0 = arith.constant 0 : i32
    %c0_i32_1 = arith.constant 0 : i32
    return %c0_i32, %c0_i32_0 : i32, i32
  }
  func.func @transform_3(%arg0: i32) -> (i32, i32) {
    %c0_i32 = arith.constant 0 : i32
    %c0_i32_0 = arith.constant 0 : i32
    %c0_i32_1 = arith.constant 0 : i32
    return %c0_i32, %c0_i32_0 : i32, i32
  }
  func.func @transform_4(%arg0: i32) -> (i32, i32) {
    %c0_i32 = arith.constant 0 : i32
    %c0_i32_0 = arith.constant 0 : i32
    %c0_i32_1 = arith.constant 0 : i32
    return %c0_i32, %c0_i32_0 : i32, i32
  }
  func.func @transform_5(%arg0: i32) -> (i32, i32) {
    %c0_i32 = arith.constant 0 : i32
    %c0_i32_0 = arith.constant 0 : i32
    %c0_i32_1 = arith.constant 0 : i32
    return %c0_i32, %c0_i32_0 : i32, i32
  }
  func.func @transform_6(%arg0: i32) -> (i32, i32) {
    %c0_i32 = arith.constant 0 : i32
    %c0_i32_0 = arith.constant 0 : i32
    %c0_i32_1 = arith.constant 0 : i32
    return %c0_i32, %c0_i32_0 : i32, i32
  }
  func.func @transform_7(%arg0: i32) -> (i32, i32) {
    %c0_i32 = arith.constant 0 : i32
    %c0_i32_0 = arith.constant 0 : i32
    %c0_i32_1 = arith.constant 0 : i32
    return %c0_i32, %c0_i32_0 : i32, i32
  }
  func.func @transform_8(%arg0: i32) -> (i32, i32) {
    %c0_i32 = arith.constant 0 : i32
    %c0_i32_0 = arith.constant 0 : i32
    %c0_i32_1 = arith.constant 0 : i32
    return %c0_i32, %c0_i32_0 : i32, i32
  }
  func.func @transform_9(%arg0: i32) -> (i32, i32) {
    %c0_i32 = arith.constant 0 : i32
    %c0_i32_0 = arith.constant 0 : i32
    %c0_i32_1 = arith.constant 0 : i32
    return %c0_i32, %c0_i32_0 : i32, i32
  }
  func.func @transform_10(%arg0: i32) -> (i32, i32) {
    %c0_i32 = arith.constant 0 : i32
    %c0_i32_0 = arith.constant 0 : i32
    %c0_i32_1 = arith.constant 0 : i32
    return %c0_i32, %c0_i32_0 : i32, i32
  }
  func.func @transform_11(%arg0: i32) -> (i32, i32) {
    %c0_i32 = arith.constant 0 : i32
    %c0_i32_0 = arith.constant 0 : i32
    %c0_i32_1 = arith.constant 0 : i32
    return %c0_i32, %c0_i32_0 : i32, i32
  }
  func.func @transform_12(%arg0: i32) -> (i32, i32) {
    %c0_i32 = arith.constant 0 : i32
    %c0_i32_0 = arith.constant 0 : i32
    %c0_i32_1 = arith.constant 0 : i32
    return %c0_i32, %c0_i32_0 : i32, i32
  }
  func.func @transform_13(%arg0: i32) -> (i32, i32) {
    %c0_i32 = arith.constant 0 : i32
    %c0_i32_0 = arith.constant 0 : i32
    %c0_i32_1 = arith.constant 0 : i32
    return %c0_i32, %c0_i32_0 : i32, i32
  }
  func.func @transform_14(%arg0: i32) -> (i32, i32) {
    %c0_i32 = arith.constant 0 : i32
    %c0_i32_0 = arith.constant 0 : i32
    %c0_i32_1 = arith.constant 0 : i32
    return %c0_i32, %c0_i32_0 : i32, i32
  }
  func.func @transform_15(%arg0: i32) -> (i32, i32) {
    %c0_i32 = arith.constant 0 : i32
    %c0_i32_0 = arith.constant 0 : i32
    %c0_i32_1 = arith.constant 0 : i32
    return %c0_i32, %c0_i32_0 : i32, i32
  }
  func.func @transform_16(%arg0: i32) -> (i32, i32) {
    %c0_i32 = arith.constant 0 : i32
    %c0_i32_0 = arith.constant 0 : i32
    return %arg0, %c0_i32 : i32, i32
  }
}

</mosaic_0001>

<bundles_post_ra>
// kernel: lstm_baseline_forward.1
= control target key start
LH: loop header
LB: loop body
LE: loop exit
PB: predicated region body
PF: predicated region fallthrough
CT: control target
= control target key end

     0   :  { %s4061_s21 = smov 0   ;;  %s6525_s0 = inlined_call_operand.vmem [shape: f32[128,20], index: 0, kind: input, shape index: {}]   ;;  %s6526_s1 = inlined_call_operand.vmem [shape: f32[20,64], index: 1, kind: input, shape index: {}]   ;;  %s6527_s2 = inlined_call_operand.vmem [shape: f32[1,64], index: 2, kind: input, shape index: {}]   ;;  %s6528_s3 = inlined_call_operand.vmem [shape: f32[64,32], index: 3, kind: input, shape index: {}]   ;;  %s6529_s4 = inlined_call_operand.vmem [shape: f32[1,32], index: 4, kind: input, shape index: {}]   ;;  %s6530_s5 = inlined_call_operand.vmem [shape: f32[32,32], index: 5, kind: input, shape index: {}]   ;;  %s6531_s6 = inlined_call_operand.vmem [shape: f32[1,32], index: 6, kind: input, shape index: {}]   ;;  %s6532_s7 = inlined_call_operand.vmem [shape: f32[32,32], index: 7, kind: input, shape index: {}]   ;;  %s6533_s8 = inlined_call_operand.vmem [shape: f32[1,32], index: 8, kind: input, shape index: {}]   ;;  %s6534_s9 = inlined_call_operand.vmem [shape: f32[32,512], index: 9, kind: input, shape index: {}]   ;;  %s6535_s10 = inlined_call_operand.vmem [shape: f32[1,512], index: 10, kind: input, shape index: {}]   ;;  %s6536_s11 = inlined_call_operand.vmem [shape: f32[128,512], index: 11, kind: input, shape index: {}]   ;;  %s6537_s12 = inlined_call_operand.vmem [shape: f32[128,32], index: 12, kind: input, shape index: {}]   ;;  %s6538_s13 = inlined_call_operand.vmem [shape: f32[1,32], index: 13, kind: input, shape index: {}]   ;;  %s6539_s14 = inlined_call_operand.vmem [shape: f32[32,128], index: 14, kind: input, shape index: {}]   ;;  %s6540_s15 = inlined_call_operand.vmem [shape: f32[1,128], index: 15, kind: input, shape index: {}]   ;;  %s6541_s16 = inlined_call_operand.vmem [shape: f32[128,128], index: 16, kind: output, shape index: {}]  }
   0x1   :  { %6601 = sst [smem:[#allocation37_spill]] %s6525_s0 }
   0x2 LB: > { %s3626_s22 = sadd.s32 4294967295, %s3973_s21   ;;  %p3630_p0 = scmp.ge.s32.totalorder %s3973_s21, 1  ;;  %s3973_s21 = sphi %s4061_s21, %s26_s21  }
   0x3   : > { %p463_p1 = scmp.lt.s32.totalorder %s3973_s21, 3 }
   0x5   : > { %p464_p2 = pnand %p3630_p0, %p463_p1 }
   0x7   : > { %467 = sbr.rel (%p464_p2) target bundleno = 2594 (0xa22), region = 84 }
   0xc   : > { %v535_v0 = vld [vmem:[%s6526_s1 + $0x10] sm:$0xf]  ;;  %vm565_vm0 = vcmask 1043456   ;;  %v534_v1 = vld [vmem:[%s6526_s1 + $0x8] sm:$0xff]  ;;  %s3631_s27 = sshll.u32 %s3626_s22, 3  ;;  %v533_v2 = vld [vmem:[%s6526_s1] sm:$0xff]  ;;  %v696_v44 = vlaneseq }
   0xd   : > { %3635 = vmatpush.msk.msra.mxu0 %vm565_vm0, %v535_v0  ;;  %p514_p3 = scmp.lt.s32.totalorder %s3631_s27, 15  ;;  %3734 = vmatpush.msk.msra.mxu1 %vm565_vm0, %v535_v0  ;;  %vm540_vm1 = vcmask 162816   ;;  %s6602_s18 = sld [smem:[#allocation37_spill]]  ;;  %v625_v6 = vld [vmem:[%s6528_s3 + $0x38] sm:$0xff]  ;;  %v624_v7 = vld [vmem:[%s6528_s3 + $0x30] sm:$0xff]  ;;  %v623_v8 = vld [vmem:[%s6528_s3 + $0x28] sm:$0xff] }
   0xe   : > { %3735 = vmatpush.msk.msra.mxu3 %vm565_vm0, %v535_v0  ;;  %v622_v11 = vld [vmem:[%s6528_s3 + $0x20] sm:$0xff]  ;;  %v621_v12 = vld [vmem:[%s6528_s3 + $0x18] sm:$0xff]  ;;  %v620_v13 = vld [vmem:[%s6528_s3 + $0x10] sm:$0xff]  ;;  %vm630_vm2 = vcmask 523264   ;;  %v4134_v46 = vand.u32 127, %v696_v44  ;;  %vm715_vm4 = vcmask 261120  }
   0xf   : > { %583 = vmatpush.msra.mxu0 %v534_v1  ;;  %s6728_s27 = smov (!%p514_p3, %s3631_s27), 15  ;;  %3736 = vmatpush.msra.mxu1 %v534_v1  ;;  %v619_v17 = vld [vmem:[%s6528_s3 + $0x8] sm:$0xff]  ;;  %v618_v18 = vld [vmem:[%s6528_s3] sm:$0xff] }
  0x10   : > { %3737 = vmatpush.msra.mxu3 %v534_v1  ;;  %s3632_s30 = sshll.u32 %s6728_s27, 3  ;;  %v3753_v19 = vld [vmem:[%s6527_s2] ss:$0 sm:$0xff]  ;;  %6603 = vst [vmem:[#allocation4_spill] sm:$0xff] %v4134_v46  ;;  %vm698_vm3 = vcmp.lt.s32.totalorder %v4134_v46, 16 }
  0x11   : > { %584 = vmatpush.msra.mxu0 %v533_v2  ;;  %3738 = vmatpush.msra.mxu1 %v533_v2  ;;  %v4132_v45 = vld [vmem:[%s6529_s4] ss:$0 sm:$0xff]  ;;  %s6459_s22 = scalar_lea.vmem %s6541_s16, %s3632_s30 }
  0x12   : > { %3739 = vmatpush.msra.mxu3 %v533_v2 }
  0x13   : > { %s517_s19 = scalar_lea.vmem %s6602_s18, %s3632_s30  ;;  %663 = vmatpush.msrb.mxu1 %v625_v6 }
  0x14   : > { %v525_v3 = vld [vmem:[%s517_s19] sm:$0xff]  ;;  %v526_v4 = vld [vmem:[%s517_s19 + $0x8] sm:$0xff]  ;;  %v528_v5 = vld [vmem:[%s517_s19 + $0x18] sm:$0xff] }
  0x15   : > { %3636 = vmatmul.msk.f32.vlgmr.msra.gmra.mxu0 %vm540_vm1, %v525_v3  ;;  %3637 = vmatmul.msk.f32.vlgmr.msra.gmra.mxu1 %vm540_vm1, %v526_v4  ;;  %v527_v9 = vld [vmem:[%s517_s19 + $0x10] sm:$0xff]  ;;  %v529_v10 = vld [vmem:[%s517_s19 + $0x20] sm:$0xff]  ;;  %v530_v14 = vld [vmem:[%s517_s19 + $0x28] sm:$0xff] }
  0x16   : > { %3639 = vmatmul.msk.f32.vlgmr.msra.gmra.mxu3 %vm540_vm1, %v528_v5  ;;  %664 = vmatpush.msrb.mxu1 %v624_v7  ;;  %v531_v15 = vld [vmem:[%s517_s19 + $0x30] sm:$0xff]  ;;  %v532_v16 = vld [vmem:[%s517_s19 + $0x38] sm:$0xff] }
  0x18   : > { %665 = vmatpush.msrb.mxu1 %v623_v8 }
  0x1a   : > { %666 = vmatpush.msrb.mxu1 %v622_v11  ;;  %v967_v11 = vld [vmem:[%s6530_s5 + $0x18] sm:$0xff] }
  0x1b   : > { %3740 = vmatpush.msra.mxu2 %v967_v11 }
  0x1c   : > { %667 = vmatpush.msrb.mxu1 %v621_v12  ;;  %v966_v12 = vld [vmem:[%s6530_s5 + $0x10] sm:$0xff] }
  0x1d   : > { %3638 = vmatmul.msk.f32.gmra.mxu1 %vm540_vm1, %v527_v9  ;;  %3741 = vmatpush.msra.mxu2 %v966_v12 }
  0x1e   : > { %3640 = vmatmul.msk.f32.gmra.mxu3 %vm540_vm1, %v529_v10  ;;  %668 = vmatpush.msrb.mxu1 %v620_v13 }
  0x20   : > { %669 = vmatpush.msrb.mxu1 %v619_v17 }
  0x22   : > { %670 = vmatpush.msrb.mxu1 %v618_v18 }
  0x24   : > { %1008 = vmatpush.msra.mxu1 %v967_v11 }
  0x26   : > { %3641 = vmatmul.msk.f32.gmra.mxu3 %vm540_vm1, %v530_v14  ;;  %1009 = vmatpush.msra.mxu1 %v966_v12 }
  0x2e   : > { %3642 = vmatmul.msk.f32.gmra.mxu3 %vm540_vm1, %v531_v15  ;;  %v965_v15 = vld [vmem:[%s6530_s5 + $0x8] sm:$0xff] }
  0x2f   : > { %1010 = vmatpush.msra.mxu1 %v965_v15  ;;  %3742 = vmatpush.msra.mxu2 %v965_v15 }
  0x36   : > { %3643 = vmatmul.msk.f32.gmra.mxu3 %vm540_vm1, %v532_v16 }
  0x92   : > { %v586_v20 = vpop.f32.mrf.mxu0  ;;  %v589_v21 = vpop.f32.mrf.mxu1 }
  0x93   : > { %v587_v22 = vadd.f32 %v3753_v19, %v586_v20  ;;  %v590_v24 = vadd.f32 %v3753_v19, %v589_v21 }
  0x95   : > { %v610_v23 = vmax.f32 %v587_v22, 0.0  ;;  %v611_v25 = vmax.f32 %v590_v24, 0.0 }
  0x97   : > { %3644 = vmatmul.msk.f32.vlgmr.msrb.gmra.mxu1 %vm630_vm2, %v610_v23 }
  0x99   : > { %v595_v27 = vpop.f32.mrf.mxu3 }
  0x9a   : > { %v592_v26 = vpop.f32.mrf.mxu1  ;;  %v596_v31 = vadd.f32 %v3753_v19, %v595_v27 }
  0x9b   : > { %v593_v28 = vadd.f32 %v3753_v19, %v592_v26 }
  0x9c   : > { %v613_v32 = vmax.f32 %v596_v31, 0.0 }
  0x9d   : > { %v612_v29 = vmax.f32 %v593_v28, 0.0 }
  0x9f   : > { %3645 = vmatmul.msk.f32.gmra.mxu1 %vm630_vm2, %v611_v25 }
  0xa1   : > { %v598_v30 = vpop.f32.mrf.mxu3 }
  0xa2   : > { %v599_v33 = vadd.f32 %v3753_v19, %v598_v30 }
  0xa4   : > { %v614_v35 = vmax.f32 %v599_v33, 0.0 }
  0xa7   : > { %3646 = vmatmul.msk.f32.gmra.mxu1 %vm630_vm2, %v612_v29 }
  0xa9   : > { %v601_v34 = vpop.f32.mrf.mxu3 }
  0xaa   : > { %v602_v36 = vadd.f32 %v3753_v19, %v601_v34 }
  0xac   : > { %v615_v38 = vmax.f32 %v602_v36, 0.0 }
  0xaf   : > { %3647 = vmatmul.msk.f32.gmra.mxu1 %vm630_vm2, %v613_v32 }
  0xb1   : > { %v604_v37 = vpop.f32.mrf.mxu3 }
  0xb2   : > { %v605_v39 = vadd.f32 %v3753_v19, %v604_v37 }
  0xb4   : > { %v616_v40 = vmax.f32 %v605_v39, 0.0 }
  0xb7   : > { %3648 = vmatmul.msk.f32.gmra.mxu1 %vm630_vm2, %v614_v35 }
  0xb9   : > { %v607_v41 = vpop.f32.mrf.mxu3 }
  0xba   : > { %v608_v42 = vadd.f32 %v3753_v19, %v607_v41 }
  0xbc   : > { %v617_v43 = vmax.f32 %v608_v42, 0.0  ;;  %v964_v42 = vld [vmem:[%s6530_s5] sm:$0xff] }
  0xbd   : > { %1011 = vmatpush.msra.mxu1 %v964_v42  ;;  %3743 = vmatpush.msra.mxu2 %v964_v42 }
  0xbf   : > { %3649 = vmatmul.msk.f32.gmra.mxu1 %vm630_vm2, %v615_v38 }
  0xc7   : > { %3650 = vmatmul.msk.f32.gmra.mxu1 %vm630_vm2, %v616_v40 }
  0xcf   : > { %3651 = vmatmul.msk.f32.gmra.mxu1 %vm630_vm2, %v617_v43 }
 0x114   : > { %v672_v47 = vpop.f32.mrf.mxu1 }
 0x115   : > { %v4137_v48 = vadd.f32 %v4132_v45, %v672_v47 }
 0x117   : > { %v699_v49 = vmul.f32 %v4137_v48, %v4137_v48 }
 0x119   : > { %v707_v50 = vsel %vm698_vm3, %v699_v49, 0.0  ;;  %v740_v55 = vsel %vm698_vm3, 0.0, %v699_v49 }
 0x11a   : > { %v716_v51 = vsel %vm715_vm4, %v707_v50, 0.0  ;;  %v748_v58 = vsel %vm715_vm4, %v740_v55, 0.0 }
 0x11b   : > { %717 = vadd.xlane.f32.xlu0 %v716_v51 }
 0x11c   : > { %v675_v52 = vpop.f32.mrf.mxu1 }
 0x11d   : > { %v4146_v53 = vadd.f32 %v4132_v45, %v675_v52 }
 0x11f   : > { %v700_v54 = vmul.f32 %v4146_v53, %v4146_v53 }
 0x121   : > { %v708_v56 = vsel %vm698_vm3, %v700_v54, 0.0  ;;  %v741_v62 = vsel %vm698_vm3, 0.0, %v700_v54 }
 0x122   : > { %v719_v57 = vsel %vm715_vm4, %v708_v56, 0.0  ;;  %v751_v1 = vsel %vm715_vm4, %v741_v62, 0.0 }
 0x123   : > { %720 = vadd.xlane.f32.xlu1 %v719_v57  ;;  %749 = vadd.xlane.f32.xlu0 %v748_v58 }
 0x124   : > { %v678_v59 = vpop.f32.mrf.mxu1 }
 0x125   : > { %v4157_v60 = vadd.f32 %v4132_v45, %v678_v59 }
 0x127   : > { %v701_v61 = vmul.f32 %v4157_v60, %v4157_v60 }
 0x129   : > { %v709_v63 = vsel %vm698_vm3, %v701_v61, 0.0  ;;  %v742_v5 = vsel %vm698_vm3, 0.0, %v701_v61 }
 0x12a   : > { %v722_v0 = vsel %vm715_vm4, %v709_v63, 0.0  ;;  %v754_v8 = vsel %vm715_vm4, %v742_v5, 0.0 }
 0x12b   : > { %723 = vadd.xlane.f32.xlu2 %v722_v0  ;;  %752 = vadd.xlane.f32.xlu1 %v751_v1 }
 0x12c   : > { %v681_v2 = vpop.f32.mrf.mxu1 }
 0x12d   : > { %v4168_v3 = vadd.f32 %v4132_v45, %v681_v2 }
 0x12f   : > { %v702_v4 = vmul.f32 %v4168_v3, %v4168_v3 }
 0x131   : > { %v743_v6 = vsel %vm698_vm3, 0.0, %v702_v4  ;;  %v710_v7 = vsel %vm698_vm3, %v702_v4, 0.0 }
 0x132   : > { %v757_v9 = vsel %vm715_vm4, %v743_v6, 0.0  ;;  %v725_v10 = vsel %vm715_vm4, %v710_v7, 0.0 }
 0x133   : > { %755 = vadd.xlane.f32.xlu2 %v754_v8  ;;  %758 = vadd.xlane.f32.xlu1 %v757_v9 }
 0x134   : > { %726 = vadd.xlane.f32.xlu0 %v725_v10  ;;  %v684_v13 = vpop.f32.mrf.mxu1 }
 0x135   : > { %v4188_v14 = vadd.f32 %v4132_v45, %v684_v13 }
 0x137   : > { %v703_v16 = vmul.f32 %v4188_v14, %v4188_v14 }
 0x139   : > { %v711_v17 = vsel %vm698_vm3, %v703_v16, 0.0  ;;  %v744_v18 = vsel %vm698_vm3, 0.0, %v703_v16 }
 0x13a   : > { %v728_v19 = vsel %vm715_vm4, %v711_v17, 0.0  ;;  %v760_v20 = vsel %vm715_vm4, %v744_v18, 0.0 }
 0x13b   : > { %729 = vadd.xlane.f32.xlu2 %v728_v19 }
 0x13c   : > { %761 = vadd.xlane.f32.xlu0 %v760_v20  ;;  %v687_v21 = vpop.f32.mrf.mxu1 }
 0x13d   : > { %v4202_v22 = vadd.f32 %v4132_v45, %v687_v21 }
 0x13f   : > { %v704_v23 = vmul.f32 %v4202_v22, %v4202_v22 }
 0x141   : > { %v745_v24 = vsel %vm698_vm3, 0.0, %v704_v23  ;;  %v712_v25 = vsel %vm698_vm3, %v704_v23, 0.0 }
 0x142   : > { %v763_v26 = vsel %vm715_vm4, %v745_v24, 0.0  ;;  %v731_v27 = vsel %vm715_vm4, %v712_v25, 0.0 }
 0x143   : > { %764 = vadd.xlane.f32.xlu2 %v763_v26  ;;  %732 = vadd.xlane.f32.xlu1 %v731_v27 }
 0x144   : > { %v690_v28 = vpop.f32.mrf.mxu1 }
 0x145   : > { %v4213_v29 = vadd.f32 %v4132_v45, %v690_v28 }
 0x147   : > { %v705_v30 = vmul.f32 %v4213_v29, %v4213_v29 }
 0x149   : > { %v746_v31 = vsel %vm698_vm3, 0.0, %v705_v30  ;;  %v713_v32 = vsel %vm698_vm3, %v705_v30, 0.0 }
 0x14a   : > { %v766_v33 = vsel %vm715_vm4, %v746_v31, 0.0  ;;  %v734_v34 = vsel %vm715_vm4, %v713_v32, 0.0 }
 0x14b   : > { %767 = vadd.xlane.f32.xlu1 %v766_v33  ;;  %735 = vadd.xlane.f32.xlu0 %v734_v34 }
 0x14c   : > { %v693_v35 = vpop.f32.mrf.mxu1 }
 0x14d   : > { %v4224_v36 = vadd.f32 %v4132_v45, %v693_v35 }
 0x14f   : > { %v706_v37 = vmul.f32 %v4224_v36, %v4224_v36 }
 0x151   : > { %v714_v38 = vsel %vm698_vm3, %v706_v37, 0.0  ;;  %v747_v39 = vsel %vm698_vm3, 0.0, %v706_v37 }
 0x152   : > { %v737_v40 = vsel %vm715_vm4, %v714_v38, 0.0  ;;  %v769_v41 = vsel %vm715_vm4, %v747_v39, 0.0 }
 0x153   : > { %738 = vadd.xlane.f32.xlu2 %v737_v40  ;;  %770 = vadd.xlane.f32.xlu0 %v769_v41 }
 0x18e   : > { %v718_v43 = vpop.xlane.xlu0 %717 }
 0x18f   : > { %v772_v44 = vmax.f32 %v718_v43, 1e-24 }
 0x191   : > { %3759 = vrsqrt.f32 %v772_v44  ;;  %vm786_vm7 = vweird.f32 %v772_v44 }
 0x196   : > { %v721_v45 = vpop.xlane.xlu1 %720  ;;  %v750_v47 = vpop.xlane.xlu0 %749 }
 0x197   : > { %v3760_v49 = vpop.eup %3759  ;;  %v4237_v50 = vmax.f32 %v721_v45, 1e-24  ;;  %v860_v51 = vmax.f32 %v750_v47, 1e-24 }
 0x198   : > { %v781_v52 = vmul.f32 %v3760_v49, %v772_v44  ;;  %vm787_vm5 = vweird.f32 %v3760_v49 }
 0x199   : > { %3761 = vrsqrt.f32 %v4237_v50  ;;  %vm788_vm8 = vmor %vm786_vm7, %vm787_vm5  ;;  %vm874_vm9 = vweird.f32 %v860_v51  ;;  %vm796_vm13 = vweird.f32 %v4237_v50 }
 0x19a   : > { %v782_v54 = vmul.f32 %v3760_v49, %v781_v52  ;;  %3763 = vrsqrt.f32 %v860_v51 }
 0x19c   : > { %v783_v55 = vmul.f32 0.5, %v782_v54 }
 0x19e   : > { %v724_v56 = vpop.xlane.xlu2 %723  ;;  %v753_v57 = vpop.xlane.xlu1 %752  ;;  %v784_v1 = vsub.f32 1.5, %v783_v55 }
 0x19f   : > { %v4240_v58 = vpop.eup %3761  ;;  %v4242_v59 = vmax.f32 %v724_v56, 1e-24  ;;  %v861_v61 = vmax.f32 %v753_v57, 1e-24 }
 0x1a0   : > { %v3764_v62 = vpop.eup %3763  ;;  %v791_v63 = vmul.f32 %v4240_v58, %v4237_v50  ;;  %v785_v6 = vmul.f32 %v3760_v49, %v784_v1  ;;  %vm797_vm11 = vweird.f32 %v4240_v58 }
 0x1a1   : > { %v869_v0 = vmul.f32 %v3764_v62, %v860_v51  ;;  %3765 = vrsqrt.f32 %v4242_v59  ;;  %vm875_vm6 = vweird.f32 %v3764_v62  ;;  %vm4282_vm14 = vmor %vm796_vm13, %vm797_vm11  ;;  %vm884_vm15 = vweird.f32 %v861_v61 }
 0x1a2   : > { %3767 = vrsqrt.f32 %v861_v61  ;;  %v792_v2 = vmul.f32 %v4240_v58, %v791_v63  ;;  %v789_v21 = vsel %vm788_vm8, %v3760_v49, %v785_v6  ;;  %vm876_vm10 = vmor %vm874_vm9, %vm875_vm6  ;;  %vm806_vm1 = vweird.f32 %v4242_v59 }
 0x1a3   : > { %v870_v4 = vmul.f32 %v3764_v62, %v869_v0 }
 0x1a4   : > { %v793_v10 = vmul.f32 0.5, %v792_v2 }
 0x1a5   : > { %v871_v5 = vmul.f32 0.5, %v870_v4 }
 0x1a6   : > { %v756_v7 = vpop.xlane.xlu2 %755  ;;  %v759_v8 = vpop.xlane.xlu1 %758  ;;  %v794_v24 = vsub.f32 1.5, %v793_v10 }
 0x1a7   : > { %v4248_v9 = vpop.eup %3765  ;;  %v872_v11 = vsub.f32 1.5, %v871_v5  ;;  %v4250_v12 = vmax.f32 %v756_v7, 1e-24  ;;  %v4252_v13 = vmax.f32 %v759_v8, 1e-24  ;;  %v727_v15 = vpop.xlane.xlu0 %726 }
 0x1a8   : > { %v3768_v16 = vpop.eup %3767  ;;  %v801_v17 = vmul.f32 %v4248_v9, %v4242_v59  ;;  %v4256_v18 = vmax.f32 %v727_v15, 1e-24  ;;  %v795_v34 = vmul.f32 %v4240_v58, %v794_v24  ;;  %vm807_vm2 = vweird.f32 %v4248_v9 }
 0x1a9   : > { %v873_v19 = vmul.f32 %v3764_v62, %v872_v11  ;;  %v879_v20 = vmul.f32 %v3768_v16, %v861_v61  ;;  %3769 = vrsqrt.f32 %v4250_v12  ;;  %vm885_vm12 = vweird.f32 %v3768_v16  ;;  %vm4317_vm8 = vmor %vm806_vm1, %vm807_vm2 }
 0x1aa   : > { %v802_v23 = vmul.f32 %v4248_v9, %v801_v17  ;;  %3771 = vrsqrt.f32 %v4252_v13  ;;  %vm886_vm0 = vmor %vm884_vm15, %vm885_vm12  ;;  %v799_v51 = vsel %vm4282_vm14, %v4240_v58, %v795_v34  ;;  %vm894_vm5 = vweird.f32 %v4250_v12 }
 0x1ab   : > { %v877_v25 = vsel %vm876_vm10, %v3764_v62, %v873_v19  ;;  %v880_v26 = vmul.f32 %v3768_v16, %v879_v20  ;;  %3773 = vrsqrt.f32 %v4256_v18  ;;  %vm904_vm11 = vweird.f32 %v4252_v13 }
 0x1ac   : > { %v948_v27 = vsel %vm698_vm3, %v789_v21, %v877_v25  ;;  %v803_v31 = vmul.f32 0.5, %v802_v23  ;;  %vm816_vm13 = vweird.f32 %v4256_v18 }
 0x1ad   : > { %v956_v28 = vmul.f32 %v948_v27, %v4137_v48  ;;  %v881_v30 = vmul.f32 0.5, %v880_v26 }
 0x1ae   : > { %v730_v32 = vpop.xlane.xlu2 %729  ;;  %v804_v45 = vsub.f32 1.5, %v803_v31 }
 0x1af   : > { %v4267_v33 = vpop.eup %3769  ;;  %v882_v35 = vsub.f32 1.5, %v881_v30  ;;  %v4270_v37 = vmax.f32 %v730_v32, 1e-24  ;;  %3652 = vmatmul.msk.f32.vlgmr.msra.gmra.mxu1 %vm715_vm4, %v956_v28  ;;  %v762_v38 = vpop.xlane.xlu0 %761 }
 0x1b0   : > { %v4273_v39 = vpop.eup %3771  ;;  %v889_v48 = vmul.f32 %v4267_v33, %v4250_v12  ;;  %v4278_v40 = vmax.f32 %v762_v38, 1e-24  ;;  %v805_v62 = vmul.f32 %v4248_v9, %v804_v45  ;;  %vm895_vm6 = vweird.f32 %v4267_v33  ;;  %v1046_v45 = vld [vmem:[%s6532_s7 + $0x8] sm:$0xff] }
 0x1b1   : > { %v3774_v41 = vpop.eup %3773  ;;  %v883_v43 = vmul.f32 %v3768_v16, %v882_v35  ;;  %v899_v44 = vmul.f32 %v4273_v39, %v4252_v13  ;;  %3775 = vrsqrt.f32 %v4270_v37  ;;  %vm905_vm7 = vweird.f32 %v4273_v39  ;;  %vm4328_vm10 = vmor %vm894_vm5, %vm895_vm6 }
 0x1b2   : > { %v890_v47 = vmul.f32 %v4267_v33, %v889_v48  ;;  %v811_v49 = vmul.f32 %v3774_v41, %v4256_v18  ;;  %3777 = vrsqrt.f32 %v4278_v40  ;;  %vm817_vm9 = vweird.f32 %v3774_v41  ;;  %vm4335_vm12 = vmor %vm904_vm11, %vm905_vm7  ;;  %v1047_v48 = vld [vmem:[%s6532_s7 + $0x10] sm:$0xff] }
 0x1b3   : > { %v900_v50 = vmul.f32 %v4273_v39, %v899_v44  ;;  %v887_v52 = vsel %vm886_vm0, %v3768_v16, %v883_v43  ;;  %vm818_vm14 = vmor %vm816_vm13, %vm817_vm9  ;;  %v809_v13 = vsel %vm4317_vm8, %v4248_v9, %v805_v62  ;;  %vm826_vm1 = vweird.f32 %v4270_v37 }
 0x1b4   : > { %v891_v54 = vmul.f32 0.5, %v890_v47  ;;  %v812_v55 = vmul.f32 %v3774_v41, %v811_v49  ;;  %v949_v56 = vsel %vm698_vm3, %v799_v51, %v887_v52  ;;  %vm914_vm5 = vweird.f32 %v4278_v40 }
 0x1b5   : > { %v901_v57 = vmul.f32 0.5, %v900_v50  ;;  %v957_v61 = vmul.f32 %v949_v56, %v4146_v53 }
 0x1b6   : > { %v892_v63 = vsub.f32 1.5, %v891_v54  ;;  %v813_v58 = vmul.f32 0.5, %v812_v55  ;;  %v765_v0 = vpop.xlane.xlu2 %764  ;;  %v733_v1 = vpop.xlane.xlu1 %732 }
 0x1b7   : > { %v4305_v2 = vpop.eup %3775  ;;  %v902_v4 = vsub.f32 1.5, %v901_v57  ;;  %v4308_v5 = vmax.f32 %v765_v0, 1e-24  ;;  %v4310_v6 = vmax.f32 %v733_v1, 1e-24  ;;  %3653 = vmatmul.msk.f32.gmra.mxu1 %vm715_vm4, %v957_v61 }
 0x1b8   : > { %v893_v7 = vmul.f32 %v4267_v33, %v892_v63  ;;  %v814_v8 = vsub.f32 1.5, %v813_v58  ;;  %v821_v10 = vmul.f32 %v4305_v2, %v4270_v37  ;;  %v3778_v11 = vpop.eup %3777  ;;  %vm827_vm15 = vweird.f32 %v4305_v2 }
 0x1b9   : > { %v903_v59 = vmul.f32 %v4273_v39, %v902_v4  ;;  %3779 = vrsqrt.f32 %v4308_v5  ;;  %v909_v12 = vmul.f32 %v3778_v11, %v4278_v40  ;;  %vm915_vm0 = vweird.f32 %v3778_v11  ;;  %vm828_vm2 = vmor %vm826_vm1, %vm827_vm15  ;;  %v1045_v40 = vld [vmem:[%s6532_s7] sm:$0xff] }
 0x1ba   : > { %v815_v17 = vmul.f32 %v3774_v41, %v814_v8  ;;  %v822_v19 = vmul.f32 %v4305_v2, %v821_v10  ;;  %3781 = vrsqrt.f32 %v4310_v6  ;;  %v897_v20 = vsel %vm4328_vm10, %v4267_v33, %v893_v7  ;;  %vm916_vm6 = vmor %vm914_vm5, %vm915_vm0 }
 0x1bb   : > { %v907_v21 = vsel %vm4335_vm12, %v4273_v39, %v903_v59  ;;  %v910_v23 = vmul.f32 %v3778_v11, %v909_v12  ;;  %v950_v24 = vsel %vm698_vm3, %v809_v13, %v897_v20  ;;  %vm924_vm9 = vweird.f32 %v4308_v5 }
 0x1bc   : > { %v823_v18 = vmul.f32 0.5, %v822_v19  ;;  %v819_v25 = vsel %vm818_vm14, %v3774_v41, %v815_v17  ;;  %v958_v26 = vmul.f32 %v950_v24, %v4157_v60  ;;  %vm836_vm11 = vweird.f32 %v4310_v6 }
 0x1bd   : > { %v951_v27 = vsel %vm698_vm3, %v819_v25, %v907_v21  ;;  %v911_v28 = vmul.f32 0.5, %v910_v23 }
 0x1be   : > { %v824_v9 = vsub.f32 1.5, %v823_v18  ;;  %v768_v30 = vpop.xlane.xlu1 %767  ;;  %v959_v31 = vmul.f32 %v951_v27, %v4168_v3  ;;  %v736_v32 = vpop.xlane.xlu0 %735  ;;  %v1048_v3 = vld [vmem:[%s6532_s7 + $0x18] sm:$0xff] }
 0x1bf   : > { %v4358_v33 = vpop.eup %3779  ;;  %v4361_v34 = vmax.f32 %v768_v30, 1e-24  ;;  %3654 = vmatmul.msk.f32.gmra.mxu1 %vm715_vm4, %v958_v26  ;;  %v4364_v35 = vmax.f32 %v736_v32, 1e-24  ;;  %v912_v38 = vsub.f32 1.5, %v911_v28  ;;  %1089 = vmatpush.msrb.mxu3 %v1048_v3 }
 0x1c0   : > { %v825_v60 = vmul.f32 %v4305_v2, %v824_v9  ;;  %v919_v39 = vmul.f32 %v4358_v33, %v4308_v5  ;;  %3655 = vmatmul.msk.f32.vlgmr.msra.gmra.mxu2 %vm715_vm4, %v959_v31  ;;  %v3782_v41 = vpop.eup %3781  ;;  %vm925_vm7 = vweird.f32 %v4358_v33 }
 0x1c1   : > { %3783 = vrsqrt.f32 %v4361_v34  ;;  %v913_v42 = vmul.f32 %v3778_v11, %v912_v38  ;;  %v831_v44 = vmul.f32 %v3782_v41, %v4310_v6  ;;  %1090 = vmatpush.msrb.mxu3 %v1047_v48  ;;  %vm837_vm8 = vweird.f32 %v3782_v41  ;;  %vm926_vm10 = vmor %vm924_vm9, %vm925_vm7 }
 0x1c2   : > { %v920_v43 = vmul.f32 %v4358_v33, %v919_v39  ;;  %3785 = vrsqrt.f32 %v4364_v35  ;;  %v829_v37 = vsel %vm828_vm2, %v4305_v2, %v825_v60  ;;  %vm838_vm12 = vmor %vm836_vm11, %vm837_vm8  ;;  %vm934_vm15 = vweird.f32 %v4361_v34 }
 0x1c3   : > { %v832_v49 = vmul.f32 %v3782_v41, %v831_v44  ;;  %v917_v50 = vsel %vm916_vm6, %v3778_v11, %v913_v42  ;;  %1091 = vmatpush.msrb.mxu3 %v1046_v45  ;;  %vm846_vm1 = vweird.f32 %v4364_v35 }
 0x1c4   : > { %v921_v47 = vmul.f32 0.5, %v920_v43  ;;  %v952_v51 = vsel %vm698_vm3, %v829_v37, %v917_v50 }
 0x1c5   : > { %v833_v54 = vmul.f32 0.5, %v832_v49  ;;  %v960_v56 = vmul.f32 %v952_v51, %v4188_v14  ;;  %1092 = vmatpush.msrb.mxu3 %v1045_v40 }
 0x1c6   : > { %v922_v52 = vsub.f32 1.5, %v921_v47  ;;  %v739_v55 = vpop.xlane.xlu2 %738  ;;  %v771_v57 = vpop.xlane.xlu0 %770 }
 0x1c7   : > { %v3784_v61 = vpop.eup %3783  ;;  %v779_v62 = vmax.f32 %v739_v55, 1e-24  ;;  %v867_v63 = vmax.f32 %v771_v57, 1e-24  ;;  %v834_v0 = vsub.f32 1.5, %v833_v54 }
 0x1c8   : > { %v923_v58 = vmul.f32 %v4358_v33, %v922_v52  ;;  %v929_v1 = vmul.f32 %v3784_v61, %v4361_v34  ;;  %3656 = vmatmul.msk.f32.gmra.mxu2 %vm715_vm4, %v960_v56  ;;  %v3786_v2 = vpop.eup %3785  ;;  %vm935_vm13 = vweird.f32 %v3784_v61 }
 0x1c9   : > { %3787 = vrsqrt.f32 %v779_v62  ;;  %v835_v14 = vmul.f32 %v3782_v41, %v834_v0  ;;  %v841_v53 = vmul.f32 %v3786_v2, %v4364_v35  ;;  %vm847_vm14 = vweird.f32 %v3786_v2  ;;  %vm936_vm0 = vmor %vm934_vm15, %vm935_vm13 }
 0x1ca   : > { %v930_v4 = vmul.f32 %v3784_v61, %v929_v1  ;;  %3789 = vrsqrt.f32 %v867_v63  ;;  %v927_v7 = vsel %vm926_vm10, %v4358_v33, %v923_v58  ;;  %vm848_vm2 = vmor %vm846_vm1, %vm847_vm14  ;;  %vm856_vm6 = vweird.f32 %v779_v62  ;;  %v3756_v58 = vld [vmem:[%s6533_s8] ss:$0 sm:$0xff] }
 0x1cb   : > { %v842_v10 = vmul.f32 %v3786_v2, %v841_v53  ;;  %v839_v11 = vsel %vm838_vm12, %v3782_v41, %v835_v14  ;;  %vm944_vm9 = vweird.f32 %v867_v63 }
 0x1cc   : > { %v931_v8 = vmul.f32 0.5, %v930_v4  ;;  %v953_v15 = vsel %vm698_vm3, %v839_v11, %v927_v7 }
 0x1cd   : > { %v843_v5 = vmul.f32 0.5, %v842_v10  ;;  %v961_v16 = vmul.f32 %v953_v15, %v4202_v22 }
 0x1ce   : > { %v932_v59 = vsub.f32 1.5, %v931_v8 }
 0x1cf   : > { %v3788_v17 = vpop.eup %3787  ;;  %v844_v19 = vsub.f32 1.5, %v843_v5 }
 0x1d0   : > { %v933_v6 = vmul.f32 %v3784_v61, %v932_v59  ;;  %v851_v12 = vmul.f32 %v3788_v17, %v779_v62  ;;  %3657 = vmatmul.msk.f32.gmra.mxu2 %vm715_vm4, %v961_v16  ;;  %v3790_v13 = vpop.eup %3789  ;;  %vm857_vm5 = vweird.f32 %v3788_v17 }
 0x1d1   : > { %v845_v20 = vmul.f32 %v3786_v2, %v844_v19  ;;  %v939_v18 = vmul.f32 %v3790_v13, %v867_v63  ;;  %vm945_vm7 = vweird.f32 %v3790_v13  ;;  %vm858_vm8 = vmor %vm856_vm6, %vm857_vm5  ;;  %v1260_v19 = vld [vmem:[%s6534_s9 + $0x70] sm:$0xff] }
 0x1d2   : > { %v852_v21 = vmul.f32 %v3788_v17, %v851_v12  ;;  %v937_v23 = vsel %vm936_vm0, %v3784_v61, %v933_v6  ;;  %vm946_vm10 = vmor %vm944_vm9, %vm945_vm7  ;;  %v1259_v12 = vld [vmem:[%s6534_s9 + $0x68] sm:$0xff]  ;;  %1390 = vmatpush.msra.mxu3 %v1260_v19 }
 0x1d3   : > { %v940_v24 = vmul.f32 %v3790_v13, %v939_v18  ;;  %v849_v25 = vsel %vm848_vm2, %v3786_v2, %v845_v20  ;;  %1349 = vmatpush.msrb.mxu2 %v1259_v12  ;;  %v1256_v20 = vld [vmem:[%s6534_s9 + $0x50] sm:$0xff] }
 0x1d4   : > { %v853_v22 = vmul.f32 0.5, %v852_v21  ;;  %v954_v26 = vsel %vm698_vm3, %v849_v25, %v937_v23  ;;  %1391 = vmatpush.msra.mxu3 %v1256_v20  ;;  %v4582_v12 = vld [vmem:[%s6536_s11 + $0x1f0] sm:$0xff] }
 0x1d5   : > { %v941_v9 = vmul.f32 0.5, %v940_v24  ;;  %v962_v28 = vmul.f32 %v954_v26, %v4213_v29  ;;  %v3755_v29 = vld [vmem:[%s6531_s6] ss:$0 sm:$0xff] }
 0x1d6   : > { %v854_v27 = vsub.f32 1.5, %v853_v22 }
 0x1d7   : > { %v942_v31 = vsub.f32 1.5, %v941_v9 }
 0x1d8   : > { %v855_v30 = vmul.f32 %v3788_v17, %v854_v27  ;;  %3658 = vmatmul.msk.f32.gmra.mxu2 %vm715_vm4, %v962_v28 }
 0x1d9   : > { %v943_v32 = vmul.f32 %v3790_v13, %v942_v31 }
 0x1da   : > { %v859_v33 = vsel %vm858_vm8, %v3788_v17, %v855_v30 }
 0x1db   : > { %v947_v34 = vsel %vm946_vm10, %v3790_v13, %v943_v32  ;;  %v1255_v13 = vld [vmem:[%s6534_s9 + $0x48] sm:$0xff] }
 0x1dc   : > { %v955_v35 = vsel %vm698_vm3, %v859_v33, %v947_v34  ;;  %1350 = vmatpush.msrb.mxu2 %v1255_v13 }
 0x1dd   : > { %v963_v60 = vmul.f32 %v955_v35, %v4224_v36 }
 0x1e0   : > { %3659 = vmatmul.msk.f32.gmra.mxu2 %vm715_vm4, %v963_v60  ;;  %v1258_v60 = vld [vmem:[%s6534_s9 + $0x60] sm:$0xff] }
 0x1e1   : > { %1308 = vmatpush.msrb.mxu0 %v1258_v60  ;;  %v4630_v60 = vld [vmem:[%s6536_s11 + $0x160] sm:$0xff] }
 0x22c   : > { %v1013_v38 = vpop.f32.mrf.mxu1 }
 0x22d   : > { %v1014_v39 = vadd.f32 %v3755_v29, %v1013_v38  ;;  %v1254_v38 = vld [vmem:[%s6534_s9 + $0x40] sm:$0xff] }
 0x22e   : > { %1309 = vmatpush.msrb.mxu0 %v1254_v38  ;;  %v4649_v38 = vld [vmem:[%s6536_s11 + $0x190] sm:$0xff] }
 0x22f   : > { %v1037_v3 = vmax.f32 %v1014_v39, 0.0  ;;  %v1257_v39 = vld [vmem:[%s6534_s9 + $0x58] sm:$0xff] }
 0x231   : > { %3660 = vmatmul.msk.f32.vlgmr.msrb.gmra.mxu3 %vm715_vm4, %v1037_v3  ;;  %v1251_v3 = vld [vmem:[%s6534_s9 + $0x28] sm:$0xff] }
 0x232   : > { %1351 = vmatpush.msrb.mxu2 %v1251_v3 }
 0x234   : > { %v1016_v48 = vpop.f32.mrf.mxu1 }
 0x235   : > { %v1017_v41 = vadd.f32 %v3755_v29, %v1016_v48  ;;  %v1252_v48 = vld [vmem:[%s6534_s9 + $0x30] sm:$0xff] }
 0x236   : > { %1392 = vmatpush.msra.mxu3 %v1252_v48 }
 0x237   : > { %v1038_v42 = vmax.f32 %v1017_v41, 0.0  ;;  %v1250_v41 = vld [vmem:[%s6534_s9 + $0x20] sm:$0xff] }
 0x238   : > { %1310 = vmatpush.msrb.mxu0 %v1250_v41 }
 0x239   : > { %3661 = vmatmul.msk.f32.gmra.mxu3 %vm715_vm4, %v1038_v42  ;;  %v1253_v42 = vld [vmem:[%s6534_s9 + $0x38] sm:$0xff] }
 0x23c   : > { %v1019_v43 = vpop.f32.mrf.mxu1 }
 0x23d   : > { %v1020_v44 = vadd.f32 %v3755_v29, %v1019_v43  ;;  %v1247_v43 = vld [vmem:[%s6534_s9 + $0x8] sm:$0xff] }
 0x23e   : > { %1352 = vmatpush.msrb.mxu2 %v1247_v43  ;;  %v4667_v43 = vld [vmem:[%s6536_s11 + $0x170] sm:$0xff] }
 0x23f   : > { %v1039_v45 = vmax.f32 %v1020_v44, 0.0  ;;  %v1246_v44 = vld [vmem:[%s6534_s9] sm:$0xff] }
 0x240   : > { %1311 = vmatpush.msrb.mxu0 %v1246_v44 }
 0x241   : > { %3662 = vmatmul.msk.f32.gmra.mxu3 %vm715_vm4, %v1039_v45  ;;  %v1248_v45 = vld [vmem:[%s6534_s9 + $0x10] sm:$0xff] }
 0x242   : > { %1393 = vmatpush.msra.mxu3 %v1248_v45 }
 0x243   : > { %v1022_v36 = vpop.f32.mrf.mxu2 }
 0x244   : > { %v1023_v37 = vadd.f32 %v3755_v29, %v1022_v36  ;;  %v1249_v36 = vld [vmem:[%s6534_s9 + $0x18] sm:$0xff]  ;;  %1603 = vmatpush.msrb.mxu3 %v4582_v12 }
 0x246   : > { %v1040_v47 = vmax.f32 %v1023_v37, 0.0 }
 0x249   : > { %3663 = vmatmul.msk.f32.gmra.mxu3 %vm715_vm4, %v1040_v47 }
 0x24b   : > { %v1025_v49 = vpop.f32.mrf.mxu2 }
 0x24c   : > { %v1026_v50 = vadd.f32 %v3755_v29, %v1025_v49  ;;  %v4522_v49 = vld [vmem:[%s6536_s11 + $0x1e8] sm:$0xff] }
 0x24d   : > { %1583 = vmatpush.msra.mxu2 %v4522_v49 }
 0x24e   : > { %v1041_v40 = vmax.f32 %v1026_v50, 0.0 }
 0x251   : > { %3664 = vmatmul.msk.f32.gmra.mxu3 %vm715_vm4, %v1041_v40 }
 0x253   : > { %v1028_v51 = vpop.f32.mrf.mxu2 }
 0x254   : > { %v1029_v52 = vadd.f32 %v3755_v29, %v1028_v51 }
 0x256   : > { %v1042_v54 = vmax.f32 %v1029_v52, 0.0 }
 0x259   : > { %3665 = vmatmul.msk.f32.gmra.mxu3 %vm715_vm4, %v1042_v54 }
 0x25b   : > { %v1031_v55 = vpop.f32.mrf.mxu2 }
 0x25c   : > { %v1032_v56 = vadd.f32 %v3755_v29, %v1031_v55  ;;  %v4528_v55 = vld [vmem:[%s6536_s11 + $0x1c8] sm:$0xff] }
 0x25d   : > { %1584 = vmatpush.msra.mxu2 %v4528_v55 }
 0x25e   : > { %v1043_v57 = vmax.f32 %v1032_v56, 0.0  ;;  %v4533_v56 = vld [vmem:[%s6536_s11 + $0x1e0] sm:$0xff] }
 0x25f   : > { %1563 = vmatpush.msra.mxu0 %v4533_v56 }
 0x261   : > { %3666 = vmatmul.msk.f32.gmra.mxu3 %vm715_vm4, %v1043_v57  ;;  %v4538_v57 = vld [vmem:[%s6536_s11 + $0x1a8] sm:$0xff] }
 0x262   : > { %1585 = vmatpush.msra.mxu2 %v4538_v57 }
 0x263   : > { %v1034_v61 = vpop.f32.mrf.mxu2 }
 0x264   : > { %v1035_v62 = vadd.f32 %v3755_v29, %v1034_v61  ;;  %v1261_v29 = vld [vmem:[%s6534_s9 + $0x78] sm:$0xff] }
 0x265   : > { %1431 = vmatpush.msrb.mxu1 %v1261_v29  ;;  %v4644_v29 = vld [vmem:[%s6536_s11 + $0x198] sm:$0xff] }
 0x266   : > { %v1044_v63 = vmax.f32 %v1035_v62, 0.0 }
 0x267   : > { %1432 = vmatpush.msrb.mxu1 %v1257_v39 }
 0x269   : > { %3667 = vmatmul.msk.f32.gmra.mxu3 %vm715_vm4, %v1044_v63  ;;  %1433 = vmatpush.msrb.mxu1 %v1253_v42  ;;  %v4662_v42 = vld [vmem:[%s6536_s11 + $0x178] sm:$0xff] }
 0x26b   : > { %1434 = vmatpush.msrb.mxu1 %v1249_v36  ;;  %v4675_v36 = vld [vmem:[%s6536_s11 + $0x140] sm:$0xff] }
 0x2b4   : > { %v1094_v0 = vpop.f32.mrf.mxu3 }
 0x2b5   : > { %v4431_v1 = vadd.f32 %v3756_v58, %v1094_v0 }
 0x2b7   : > { %v1118_v2 = vmul.f32 %v4431_v1, %v4431_v1 }
 0x2b9   : > { %v1126_v14 = vsel %vm715_vm4, %v1118_v2, 0.0 }
 0x2ba   : > { %1127 = vadd.xlane.f32.xlu1 %v1126_v14 }
 0x2bc   : > { %v1097_v4 = vpop.f32.mrf.mxu3 }
 0x2bd   : > { %v4436_v53 = vadd.f32 %v3756_v58, %v1097_v4 }
 0x2bf   : > { %v1119_v7 = vmul.f32 %v4436_v53, %v4436_v53 }
 0x2c1   : > { %v1129_v8 = vsel %vm715_vm4, %v1119_v7, 0.0 }
 0x2c2   : > { %1130 = vadd.xlane.f32.xlu2 %v1129_v8  ;;  %v4549_v8 = vld [vmem:[%s6536_s11 + $0x1c0] sm:$0xff] }
 0x2c3   : > { %1564 = vmatpush.msra.mxu0 %v4549_v8 }
 0x2c4   : > { %v1100_v10 = vpop.f32.mrf.mxu3 }
 0x2c5   : > { %v4441_v11 = vadd.f32 %v3756_v58, %v1100_v10  ;;  %v4554_v10 = vld [vmem:[%s6536_s11 + $0x188] sm:$0xff] }
 0x2c6   : > { %1586 = vmatpush.msra.mxu2 %v4554_v10 }
 0x2c7   : > { %v1120_v15 = vmul.f32 %v4441_v11, %v4441_v11 }
 0x2c9   : > { %v1132_v59 = vsel %vm715_vm4, %v1120_v15, 0.0 }
 0x2ca   : > { %1133 = vadd.xlane.f32.xlu0 %v1132_v59  ;;  %v4562_v59 = vld [vmem:[%s6536_s11 + $0x1f8] sm:$0xff] }
 0x2cb   : > { %1623 = vmatpush.msra.mxu1 %v4562_v59 }
 0x2cc   : > { %v1103_v5 = vpop.f32.mrf.mxu3 }
 0x2cd   : > { %v4446_v16 = vadd.f32 %v3756_v58, %v1103_v5 }
 0x2cf   : > { %v1121_v17 = vmul.f32 %v4446_v16, %v4446_v16 }
 0x2d1   : > { %v1135_v6 = vsel %vm715_vm4, %v1121_v17, 0.0  ;;  %v4567_v17 = vld [vmem:[%s6536_s11 + $0x1a0] sm:$0xff] }
 0x2d2   : > { %1136 = vadd.xlane.f32.xlu1 %v1135_v6  ;;  %v4572_v6 = vld [vmem:[%s6536_s11 + $0x168] sm:$0xff]  ;;  %1565 = vmatpush.msra.mxu0 %v4567_v17 }
 0x2d3   : > { %1587 = vmatpush.msra.mxu2 %v4572_v6 }
 0x2d4   : > { %v1106_v21 = vpop.f32.mrf.mxu3 }
 0x2d5   : > { %v4463_v18 = vadd.f32 %v3756_v58, %v1106_v21 }
 0x2d7   : > { %v1122_v23 = vmul.f32 %v4463_v18, %v4463_v18 }
 0x2d9   : > { %v1138_v22 = vsel %vm715_vm4, %v1122_v23, 0.0 }
 0x2da   : > { %1139 = vadd.xlane.f32.xlu2 %v1138_v22  ;;  %v4593_v22 = vld [vmem:[%s6536_s11 + $0x1d8] sm:$0xff] }
 0x2db   : > { %1624 = vmatpush.msra.mxu1 %v4593_v22 }
 0x2dc   : > { %v1109_v24 = vpop.f32.mrf.mxu3 }
 0x2dd   : > { %v4468_v25 = vadd.f32 %v3756_v58, %v1109_v24  ;;  %v4598_v24 = vld [vmem:[%s6536_s11 + $0x1d0] sm:$0xff] }
 0x2de   : > { %1604 = vmatpush.msrb.mxu3 %v4598_v24 }
 0x2df   : > { %v1123_v26 = vmul.f32 %v4468_v25, %v4468_v25 }
 0x2e1   : > { %v1141_v27 = vsel %vm715_vm4, %v1123_v26, 0.0 }
 0x2e2   : > { %1142 = vadd.xlane.f32.xlu0 %v1141_v27 }
 0x2e4   : > { %v1112_v9 = vpop.f32.mrf.mxu3 }
 0x2e5   : > { %v4473_v28 = vadd.f32 %v3756_v58, %v1112_v9  ;;  %v4606_v9 = vld [vmem:[%s6536_s11 + $0x180] sm:$0xff] }
 0x2e6   : > { %1566 = vmatpush.msra.mxu0 %v4606_v9 }
 0x2e7   : > { %v1124_v30 = vmul.f32 %v4473_v28, %v4473_v28 }
 0x2e8   : > { %1567 = vmatpush.msra.mxu0 %v4630_v60 }
 0x2e9   : > { %v1144_v31 = vsel %vm715_vm4, %v1124_v30, 0.0  ;;  %v4611_v30 = vld [vmem:[%s6536_s11 + $0x148] sm:$0xff] }
 0x2ea   : > { %1145 = vadd.xlane.f32.xlu1 %v1144_v31  ;;  %1588 = vmatpush.msra.mxu2 %v4611_v30 }
 0x2eb   : > { %1568 = vmatpush.msra.mxu0 %v4675_v36 }
 0x2ec   : > { %v1115_v32 = vpop.f32.mrf.mxu3 }
 0x2ed   : > { %v4478_v33 = vadd.f32 %v3756_v58, %v1115_v32  ;;  %v4620_v32 = vld [vmem:[%s6536_s11 + $0x1b8] sm:$0xff] }
 0x2ee   : > { %1625 = vmatpush.msra.mxu1 %v4620_v32 }
 0x2ef   : > { %v1125_v34 = vmul.f32 %v4478_v33, %v4478_v33 }
 0x2f0   : > { %1626 = vmatpush.msra.mxu1 %v4644_v29 }
 0x2f1   : > { %v1147_v35 = vsel %vm715_vm4, %v1125_v34, 0.0  ;;  %v4625_v34 = vld [vmem:[%s6536_s11 + $0x1b0] sm:$0xff] }
 0x2f2   : > { %1148 = vadd.xlane.f32.xlu2 %v1147_v35  ;;  %1605 = vmatpush.msrb.mxu3 %v4625_v34 }
 0x2f3   : > { %1627 = vmatpush.msra.mxu1 %v4662_v42 }
 0x2f4   : > { %1606 = vmatpush.msrb.mxu3 %v4649_v38 }
 0x2f6   : > { %1607 = vmatpush.msrb.mxu3 %v4667_v43 }
 0x32d   : > { %v1128_v37 = vpop.xlane.xlu1 %1127 }
 0x32e   : > { %v1150_v47 = vmax.f32 %v1128_v37, 1e-24  ;;  %v4685_v37 = vld [vmem:[%s6536_s11 + $0x158] sm:$0xff] }
 0x32f   : > { %1628 = vmatpush.msra.mxu1 %v4685_v37 }
 0x330   : > { %3791 = vrsqrt.f32 %v1150_v47  ;;  %vm1164_vm12 = vweird.f32 %v1150_v47 }
 0x335   : > { %v1131_v50 = vpop.xlane.xlu2 %1130 }
 0x336   : > { %v3792_v40 = vpop.eup %3791  ;;  %v1151_v51 = vmax.f32 %v1131_v50, 1e-24 }
 0x337   : > { %v1159_v52 = vmul.f32 %v3792_v40, %v1150_v47  ;;  %vm1165_vm11 = vweird.f32 %v3792_v40  ;;  %v4690_v47 = vld [vmem:[%s6536_s11 + $0x150] sm:$0xff] }
 0x338   : > { %3793 = vrsqrt.f32 %v1151_v51  ;;  %vm1166_vm13 = vmor %vm1164_vm12, %vm1165_vm11  ;;  %vm1174_vm15 = vweird.f32 %v1151_v51  ;;  %1608 = vmatpush.msrb.mxu3 %v4690_v47 }
 0x339   : > { %v1160_v54 = vmul.f32 %v3792_v40, %v1159_v52  ;;  %v4701_v52 = vld [vmem:[%s6536_s11 + $0x120] sm:$0xff] }
 0x33a   : > { %1569 = vmatpush.msra.mxu0 %v4701_v52 }
 0x33b   : > { %v1161_v61 = vmul.f32 0.5, %v1160_v54 }
 0x33d   : > { %v1162_v62 = vsub.f32 1.5, %v1161_v61  ;;  %v1134_v63 = vpop.xlane.xlu0 %1133 }
 0x33e   : > { %v3794_v58 = vpop.eup %3793  ;;  %v4543_v0 = vmax.f32 %v1134_v63, 1e-24  ;;  %v4716_v63 = vld [vmem:[%s6536_s11 + $0x100] sm:$0xff] }
 0x33f   : > { %v1163_v2 = vmul.f32 %v3792_v40, %v1162_v62  ;;  %v1169_v14 = vmul.f32 %v3794_v58, %v1151_v51  ;;  %vm1175_vm14 = vweird.f32 %v3794_v58  ;;  %v4696_v51 = vld [vmem:[%s6536_s11 + $0x108] sm:$0xff]  ;;  %1570 = vmatpush.msra.mxu0 %v4716_v63 }
 0x340   : > { %3795 = vrsqrt.f32 %v4543_v0  ;;  %vm1176_vm0 = vmor %vm1174_vm15, %vm1175_vm14  ;;  %vm1184_vm2 = vweird.f32 %v4543_v0  ;;  %v4711_v62 = vld [vmem:[%s6536_s11 + $0xe8] sm:$0xff] }
 0x341   : > { %v1167_v4 = vsel %vm1166_vm13, %v3792_v40, %v1163_v2  ;;  %v1170_v7 = vmul.f32 %v3794_v58, %v1169_v14  ;;  %v4738_v14 = vld [vmem:[%s6536_s11 + $0xe0] sm:$0xff] }
 0x342   : > { %v1238_v15 = vmul.f32 %v1167_v4, %v4431_v1  ;;  %1571 = vmatpush.msra.mxu0 %v4738_v14 }
 0x343   : > { %v1171_v5 = vmul.f32 0.5, %v1170_v7 }
 0x344   : > { %3668 = vmatmul.msk.f32.vlgmr.msrb.gmra.mxu0 %vm715_vm4, %v1238_v15  ;;  %3676 = vmatmul.msk.f32.vlgmr.msrb.gmra.mxu2 %vm715_vm4, %v1238_v15 }
 0x345   : > { %v1172_v1 = vsub.f32 1.5, %v1171_v5  ;;  %3684 = vmatmul.msk.f32.vlgmr.msra.gmra.mxu3 %vm715_vm4, %v1238_v15  ;;  %3692 = vmatmul.msk.f32.vlgmr.msrb.gmra.mxu1 %vm715_vm4, %v1238_v15  ;;  %v1137_v19 = vpop.xlane.xlu1 %1136  ;;  %v4749_v15 = vld [vmem:[%s6536_s11 + $0x118] sm:$0xff]  ;;  %v4754_v5 = vld [vmem:[%s6536_s11 + $0x110] sm:$0xff] }
 0x346   : > { %v3796_v13 = vpop.eup %3795  ;;  %v4584_v20 = vmax.f32 %v1137_v19, 1e-24 }
 0x347   : > { %v1173_v21 = vmul.f32 %v3794_v58, %v1172_v1  ;;  %v1179_v23 = vmul.f32 %v3796_v13, %v4543_v0  ;;  %vm1185_vm1 = vweird.f32 %v3796_v13 }
 0x348   : > { %3797 = vrsqrt.f32 %v4584_v20  ;;  %vm1186_vm5 = vmor %vm1184_vm2, %vm1185_vm1  ;;  %vm1194_vm7 = vweird.f32 %v4584_v20 }
 0x349   : > { %v1177_v26 = vsel %vm1176_vm0, %v3794_v58, %v1173_v21  ;;  %v1180_v27 = vmul.f32 %v3796_v13, %v1179_v23  ;;  %v4730_v58 = vld [vmem:[%s6536_s11 + $0x130] sm:$0xff]  ;;  %v4769_v21 = vld [vmem:[%s6536_s11 + $0xc0] sm:$0xff]  ;;  %v4785_v23 = vld [vmem:[%s6536_s11 + $0xf8] sm:$0xff] }
 0x34a   : > { %v1239_v31 = vmul.f32 %v1177_v26, %v4436_v53  ;;  %v4635_v53 = vld [vmem:[%s6536_s11 + $0x128] sm:$0xff]  ;;  %1609 = vmatpush.msrb.mxu3 %v4730_v58  ;;  %1572 = vmatpush.msra.mxu0 %v4769_v21 }
 0x34b   : > { %v1181_v35 = vmul.f32 0.5, %v1180_v27  ;;  %1589 = vmatpush.msra.mxu2 %v4635_v53 }
 0x34c   : > { %3669 = vmatmul.msk.f32.gmra.mxu0 %vm715_vm4, %v1239_v31  ;;  %3677 = vmatmul.msk.f32.gmra.mxu2 %vm715_vm4, %v1239_v31 }
 0x34d   : > { %v1182_v39 = vsub.f32 1.5, %v1181_v35  ;;  %3685 = vmatmul.msk.f32.gmra.mxu3 %vm715_vm4, %v1239_v31  ;;  %3693 = vmatmul.msk.f32.gmra.mxu1 %vm715_vm4, %v1239_v31  ;;  %v1140_v3 = vpop.xlane.xlu2 %1139  ;;  %v4792_v31 = vld [vmem:[%s6536_s11 + $0xa8] sm:$0xff] }
 0x34e   : > { %v4653_v48 = vpop.eup %3797  ;;  %v4655_v41 = vmax.f32 %v1140_v3, 1e-24  ;;  %1590 = vmatpush.msra.mxu2 %v4696_v51  ;;  %1610 = vmatpush.msrb.mxu3 %v4754_v5  ;;  %v4802_v3 = vld [vmem:[%s6536_s11 + $0x88] sm:$0xff] }
 0x34f   : > { %v1183_v44 = vmul.f32 %v3796_v13, %v1182_v39  ;;  %v1189_v45 = vmul.f32 %v4653_v48, %v4584_v20  ;;  %vm1195_vm6 = vweird.f32 %v4653_v48  ;;  %v4780_v20 = vld [vmem:[%s6536_s11 + $0xf0] sm:$0xff]  ;;  %6612 = vst [vmem:[#allocation5_spill] sm:$0xff] %v4802_v3 }
 0x350   : > { %3799 = vrsqrt.f32 %v4655_v41  ;;  %1591 = vmatpush.msra.mxu2 %v4711_v62  ;;  %vm1196_vm8 = vmor %vm1194_vm7, %vm1195_vm6  ;;  %1611 = vmatpush.msrb.mxu3 %v4780_v20  ;;  %vm1204_vm10 = vweird.f32 %v4655_v41 }
 0x351   : > { %v1187_v50 = vsel %vm1186_vm5, %v3796_v13, %v1183_v44  ;;  %v1190_v40 = vmul.f32 %v4653_v48, %v1189_v45  ;;  %v4763_v13 = vld [vmem:[%s6536_s11 + $0xc8] sm:$0xff]  ;;  %v4821_v44 = vld [vmem:[%s6536_s11 + $0xd8] sm:$0xff] }
 0x352   : > { %v1240_v54 = vmul.f32 %v1187_v50, %v4441_v11  ;;  %v4725_v11 = vld [vmem:[%s6536_s11 + $0x138] sm:$0xff]  ;;  %1592 = vmatpush.msra.mxu2 %v4763_v13 }
 0x353   : > { %v1191_v61 = vmul.f32 0.5, %v1190_v40  ;;  %1629 = vmatpush.msra.mxu1 %v4725_v11  ;;  %v4829_v40 = vld [vmem:[%s6536_s11 + $0x68] sm:$0xff] }
 0x354   : > { %3670 = vmatmul.msk.f32.gmra.mxu0 %vm715_vm4, %v1240_v54  ;;  %3678 = vmatmul.msk.f32.gmra.mxu2 %vm715_vm4, %v1240_v54  ;;  %6613 = vst [vmem:[#allocation6_spill] sm:$0xff] %v4829_v40 }
 0x355   : > { %v1192_v0 = vsub.f32 1.5, %v1191_v61  ;;  %3686 = vmatmul.msk.f32.gmra.mxu3 %vm715_vm4, %v1240_v54  ;;  %3694 = vmatmul.msk.f32.gmra.mxu1 %vm715_vm4, %v1240_v54  ;;  %v1143_v2 = vpop.xlane.xlu0 %1142  ;;  %v4834_v54 = vld [vmem:[%s6536_s11 + $0x80] sm:$0xff] }
 0x356   : > { %v4740_v4 = vpop.eup %3799  ;;  %v4742_v7 = vmax.f32 %v1143_v2, 1e-24  ;;  %1630 = vmatpush.msra.mxu1 %v4749_v15  ;;  %1593 = vmatpush.msra.mxu2 %v4792_v31  ;;  %v4845_v2 = vld [vmem:[%s6536_s11 + $0xb0] sm:$0xff] }
 0x357   : > { %v1193_v1 = vmul.f32 %v4653_v48, %v1192_v0  ;;  %v1199_v19 = vmul.f32 %v4740_v4, %v4655_v41  ;;  %vm1205_vm9 = vweird.f32 %v4740_v4  ;;  %v4876_v41 = vld [vmem:[%s6536_s11 + $0x90] sm:$0xff] }
 0x358   : > { %3801 = vrsqrt.f32 %v4742_v7  ;;  %1631 = vmatpush.msra.mxu1 %v4785_v23  ;;  %1594 = vmatpush.msra.mxu2 %v4802_v3  ;;  %vm1206_vm11 = vmor %vm1204_vm10, %vm1205_vm9  ;;  %6616 = vst [vmem:[#allocation9_spill] sm:$0xff] %v4876_v41  ;;  %vm1214_vm13 = vweird.f32 %v4742_v7 }
 0x359   : > { %v1197_v26 = vsel %vm1196_vm8, %v4653_v48, %v1193_v1  ;;  %v1200_v27 = vmul.f32 %v4740_v4, %v1199_v19  ;;  %v4807_v48 = vld [vmem:[%s6536_s11 + $0xa0] sm:$0xff]  ;;  %v4850_v1 = vld [vmem:[%s6536_s11 + $0xb8] sm:$0xff] }
 0x35a   : > { %v1241_v35 = vmul.f32 %v1197_v26, %v4446_v16  ;;  %v4816_v16 = vld [vmem:[%s6536_s11 + $0xd0] sm:$0xff]  ;;  %1573 = vmatpush.msra.mxu0 %v4807_v48  ;;  %1632 = vmatpush.msra.mxu1 %v4821_v44 }
 0x35b   : > { %v1201_v39 = vmul.f32 0.5, %v1200_v27  ;;  %1612 = vmatpush.msrb.mxu3 %v4816_v16  ;;  %v4861_v27 = vld [vmem:[%s6536_s11 + $0x48] sm:$0xff]  ;;  %1595 = vmatpush.msra.mxu2 %v4829_v40 }
 0x35c   : > { %3671 = vmatmul.msk.f32.gmra.mxu0 %vm715_vm4, %v1241_v35  ;;  %3679 = vmatmul.msk.f32.gmra.mxu2 %vm715_vm4, %v1241_v35  ;;  %6614 = vst [vmem:[#allocation7_spill] sm:$0xff] %v4861_v27 }
 0x35d   : > { %v1202_v45 = vsub.f32 1.5, %v1201_v39  ;;  %3687 = vmatmul.msk.f32.gmra.mxu3 %vm715_vm4, %v1241_v35  ;;  %3695 = vmatmul.msk.f32.gmra.mxu1 %vm715_vm4, %v1241_v35  ;;  %v1146_v50 = vpop.xlane.xlu1 %1145  ;;  %v4866_v35 = vld [vmem:[%s6536_s11 + $0x60] sm:$0xff]  ;;  %v4881_v39 = vld [vmem:[%s6536_s11 + $0x98] sm:$0xff] }
 0x35e   : > { %v4836_v61 = vpop.eup %3801  ;;  %v4838_v0 = vmax.f32 %v1146_v50, 1e-24  ;;  %6615 = vst [vmem:[#allocation8_spill] sm:$0xff] %v4866_v35  ;;  %1574 = vmatpush.msra.mxu0 %v4834_v54  ;;  %1613 = vmatpush.msrb.mxu3 %v4845_v2 }
 0x35f   : > { %v1203_v19 = vmul.f32 %v4740_v4, %v1202_v45  ;;  %v1209_v26 = vmul.f32 %v4836_v61, %v4742_v7  ;;  %6617 = vst [vmem:[#allocation10_spill] sm:$0xff] %v4881_v39  ;;  %1633 = vmatpush.msra.mxu1 %v4850_v1  ;;  %1596 = vmatpush.msra.mxu2 %v4861_v27  ;;  %vm1215_vm12 = vweird.f32 %v4836_v61  ;;  %v4920_v27 = vld [vmem:[%s6536_s11 + $0x50] sm:$0xff]  ;;  %v4959_v7 = vld [vmem:[%s6536_s11 + $0x38] sm:$0xff] }
 0x360   : > { %3803 = vrsqrt.f32 %v4838_v0  ;;  %1575 = vmatpush.msra.mxu0 %v4866_v35  ;;  %1614 = vmatpush.msrb.mxu3 %v4876_v41  ;;  %6621 = vst [vmem:[#allocation14_spill] sm:$0xff] %v4920_v27  ;;  %v4925_v35 = vld [vmem:[%s6536_s11 + $0x8] sm:$0xff]  ;;  %vm1216_vm14 = vmor %vm1214_vm13, %vm1215_vm12  ;;  %vm1224_vm0 = vweird.f32 %v4838_v0 }
 0x361   : > { %v1207_v45 = vsel %vm1206_vm11, %v4740_v4, %v1203_v19  ;;  %v1210_v50 = vmul.f32 %v4836_v61, %v1209_v26  ;;  %1634 = vmatpush.msra.mxu1 %v4881_v39  ;;  %v4895_v4 = vld [vmem:[%s6536_s11 + $0x28] sm:$0xff]  ;;  %v4900_v19 = vld [vmem:[%s6536_s11 + $0x70] sm:$0xff]  ;;  %v4912_v26 = vld [vmem:[%s6536_s11 + $0x40] sm:$0xff]  ;;  %6622 = vst [vmem:[#allocation15_spill] sm:$0xff] %v4925_v35 }
 0x362   : > { %v1242_v46 = vmul.f32 %v1207_v45, %v4463_v18  ;;  %6618 = vst [vmem:[#allocation11_spill] sm:$0xff] %v4895_v4  ;;  %v4907_v18 = vld [vmem:[%s6536_s11 + $0x78] sm:$0xff]  ;;  %1597 = vmatpush.msra.mxu2 %v4895_v4  ;;  %1615 = vmatpush.msrb.mxu3 %v4900_v19  ;;  %v4949_v4 = vld [vmem:[%s6536_s11 + $0x30] sm:$0xff] }
 0x363   : > { %v1211_v40 = vmul.f32 0.5, %v1210_v50  ;;  %6619 = vst [vmem:[#allocation12_spill] sm:$0xff] %v4907_v18  ;;  %1635 = vmatpush.msra.mxu1 %v4907_v18  ;;  %1576 = vmatpush.msra.mxu0 %v4912_v26 }
 0x364   : > { %3672 = vmatmul.msk.f32.gmra.mxu0 %vm715_vm4, %v1242_v46  ;;  %3680 = vmatmul.msk.f32.gmra.mxu2 %vm715_vm4, %v1242_v46  ;;  %6620 = vst [vmem:[#allocation13_spill] sm:$0xff] %v4912_v26 }
 0x365   : > { %v1212_v45 = vsub.f32 1.5, %v1211_v40  ;;  %3688 = vmatmul.msk.f32.gmra.mxu3 %vm715_vm4, %v1242_v46  ;;  %3696 = vmatmul.msk.f32.gmra.mxu1 %vm715_vm4, %v1242_v46  ;;  %v1149_v50 = vpop.xlane.xlu2 %1148  ;;  %v4934_v46 = vld [vmem:[%s6536_s11 + $0x58] sm:$0xff]  ;;  %v4939_v40 = vld [vmem:[%s6536_s11 + $0x20] sm:$0xff] }
 0x366   : > { %v3804_v39 = vpop.eup %3803  ;;  %v4927_v41 = vmax.f32 %v1149_v50, 1e-24  ;;  %1616 = vmatpush.msrb.mxu3 %v4920_v27  ;;  %1598 = vmatpush.msra.mxu2 %v4925_v35 }
 0x367   : > { %v1213_v3 = vmul.f32 %v4836_v61, %v1212_v45  ;;  %v1219_v50 = vmul.f32 %v3804_v39, %v4838_v0  ;;  %v4964_v45 = vld [vmem:[%s6536_s11] sm:$0xff]  ;;  %1636 = vmatpush.msra.mxu1 %v4934_v46  ;;  %1577 = vmatpush.msra.mxu0 %v4939_v40  ;;  %vm1225_vm15 = vweird.f32 %v3804_v39  ;;  %v6630_v0 = vld [vmem:[#allocation7_spill] sm:$0xff] }
 0x368   : > { %3805 = vrsqrt.f32 %v4927_v41  ;;  %1617 = vmatpush.msrb.mxu3 %v4949_v4  ;;  %1802 = vmatpush.msrb.mxu2 %v4522_v49  ;;  %vm1226_vm1 = vmor %vm1224_vm0, %vm1225_vm15  ;;  %vm1234_vm5 = vweird.f32 %v4927_v41 }
 0x369   : > { %v1217_v26 = vsel %vm1216_vm14, %v4836_v61, %v1213_v3  ;;  %v1220_v18 = vmul.f32 %v3804_v39, %v1219_v50  ;;  %1637 = vmatpush.msra.mxu1 %v4959_v7  ;;  %1578 = vmatpush.msra.mxu0 %v4964_v45  ;;  %v4977_v3 = vld [vmem:[%s6536_s11 + $0x10] sm:$0xff]  ;;  %v4982_v61 = vld [vmem:[%s6536_s11 + $0x18] sm:$0xff] }
 0x36a   : > { %v1243_v27 = vmul.f32 %v1217_v26, %v4468_v25  ;;  %1618 = vmatpush.msrb.mxu3 %v4977_v3  ;;  %1803 = vmatpush.msrb.mxu2 %v4528_v55 }
 0x36b   : > { %v1221_v35 = vmul.f32 0.5, %v1220_v18  ;;  %1638 = vmatpush.msra.mxu1 %v4982_v61  ;;  %1782 = vmatpush.msrb.mxu0 %v4533_v56 }
 0x36c   : > { %3673 = vmatmul.msk.f32.gmra.mxu0 %vm715_vm4, %v1243_v27  ;;  %3681 = vmatmul.msk.f32.gmra.mxu2 %vm715_vm4, %v1243_v27 }
 0x36d   : > { %v1222_v25 = vsub.f32 1.5, %v1221_v35  ;;  %3689 = vmatmul.msk.f32.gmra.mxu3 %vm715_vm4, %v1243_v27  ;;  %3697 = vmatmul.msk.f32.gmra.mxu1 %vm715_vm4, %v1243_v27 }
 0x36e   : > { %v3806_v49 = vpop.eup %3805  ;;  %1822 = vmatpush.msra.mxu3 %v4582_v12  ;;  %1842 = vmatpush.msrb.mxu1 %v4562_v59 }
 0x36f   : > { %v1223_v18 = vmul.f32 %v3804_v39, %v1222_v25  ;;  %v1229_v26 = vmul.f32 %v3806_v49, %v4927_v41  ;;  %1783 = vmatpush.msrb.mxu0 %v4549_v8  ;;  %1804 = vmatpush.msrb.mxu2 %v4538_v57  ;;  %vm1235_vm2 = vweird.f32 %v3806_v49  ;;  %v6631_v41 = vld [vmem:[#allocation14_spill] sm:$0xff]  ;;  %v6633_v25 = vld [vmem:[#allocation15_spill] sm:$0xff] }
 0x370   : > { %1823 = vmatpush.msra.mxu3 %v4598_v24  ;;  %1843 = vmatpush.msrb.mxu1 %v4593_v22  ;;  %vm1236_vm6 = vmor %vm1234_vm5, %vm1235_vm2 }
 0x371   : > { %v1227_v27 = vsel %vm1226_vm1, %v3804_v39, %v1223_v18  ;;  %v1230_v35 = vmul.f32 %v3806_v49, %v1229_v26  ;;  %1784 = vmatpush.msrb.mxu0 %v4567_v17  ;;  %1805 = vmatpush.msrb.mxu2 %v4554_v10  ;;  %v6623_v10 = vld [vmem:[#allocation5_spill] sm:$0xff]  ;;  %v6632_v39 = vld [vmem:[#allocation11_spill] sm:$0xff] }
 0x372   : > { %v1244_v50 = vmul.f32 %v1227_v27, %v4473_v28  ;;  %1824 = vmatpush.msra.mxu3 %v4625_v34  ;;  %1844 = vmatpush.msrb.mxu1 %v4620_v32  ;;  %v6624_v17 = vld [vmem:[#allocation9_spill] sm:$0xff] }
 0x373   : > { %v1231_v56 = vmul.f32 0.5, %v1230_v35  ;;  %1785 = vmatpush.msrb.mxu0 %v4606_v9  ;;  %1806 = vmatpush.msrb.mxu2 %v4572_v6  ;;  %v6625_v6 = vld [vmem:[#allocation10_spill] sm:$0xff]  ;;  %v6626_v9 = vld [vmem:[#allocation8_spill] sm:$0xff] }
 0x374   : > { %3674 = vmatmul.msk.f32.gmra.mxu0 %vm715_vm4, %v1244_v50  ;;  %3682 = vmatmul.msk.f32.gmra.mxu2 %vm715_vm4, %v1244_v50 }
 0x375   : > { %v1232_v55 = vsub.f32 1.5, %v1231_v56  ;;  %3690 = vmatmul.msk.f32.gmra.mxu3 %vm715_vm4, %v1244_v50  ;;  %3698 = vmatmul.msk.f32.gmra.mxu1 %vm715_vm4, %v1244_v50 }
 0x376   : > { %1825 = vmatpush.msra.mxu3 %v4649_v38  ;;  %1845 = vmatpush.msrb.mxu1 %v4644_v29 }
 0x377   : > { %v1233_v28 = vmul.f32 %v3806_v49, %v1232_v55  ;;  %1786 = vmatpush.msrb.mxu0 %v4630_v60  ;;  %1807 = vmatpush.msrb.mxu2 %v4611_v30  ;;  %v6627_v30 = vld [vmem:[#allocation6_spill] sm:$0xff]  ;;  %v6628_v60 = vld [vmem:[#allocation12_spill] sm:$0xff] }
 0x378   : > { %1826 = vmatpush.msra.mxu3 %v4667_v43  ;;  %1846 = vmatpush.msrb.mxu1 %v4662_v42 }
 0x379   : > { %v1237_v57 = vsel %vm1236_vm6, %v3806_v49, %v1233_v28  ;;  %1787 = vmatpush.msrb.mxu0 %v4675_v36  ;;  %1808 = vmatpush.msrb.mxu2 %v4635_v53  ;;  %v6629_v53 = vld [vmem:[#allocation13_spill] sm:$0xff] }
 0x37a   : > { %v1245_v8 = vmul.f32 %v1237_v57, %v4478_v33  ;;  %1827 = vmatpush.msra.mxu3 %v4690_v47  ;;  %1847 = vmatpush.msrb.mxu1 %v4685_v37  ;;  %v3975_v33 = vmov 0.0  }
 0x37b   : > { %1788 = vmatpush.msrb.mxu0 %v4701_v52  ;;  %1809 = vmatpush.msrb.mxu2 %v4696_v51 }
 0x37c   : > { %3675 = vmatmul.msk.f32.gmra.mxu0 %vm715_vm4, %v1245_v8  ;;  %3683 = vmatmul.msk.f32.gmra.mxu2 %vm715_vm4, %v1245_v8 }
 0x37d   : > { %3691 = vmatmul.msk.f32.gmra.mxu3 %vm715_vm4, %v1245_v8  ;;  %3699 = vmatmul.msk.f32.gmra.mxu1 %vm715_vm4, %v1245_v8 }
 0x37e   : > { %1828 = vmatpush.msra.mxu3 %v4730_v58  ;;  %1848 = vmatpush.msrb.mxu1 %v4725_v11 }
 0x37f   : > { %1789 = vmatpush.msrb.mxu0 %v4716_v63  ;;  %1810 = vmatpush.msrb.mxu2 %v4711_v62 }
 0x380   : > { %1829 = vmatpush.msra.mxu3 %v4754_v5  ;;  %1849 = vmatpush.msrb.mxu1 %v4749_v15 }
 0x381   : > { %1790 = vmatpush.msrb.mxu0 %v4738_v14  ;;  %1811 = vmatpush.msrb.mxu2 %v4763_v13 }
 0x382   : > { %1830 = vmatpush.msra.mxu3 %v4780_v20  ;;  %1850 = vmatpush.msrb.mxu1 %v4785_v23 }
 0x383   : > { %1791 = vmatpush.msrb.mxu0 %v4769_v21  ;;  %1812 = vmatpush.msrb.mxu2 %v4792_v31 }
 0x384   : > { %1579 = vmatmul.f32.vlgmr.msra.gmra.mxu0 %v3975_v33  ;;  %1599 = vmatmul.f32.vlgmr.msra.gmra.mxu2 %v3975_v33 }
 0x385   : > { %1619 = vmatmul.f32.vlgmr.msrb.gmra.mxu3 %v3975_v33  ;;  %1639 = vmatmul.f32.vlgmr.msra.gmra.mxu1 %v3975_v33 }
 0x386   : > { %1831 = vmatpush.msra.mxu3 %v4816_v16  ;;  %1851 = vmatpush.msrb.mxu1 %v4821_v44 }
 0x387   : > { %1792 = vmatpush.msrb.mxu0 %v4807_v48  ;;  %1813 = vmatpush.msrb.mxu2 %v6623_v10 }
 0x388   : > { %1832 = vmatpush.msra.mxu3 %v4845_v2  ;;  %1852 = vmatpush.msrb.mxu1 %v4850_v1 }
 0x389   : > { %1793 = vmatpush.msrb.mxu0 %v4834_v54  ;;  %1814 = vmatpush.msrb.mxu2 %v6627_v30 }
 0x38a   : > { %1833 = vmatpush.msra.mxu3 %v6624_v17  ;;  %1853 = vmatpush.msrb.mxu1 %v6625_v6 }
 0x38b   : > { %1794 = vmatpush.msrb.mxu0 %v6626_v9  ;;  %1815 = vmatpush.msrb.mxu2 %v6630_v0 }
 0x38c   : > { %1834 = vmatpush.msra.mxu3 %v4900_v19  ;;  %1854 = vmatpush.msrb.mxu1 %v6628_v60 }
 0x38d   : > { %1795 = vmatpush.msrb.mxu0 %v6629_v53  ;;  %1816 = vmatpush.msrb.mxu2 %v6632_v39 }
 0x38e   : > { %1835 = vmatpush.msra.mxu3 %v6631_v41  ;;  %1855 = vmatpush.msrb.mxu1 %v4934_v46 }
 0x38f   : > { %1796 = vmatpush.msrb.mxu0 %v4939_v40  ;;  %1817 = vmatpush.msrb.mxu2 %v6633_v25 }
 0x390   : > { %1836 = vmatpush.msra.mxu3 %v4949_v4  ;;  %1856 = vmatpush.msrb.mxu1 %v4959_v7 }
 0x391   : > { %1797 = vmatpush.msrb.mxu0 %v4964_v45 }
 0x392   : > { %1837 = vmatpush.msra.mxu3 %v4977_v3  ;;  %1857 = vmatpush.msrb.mxu1 %v4982_v61 }
 0x394   : > { %2042 = vmatpush.msrb.mxu3 %v4582_v12  ;;  %2062 = vmatpush.msra.mxu1 %v4562_v59 }
 0x396   : > { %2043 = vmatpush.msrb.mxu3 %v4598_v24  ;;  %2063 = vmatpush.msra.mxu1 %v4593_v22  ;;  %v1262_v22 = vld [vmem:[%s6535_s10] sm:$0xf] }
 0x398   : > { %2044 = vmatpush.msrb.mxu3 %v4625_v34  ;;  %2064 = vmatpush.msra.mxu1 %v4620_v32  ;;  %v1264_v32 = vperm.slane %v1262_v22, 0 }
 0x39a   : > { %2045 = vmatpush.msrb.mxu3 %v4649_v38  ;;  %2065 = vmatpush.msra.mxu1 %v4644_v29  ;;  %v1267_v29 = vperm.slane %v1262_v22, 3 }
 0x39c   : > { %2046 = vmatpush.msrb.mxu3 %v4667_v43  ;;  %2066 = vmatpush.msra.mxu1 %v4662_v42 }
 0x39e   : > { %2047 = vmatpush.msrb.mxu3 %v4690_v47  ;;  %2067 = vmatpush.msra.mxu1 %v4685_v37  ;;  %v1265_v47 = vperm.slane %v1262_v22, 1 }
 0x3a0   : > { %2048 = vmatpush.msrb.mxu3 %v4730_v58  ;;  %2068 = vmatpush.msra.mxu1 %v4725_v11  ;;  %v5111_v11 = vperm.slane %v1262_v22, 2 }
 0x3a2   : > { %2049 = vmatpush.msrb.mxu3 %v4754_v5  ;;  %2069 = vmatpush.msra.mxu1 %v4749_v15 }
 0x3a4   : > { %2050 = vmatpush.msrb.mxu3 %v4780_v20  ;;  %2070 = vmatpush.msra.mxu1 %v4785_v23 }
 0x3a6   : > { %2051 = vmatpush.msrb.mxu3 %v4816_v16  ;;  %2071 = vmatpush.msra.mxu1 %v4821_v44 }
 0x3a8   : > { %2052 = vmatpush.msrb.mxu3 %v4845_v2  ;;  %2072 = vmatpush.msra.mxu1 %v4850_v1 }
 0x3aa   : > { %2053 = vmatpush.msrb.mxu3 %v6624_v17  ;;  %2073 = vmatpush.msra.mxu1 %v6625_v6 }
 0x3ac   : > { %2054 = vmatpush.msrb.mxu3 %v4900_v19  ;;  %2074 = vmatpush.msra.mxu1 %v6628_v60 }
 0x3ae   : > { %2055 = vmatpush.msrb.mxu3 %v6631_v41  ;;  %2075 = vmatpush.msra.mxu1 %v4934_v46 }
 0x3b0   : > { %2056 = vmatpush.msrb.mxu3 %v4949_v4  ;;  %2076 = vmatpush.msra.mxu1 %v4959_v7 }
 0x3b2   : > { %2057 = vmatpush.msrb.mxu3 %v4977_v3  ;;  %2077 = vmatpush.msra.mxu1 %v4982_v61 }
 0x3c1   : > { %v1313_v59 = vpop.f32.mrf.mxu0 }
 0x3c2   : > { %v5098_v12 = vpop.f32.mrf.mxu1 }
 0x3c7   : > { %v5103_v24 = vpop.f32.mrf.mxu2 }
 0x3c8   : > { %v5105_v34 = vpop.f32.mrf.mxu3 }
 0x3c9   : > { %v1316_v38 = vpop.f32.mrf.mxu0 }
 0x3ca   : > { %v5107_v42 = vadd.f32 %v1316_v38, %v1264_v32  ;;  %v1439_v43 = vpop.f32.mrf.mxu1 }
 0x3cb   : > { %v5109_v37 = vadd.f32 %v1439_v43, %v1267_v29 }
 0x3cf   : > { %v1357_v58 = vpop.f32.mrf.mxu2 }
 0x3d0   : > { %v5113_v15 = vadd.f32 %v1357_v58, %v1265_v47  ;;  %v1398_v5 = vpop.f32.mrf.mxu3 }
 0x3d1   : > { %v5116_v20 = vadd.f32 %v1398_v5, %v5111_v11  ;;  %v1319_v23 = vpop.f32.mrf.mxu0 }
 0x3d2   : > { %v5118_v16 = vadd.f32 %v1319_v23, %v1264_v32  ;;  %v1442_v44 = vpop.f32.mrf.mxu1 }
 0x3d3   : > { %v5120_v2 = vadd.f32 %v1442_v44, %v1267_v29 }
 0x3d7   : > { %v1360_v1 = vpop.f32.mrf.mxu2 }
 0x3d8   : > { %v5122_v4 = vadd.f32 %v1360_v1, %v1265_v47  ;;  %v1401_v19 = vpop.f32.mrf.mxu3 }
 0x3d9   : > { %v5125_v46 = vadd.f32 %v1401_v19, %v5111_v11  ;;  %v1322_v7 = vpop.f32.mrf.mxu0 }
 0x3da   : > { %v5127_v3 = vadd.f32 %v1322_v7, %v1264_v32  ;;  %v1445_v61 = vpop.f32.mrf.mxu1 }
 0x3db   : > { %v5129_v49 = vadd.f32 %v1445_v61, %v1267_v29 }
 0x3dc   : > { %6634 = vst [vmem:[#allocation5_spill] sm:$0xff] %v5127_v3  ;;  %v5596_v3 = vld [vmem:[%s6536_s11 + $0x38] sm:$0xff] }
 0x3dd   : > { %6635 = vst [vmem:[#allocation9_spill] sm:$0xff] %v5129_v49  ;;  %v5591_v49 = vld [vmem:[%s6536_s11 + $0x30] sm:$0xff] }
 0x3df   : > { %v1363_v18 = vpop.f32.mrf.mxu2 }
 0x3e0   : > { %v5131_v26 = vadd.f32 %v1363_v18, %v1265_v47  ;;  %v1404_v27 = vpop.f32.mrf.mxu3 }
 0x3e1   : > { %v5134_v35 = vadd.f32 %v1404_v27, %v5111_v11  ;;  %v1325_v50 = vpop.f32.mrf.mxu0 }
 0x3e2   : > { %6636 = vst [vmem:[#allocation10_spill] sm:$0xff] %v5131_v26  ;;  %v5136_v56 = vadd.f32 %v1325_v50, %v1264_v32  ;;  %v1448_v55 = vpop.f32.mrf.mxu1  ;;  %v5583_v26 = vld [vmem:[%s6536_s11 + $0x28] sm:$0xff] }
 0x3e3   : > { %6637 = vst [vmem:[#allocation8_spill] sm:$0xff] %v5134_v35  ;;  %v5138_v28 = vadd.f32 %v1448_v55, %v1267_v29  ;;  %v5571_v35 = vld [vmem:[%s6536_s11 + $0x58] sm:$0xff] }
 0x3e4   : > { %6638 = vst [vmem:[#allocation6_spill] sm:$0xff] %v5136_v56  ;;  %v5566_v56 = vld [vmem:[%s6536_s11 + $0x50] sm:$0xff] }
 0x3e5   : > { %6639 = vst [vmem:[#allocation12_spill] sm:$0xff] %v5138_v28  ;;  %v5561_v28 = vld [vmem:[%s6536_s11 + $0x48] sm:$0xff] }
 0x3e6   : > { %6660 = vst [vmem:[#allocation31_spill] sm:$0xff] %v5561_v28 }
 0x3e7   : > { %v1366_v57 = vpop.f32.mrf.mxu2  ;;  %6661 = vst [vmem:[#allocation32_spill] sm:$0xff] %v5566_v56 }
 0x3e8   : > { %v5140_v8 = vadd.f32 %v1366_v57, %v1265_v47  ;;  %v1407_v33 = vpop.f32.mrf.mxu3  ;;  %6662 = vst [vmem:[#allocation33_spill] sm:$0xff] %v5571_v35 }
 0x3e9   : > { %v5143_v17 = vadd.f32 %v1407_v33, %v5111_v11  ;;  %v1328_v6 = vpop.f32.mrf.mxu0  ;;  %6664 = vst [vmem:[#allocation35_spill] sm:$0xff] %v5583_v26 }
 0x3ea   : > { %6640 = vst [vmem:[#allocation13_spill] sm:$0xff] %v5140_v8  ;;  %v5145_v60 = vadd.f32 %v1328_v6, %v1264_v32  ;;  %v1451_v41 = vpop.f32.mrf.mxu1 }
 0x3eb   : > { %6641 = vst [vmem:[#allocation7_spill] sm:$0xff] %v5143_v17  ;;  %v5147_v22 = vadd.f32 %v1451_v41, %v1267_v29  ;;  %v1314_v41 = vadd.f32 %v1313_v59, %v1264_v32  ;;  %v5552_v17 = vld [vmem:[%s6536_s11 + $0x40] sm:$0xff] }
 0x3ec   : > { %6642 = vst [vmem:[#allocation14_spill] sm:$0xff] %v5145_v60  ;;  %v5547_v60 = vld [vmem:[%s6536_s11 + $0x78] sm:$0xff] }
 0x3ed   : > { %6643 = vst [vmem:[#allocation11_spill] sm:$0xff] %v5147_v22  ;;  %v5542_v22 = vld [vmem:[%s6536_s11 + $0x70] sm:$0xff] }
 0x3ee   : > { %6657 = vst [vmem:[#allocation28_spill] sm:$0xff] %v5542_v22 }
 0x3ef   : > { %v1369_v38 = vpop.f32.mrf.mxu2  ;;  %6658 = vst [vmem:[#allocation29_spill] sm:$0xff] %v5547_v60 }
 0x3f0   : > { %v5149_v43 = vadd.f32 %v1369_v38, %v1265_v47  ;;  %v1410_v58 = vpop.f32.mrf.mxu3  ;;  %6659 = vst [vmem:[#allocation30_spill] sm:$0xff] %v5552_v17 }
 0x3f1   : > { %v5152_v5 = vadd.f32 %v1410_v58, %v5111_v11  ;;  %v1331_v23 = vpop.f32.mrf.mxu0 }
 0x3f2   : > { %6644 = vst [vmem:[#allocation15_spill] sm:$0xff] %v5149_v43  ;;  %v5154_v44 = vadd.f32 %v1331_v23, %v1264_v32  ;;  %v1454_v1 = vpop.f32.mrf.mxu1  ;;  %v1437_v23 = vadd.f32 %v5098_v12, %v1267_v29 }
 0x3f3   : > { %6645 = vst [vmem:[#allocation16_spill] sm:$0xff] %v5152_v5  ;;  %v5156_v19 = vadd.f32 %v1454_v1, %v1267_v29 }
 0x3f4   : > { %6646 = vst [vmem:[#allocation17_spill] sm:$0xff] %v5154_v44 }
 0x3f5   : > { %6647 = vst [vmem:[#allocation18_spill] sm:$0xff] %v5156_v19 }
 0x3f7   : > { %v1372_v7 = vpop.f32.mrf.mxu2 }
 0x3f8   : > { %v5158_v61 = vadd.f32 %v1372_v7, %v1265_v47  ;;  %v1413_v18 = vpop.f32.mrf.mxu3 }
 0x3f9   : > { %v5161_v27 = vadd.f32 %v1413_v18, %v5111_v11  ;;  %v1334_v50 = vpop.f32.mrf.mxu0 }
 0x3fa   : > { %6648 = vst [vmem:[#allocation19_spill] sm:$0xff] %v5158_v61  ;;  %v5163_v55 = vadd.f32 %v1334_v50, %v1264_v32  ;;  %v1457_v57 = vpop.f32.mrf.mxu1 }
 0x3fb   : > { %6649 = vst [vmem:[#allocation20_spill] sm:$0xff] %v5161_v27  ;;  %v5165_v33 = vadd.f32 %v1457_v57, %v1267_v29 }
 0x3fc   : > { %6650 = vst [vmem:[#allocation21_spill] sm:$0xff] %v5163_v55  ;;  %v1355_v55 = vadd.f32 %v5103_v24, %v1265_v47  ;;  %v1396_v24 = vadd.f32 %v5105_v34, %v5111_v11 }
 0x3fd   : > { %6651 = vst [vmem:[#allocation22_spill] sm:$0xff] %v5165_v33 }
 0x3ff   : > { %v1375_v6 = vpop.f32.mrf.mxu2 }
 0x400   : > { %v5167_v38 = vadd.f32 %v1375_v6, %v1265_v47  ;;  %v1416_v58 = vpop.f32.mrf.mxu3 }
 0x401   : > { %v5171_v1 = vadd.f32 %v1416_v58, %v5111_v11  ;;  %v1580_v7 = vpop.f32.mrf.mxu0 }
 0x402   : > { %6652 = vst [vmem:[#allocation23_spill] sm:$0xff] %v5167_v38  ;;  %v1643_v61 = vadd.f32 %v1580_v7, %v1314_v41  ;;  %v1640_v18 = vpop.f32.mrf.mxu1 }
 0x403   : > { %6653 = vst [vmem:[#allocation24_spill] sm:$0xff] %v5171_v1  ;;  %v1646_v27 = vadd.f32 %v1640_v18, %v1437_v23 }
 0x404   : > { %v3700_v19 = vmul.f32 -1.442695, %v1643_v61 }
 0x405   : > { %v3702_v50 = vmul.f32 -1.442695, %v1646_v27 }
 0x406   : > { %3807 = vpow2.f32 %v3700_v19 }
 0x407   : > { %3809 = vpow2.f32 %v3702_v50  ;;  %v1600_v57 = vpop.f32.mrf.mxu2 }
 0x408   : > { %v1644_v59 = vadd.f32 %v1600_v57, %v1355_v55  ;;  %v1620_v23 = vpop.f32.mrf.mxu3 }
 0x409   : > { %v1645_v7 = vadd.f32 %v1620_v23, %v1396_v24 }
 0x40a   : > { %v3701_v32 = vmul.f32 -1.442695, %v1644_v59 }
 0x40c   : > { %v3808_v6 = vpop.eup %3807  ;;  %3811 = vpow2.f32 %v3701_v32 }
 0x40d   : > { %v3810_v38 = vpop.eup %3809  ;;  %v1650_v12 = vadd.f32 1.0, %v3808_v6 }
 0x40e   : > { %v1689_v29 = vadd.f32 1.0, %v3810_v38 }
 0x40f   : > { %3813 = vrcp.f32 %v1650_v12  ;;  %v1662_v38 = vand.u32 2147483648, %v1650_v12  ;;  %vm1656_vm8 = vweird.f32 %v1650_v12  ;;  %v1660_v32 = vand.u32 2147483647, %v1650_v12 }
 0x410   : > { %3815 = vrcp.f32 %v1689_v29  ;;  %vm1695_vm0 = vweird.f32 %v1689_v29 }
 0x411   : > { %v1663_v11 = vor.u32 1.1754944e-38, %v1662_v38  ;;  %vm1661_vm12 = vcmp.eq.f32.partialorder %v1660_v32, 8.507059e+37  ;;  %v5217_v32 = vld [vmem:[%s6536_s11 + $0x1a8] sm:$0xff] }
 0x412   : > { %v3812_v58 = vpop.eup %3811 }
 0x413   : > { %v1669_v1 = vadd.f32 1.0, %v3812_v58 }
 0x415   : > { %v3814_v41 = vpop.eup %3813  ;;  %3817 = vrcp.f32 %v1669_v1  ;;  %v1681_v6 = vand.u32 2147483648, %v1669_v1  ;;  %v1679_v33 = vand.u32 2147483647, %v1669_v1  ;;  %vm1675_vm11 = vweird.f32 %v1669_v1 }
 0x416   : > { %v1652_v61 = vmul.f32 %v3814_v41, %v1650_v12  ;;  %v3816_v47 = vpop.eup %3815  ;;  %vm1657_vm7 = vweird.f32 %v3814_v41  ;;  %3819 = vtanh.f32 %v1645_v7 }
 0x417   : > { %v1691_v57 = vmul.f32 %v3816_v47, %v1689_v29  ;;  %vm1658_vm9 = vmor %vm1656_vm8, %vm1657_vm7  ;;  %v1682_v23 = vor.u32 1.1754944e-38, %v1681_v6  ;;  %vm1680_vm14 = vcmp.eq.f32.partialorder %v1679_v33, 8.507059e+37  ;;  %vm1696_vm15 = vweird.f32 %v3816_v47  ;;  %v5224_v6 = vld [vmem:[%s6536_s11 + $0x180] sm:$0xff] }
 0x418   : > { %v1653_v27 = vsub.f32 1.0, %v1652_v61  ;;  %vm1697_vm1 = vmor %vm1695_vm0, %vm1696_vm15 }
 0x419   : > { %v1692_v34 = vsub.f32 1.0, %v1691_v57 }
 0x41a   : > { %v1654_v19 = vmul.f32 %v3814_v41, %v1653_v27 }
 0x41b   : > { %v3818_v55 = vpop.eup %3817  ;;  %v1693_v44 = vmul.f32 %v3816_v47, %v1692_v34  ;;  %v5241_v34 = vld [vmem:[%s6536_s11 + $0x168] sm:$0xff] }
 0x41c   : > { %v1671_v18 = vmul.f32 %v3818_v55, %v1669_v1  ;;  %v1655_v50 = vadd.f32 %v3814_v41, %v1654_v19  ;;  %vm1676_vm10 = vweird.f32 %v3818_v55  ;;  %v1699_v1 = vand.u32 2147483647, %v1689_v29 }
 0x41d   : > { %vm1677_vm13 = vmor %vm1675_vm11, %vm1676_vm10 }
 0x41e   : > { %v1672_v59 = vsub.f32 1.0, %v1671_v18  ;;  %v1659_v61 = vsel %vm1658_vm9, %v3814_v41, %v1655_v50  ;;  %v3820_v18 = vpop.eup %3819  ;;  %v1694_v41 = vadd.f32 %v3816_v47, %v1693_v44  ;;  %v1701_v50 = vand.u32 2147483648, %v1689_v29  ;;  %v5200_v44 = vld [vmem:[%s6536_s11 + $0x1c0] sm:$0xff]  ;;  %v5205_v29 = vld [vmem:[%s6536_s11 + $0x1c8] sm:$0xff] }
 0x41f   : > { %v1664_v24 = vsel %vm1661_vm12, %v1663_v11, %v1659_v61  ;;  %vm1700_vm2 = vcmp.eq.f32.partialorder %v1699_v1, 8.507059e+37  ;;  %v5236_v61 = vld [vmem:[%s6536_s11 + $0x160] sm:$0xff]  ;;  %v5248_v11 = vld [vmem:[%s6536_s11 + $0x148] sm:$0xff] }
 0x420   : > { %v1673_v58 = vmul.f32 %v3818_v55, %v1672_v59  ;;  %v1706_v43 = vmul.f32 %v3820_v18, %v1664_v24  ;;  %v1698_v57 = vsel %vm1697_vm1, %v3816_v47, %v1694_v41  ;;  %v1702_v38 = vor.u32 1.1754944e-38, %v1701_v50  ;;  %v5212_v47 = vld [vmem:[%s6536_s11 + $0x1a0] sm:$0xff] }
 0x422   : > { %v1674_v27 = vadd.f32 %v3818_v55, %v1673_v58  ;;  %v1703_v33 = vsel %vm1700_vm2, %v1702_v38, %v1698_v57  ;;  %v5229_v58 = vld [vmem:[%s6536_s11 + $0x188] sm:$0xff] }
 0x424   : > { %v1678_v19 = vsel %vm1677_vm13, %v3818_v55, %v1674_v27  ;;  %v5255_v27 = vld [vmem:[%s6536_s11 + $0x128] sm:$0xff] }
 0x425   : > { %v1683_v12 = vsel %vm1680_vm14, %v1682_v23, %v1678_v19 }
 0x426   : > { %v1705_v5 = vmul.f32 0.0, %v1683_v12 }
 0x428   : > { %v5176_v7 = vadd.f32 %v1706_v43, %v1705_v5  ;;  %v5188_v43 = vld [vmem:[%s6536_s11 + $0x1e0] sm:$0xff]  ;;  %v5193_v5 = vld [vmem:[%s6536_s11 + $0x1e8] sm:$0xff] }
 0x429   : > { %2002 = vmatpush.msra.mxu0 %v5188_v43  ;;  %2022 = vmatpush.msra.mxu2 %v5193_v5 }
 0x42a   : > { %3821 = vtanh.f32 %v5176_v7 }
 0x42b   : > { %2003 = vmatpush.msra.mxu0 %v5200_v44  ;;  %2023 = vmatpush.msra.mxu2 %v5205_v29 }
 0x42d   : > { %2004 = vmatpush.msra.mxu0 %v5212_v47  ;;  %2024 = vmatpush.msra.mxu2 %v5217_v32 }
 0x42f   : > { %2005 = vmatpush.msra.mxu0 %v5224_v6  ;;  %2025 = vmatpush.msra.mxu2 %v5229_v58 }
 0x430   : > { %v3822_v55 = vpop.eup %3821 }
 0x431   : > { %v5179_v59 = vmul.f32 %v3822_v55, %v1703_v33  ;;  %2006 = vmatpush.msra.mxu0 %v5236_v61  ;;  %2026 = vmatpush.msra.mxu2 %v5241_v34 }
 0x433   : > { %6654 = vst [vmem:[#allocation25_spill] sm:$0xff] %v5179_v59  ;;  %1798 = vmatmul.f32.vlgmr.msrb.gmra.mxu0 %v5179_v59  ;;  %1818 = vmatmul.f32.vlgmr.msrb.gmra.mxu2 %v5179_v59 }
 0x434   : > { %1838 = vmatmul.f32.vlgmr.msra.gmra.mxu3 %v5179_v59  ;;  %1858 = vmatmul.f32.vlgmr.msrb.gmra.mxu1 %v5179_v59 }
 0x435   : > { %2007 = vmatpush.msra.mxu0 %v4675_v36  ;;  %2027 = vmatpush.msra.mxu2 %v5248_v11 }
 0x437   : > { %2008 = vmatpush.msra.mxu0 %v4701_v52  ;;  %2028 = vmatpush.msra.mxu2 %v5255_v27 }
 0x439   : > { %2009 = vmatpush.msra.mxu0 %v4716_v63  ;;  %2029 = vmatpush.msra.mxu2 %v4696_v51 }
 0x43b   : > { %2010 = vmatpush.msra.mxu0 %v4738_v14  ;;  %2030 = vmatpush.msra.mxu2 %v4711_v62 }
 0x43d   : > { %2011 = vmatpush.msra.mxu0 %v4769_v21  ;;  %2031 = vmatpush.msra.mxu2 %v4763_v13 }
 0x43f   : > { %2012 = vmatpush.msra.mxu0 %v4807_v48  ;;  %2032 = vmatpush.msra.mxu2 %v4792_v31 }
 0x441   : > { %2013 = vmatpush.msra.mxu0 %v4834_v54  ;;  %2033 = vmatpush.msra.mxu2 %v6623_v10 }
 0x443   : > { %2014 = vmatpush.msra.mxu0 %v6626_v9  ;;  %2034 = vmatpush.msra.mxu2 %v6627_v30 }
 0x445   : > { %2015 = vmatpush.msra.mxu0 %v6629_v53  ;;  %2035 = vmatpush.msra.mxu2 %v6630_v0 }
 0x447   : > { %2016 = vmatpush.msra.mxu0 %v4939_v40  ;;  %2036 = vmatpush.msra.mxu2 %v6632_v39 }
 0x449   : > { %2017 = vmatpush.msra.mxu0 %v4964_v45  ;;  %2037 = vmatpush.msra.mxu2 %v6633_v25 }
 0x44b   : > { %2222 = vmatpush.msrb.mxu0 %v5188_v43  ;;  %2242 = vmatpush.msrb.mxu2 %v5193_v5 }
 0x44d   : > { %2223 = vmatpush.msrb.mxu0 %v5200_v44  ;;  %2243 = vmatpush.msrb.mxu2 %v5205_v29 }
 0x44f   : > { %2224 = vmatpush.msrb.mxu0 %v5212_v47  ;;  %2244 = vmatpush.msrb.mxu2 %v5217_v32 }
 0x451   : > { %2225 = vmatpush.msrb.mxu0 %v5224_v6  ;;  %2245 = vmatpush.msrb.mxu2 %v5229_v58 }
 0x453   : > { %2226 = vmatpush.msrb.mxu0 %v5236_v61  ;;  %2246 = vmatpush.msrb.mxu2 %v5241_v34 }
 0x455   : > { %2247 = vmatpush.msrb.mxu2 %v5248_v11 }
 0x457   : > { %2248 = vmatpush.msrb.mxu2 %v5255_v27 }
 0x4b0   : > { %v1799_v23 = vpop.f32.mrf.mxu0 }
 0x4b1   : > { %v1862_v24 = vadd.f32 %v1799_v23, %v5107_v42  ;;  %v1859_v19 = vpop.f32.mrf.mxu1 }
 0x4b2   : > { %v1865_v18 = vadd.f32 %v1859_v19, %v5109_v37 }
 0x4b3   : > { %v3703_v36 = vmul.f32 -1.442695, %v1862_v24 }
 0x4b4   : > { %v3705_v12 = vmul.f32 -1.442695, %v1865_v18 }
 0x4b5   : > { %3823 = vpow2.f32 %v3703_v36 }
 0x4b6   : > { %3825 = vpow2.f32 %v3705_v12  ;;  %v1819_v52 = vpop.f32.mrf.mxu2 }
 0x4b7   : > { %v1863_v42 = vadd.f32 %v1819_v52, %v5113_v15  ;;  %v1839_v31 = vpop.f32.mrf.mxu3 }
 0x4b8   : > { %v1864_v10 = vadd.f32 %v1839_v31, %v5116_v20 }
 0x4b9   : > { %v3704_v51 = vmul.f32 -1.442695, %v1863_v42 }
 0x4bb   : > { %v3824_v63 = vpop.eup %3823  ;;  %3827 = vpow2.f32 %v3704_v51 }
 0x4bc   : > { %v3826_v62 = vpop.eup %3825  ;;  %v1869_v14 = vadd.f32 1.0, %v3824_v63 }
 0x4bd   : > { %v5276_v13 = vadd.f32 1.0, %v3826_v62 }
 0x4be   : > { %3829 = vrcp.f32 %v1869_v14  ;;  %v1881_v45 = vand.u32 2147483648, %v1869_v14  ;;  %v1879_v0 = vand.u32 2147483647, %v1869_v14  ;;  %vm1875_vm6 = vweird.f32 %v1869_v14 }
 0x4bf   : > { %3831 = vrcp.f32 %v5276_v13  ;;  %v1920_v62 = vand.u32 2147483648, %v5276_v13  ;;  %vm1914_vm14 = vweird.f32 %v5276_v13 }
 0x4c0   : > { %v1882_v20 = vor.u32 1.1754944e-38, %v1881_v45  ;;  %vm1880_vm8 = vcmp.eq.f32.partialorder %v1879_v0, 8.507059e+37  ;;  %v5337_v45 = vld [vmem:[%s6536_s11 + $0x1b0] sm:$0xff]  ;;  %v5354_v0 = vld [vmem:[%s6536_s11 + $0x198] sm:$0xff] }
 0x4c1   : > { %v3828_v21 = vpop.eup %3827  ;;  %v1921_v31 = vor.u32 1.1754944e-38, %v1920_v62  ;;  %v5464_v62 = vld [vmem:[%s6536_s11 + $0xc8] sm:$0xff] }
 0x4c2   : > { %v1888_v48 = vadd.f32 1.0, %v3828_v21 }
 0x4c4   : > { %v3830_v54 = vpop.eup %3829  ;;  %3833 = vrcp.f32 %v1888_v48  ;;  %v1900_v57 = vand.u32 2147483648, %v1888_v48  ;;  %v1898_v33 = vand.u32 2147483647, %v1888_v48  ;;  %vm1894_vm10 = vweird.f32 %v1888_v48 }
 0x4c5   : > { %v1871_v40 = vmul.f32 %v3830_v54, %v1869_v14  ;;  %3835 = vtanh.f32 %v1864_v10  ;;  %v3832_v30 = vpop.eup %3831  ;;  %vm1876_vm5 = vweird.f32 %v3830_v54  ;;  %v1918_v14 = vand.u32 2147483647, %v5276_v13 }
 0x4c6   : > { %v1910_v15 = vmul.f32 %v3832_v30, %v5276_v13  ;;  %vm1877_vm7 = vmor %vm1875_vm6, %vm1876_vm5  ;;  %v1901_v18 = vor.u32 1.1754944e-38, %v1900_v57  ;;  %vm1899_vm12 = vcmp.eq.f32.partialorder %v1898_v33, 8.507059e+37  ;;  %vm1915_vm13 = vweird.f32 %v3832_v30  ;;  %v5318_v13 = vld [vmem:[%s6536_s11 + $0x1f8] sm:$0xff]  ;;  %v5410_v33 = vld [vmem:[%s6536_s11 + $0x100] sm:$0xff] }
 0x4c7   : > { %v1872_v9 = vsub.f32 1.0, %v1871_v40  ;;  %vm1916_vm15 = vmor %vm1914_vm14, %vm1915_vm13  ;;  %vm1919_vm0 = vcmp.eq.f32.partialorder %v1918_v14, 8.507059e+37  ;;  %2282 = vmatpush.msrb.mxu1 %v5318_v13  ;;  %v5325_v40 = vld [vmem:[%s6536_s11 + $0x1d0] sm:$0xff] }
 0x4c8   : > { %v1911_v24 = vsub.f32 1.0, %v1910_v15  ;;  %v5378_v15 = vld [vmem:[%s6536_s11 + $0x150] sm:$0xff] }
 0x4c9   : > { %v1873_v53 = vmul.f32 %v3830_v54, %v1872_v9  ;;  %v5330_v9 = vld [vmem:[%s6536_s11 + $0x1d8] sm:$0xff]  ;;  %v5469_v14 = vld [vmem:[%s6536_s11 + $0xd0] sm:$0xff] }
 0x4ca   : > { %v3834_v39 = vpop.eup %3833  ;;  %v1912_v12 = vmul.f32 %v3832_v30, %v1911_v24  ;;  %2283 = vmatpush.msrb.mxu1 %v5330_v9  ;;  %v5420_v24 = vld [vmem:[%s6536_s11 + $0x110] sm:$0xff] }
 0x4cb   : > { %v1890_v25 = vmul.f32 %v3834_v39, %v1888_v48  ;;  %v1874_v37 = vadd.f32 %v3830_v54, %v1873_v53  ;;  %v3836_v1 = vpop.eup %3835  ;;  %vm1895_vm9 = vweird.f32 %v3834_v39  ;;  %v5349_v53 = vld [vmem:[%s6536_s11 + $0x190] sm:$0xff] }
 0x4cc   : > { %vm1896_vm11 = vmor %vm1894_vm10, %vm1895_vm9  ;;  %v1913_v63 = vadd.f32 %v3832_v30, %v1912_v12  ;;  %v5445_v12 = vld [vmem:[%s6536_s11 + $0xf0] sm:$0xff] }
 0x4cd   : > { %v1891_v41 = vsub.f32 1.0, %v1890_v25  ;;  %v1878_v50 = vsel %vm1877_vm7, %v3830_v54, %v1874_v37  ;;  %v5366_v25 = vld [vmem:[%s6536_s11 + $0x178] sm:$0xff]  ;;  %v5373_v37 = vld [vmem:[%s6536_s11 + $0x140] sm:$0xff] }
 0x4ce   : > { %v1883_v38 = vsel %vm1880_vm8, %v1882_v20, %v1878_v50  ;;  %v1917_v21 = vsel %vm1916_vm15, %v3832_v30, %v1913_v63  ;;  %v5342_v30 = vld [vmem:[%s6536_s11 + $0x1b8] sm:$0xff]  ;;  %2227 = vmatpush.msrb.mxu0 %v5373_v37  ;;  %v5396_v50 = vld [vmem:[%s6536_s11 + $0x130] sm:$0xff]  ;;  %v5459_v63 = vld [vmem:[%s6536_s11 + $0xc0] sm:$0xff] }
 0x4cf   : > { %v1892_v55 = vmul.f32 %v3834_v39, %v1891_v41  ;;  %v1925_v23 = vmul.f32 %v3836_v1, %v1883_v38  ;;  %v1922_v54 = vsel %vm1919_vm0, %v1921_v31, %v1917_v21  ;;  %2284 = vmatpush.msrb.mxu1 %v5342_v30  ;;  %v5383_v20 = vld [vmem:[%s6536_s11 + $0x158] sm:$0xff]  ;;  %v5391_v41 = vld [vmem:[%s6536_s11 + $0x120] sm:$0xff] }
 0x4d0   : > { %v5401_v1 = vld [vmem:[%s6536_s11 + $0x138] sm:$0xff]  ;;  %2228 = vmatpush.msrb.mxu0 %v5391_v41 }
 0x4d1   : > { %v1893_v19 = vadd.f32 %v3834_v39, %v1892_v55  ;;  %2285 = vmatpush.msrb.mxu1 %v5354_v0  ;;  %v5476_v31 = vld [vmem:[%s6536_s11 + $0xd8] sm:$0xff] }
 0x4d2   : > { %2229 = vmatpush.msrb.mxu0 %v5410_v33 }
 0x4d3   : > { %v1897_v36 = vsel %vm1896_vm11, %v3834_v39, %v1893_v19  ;;  %v5361_v39 = vld [vmem:[%s6536_s11 + $0x170] sm:$0xff]  ;;  %2286 = vmatpush.msrb.mxu1 %v5366_v25  ;;  %v5428_v19 = vld [vmem:[%s6536_s11 + $0x118] sm:$0xff] }
 0x4d4   : > { %v1902_v52 = vsel %vm1899_vm12, %v1901_v18, %v1897_v36  ;;  %v5435_v36 = vld [vmem:[%s6536_s11 + $0xe0] sm:$0xff] }
 0x4d5   : > { %v1924_v42 = vmul.f32 %v1902_v52, %v5176_v7  ;;  %v5313_v7 = vld [vmem:[%s6536_s11 + $0x1f0] sm:$0xff]  ;;  %2287 = vmatpush.msrb.mxu1 %v5383_v20  ;;  %2230 = vmatpush.msrb.mxu0 %v5435_v36 }
 0x4d6   : > { %2262 = vmatpush.msra.mxu3 %v5313_v7 }
 0x4d7   : > { %v5298_v51 = vadd.f32 %v1925_v23, %v1924_v42  ;;  %2288 = vmatpush.msrb.mxu1 %v5401_v1  ;;  %v5415_v23 = vld [vmem:[%s6536_s11 + $0x108] sm:$0xff]  ;;  %v5452_v42 = vld [vmem:[%s6536_s11 + $0xf8] sm:$0xff]  ;;  %2231 = vmatpush.msrb.mxu0 %v5459_v63 }
 0x4d8   : > { %2263 = vmatpush.msra.mxu3 %v5325_v40  ;;  %2249 = vmatpush.msrb.mxu2 %v5415_v23 }
 0x4d9   : > { %3837 = vtanh.f32 %v5298_v51  ;;  %2289 = vmatpush.msrb.mxu1 %v5428_v19 }
 0x4da   : > { %2264 = vmatpush.msra.mxu3 %v5337_v45 }
 0x4db   : > { %2290 = vmatpush.msrb.mxu1 %v5452_v42 }
 0x4dc   : > { %2265 = vmatpush.msra.mxu3 %v5349_v53 }
 0x4dd   : > { %2291 = vmatpush.msrb.mxu1 %v5476_v31 }
 0x4de   : > { %2266 = vmatpush.msra.mxu3 %v5361_v39 }
 0x4df   : > { %v3838_v48 = vpop.eup %3837 }
 0x4e0   : > { %v5304_v10 = vmul.f32 %v3838_v48, %v1922_v54  ;;  %2267 = vmatpush.msra.mxu3 %v5378_v15  ;;  %v5484_v54 = vld [vmem:[%s6536_s11 + $0xa0] sm:$0xff] }
 0x4e1   : > { %2232 = vmatpush.msrb.mxu0 %v5484_v54 }
 0x4e2   : > { %6655 = vst [vmem:[#allocation26_spill] sm:$0xff] %v5304_v10  ;;  %2018 = vmatmul.f32.vlgmr.msra.gmra.mxu0 %v5304_v10  ;;  %2038 = vmatmul.f32.vlgmr.msra.gmra.mxu2 %v5304_v10 }
 0x4e3   : > { %2058 = vmatmul.f32.vlgmr.msrb.gmra.mxu3 %v5304_v10  ;;  %2078 = vmatmul.f32.vlgmr.msra.gmra.mxu1 %v5304_v10  ;;  %v5535_v10 = vld [vmem:[%s6536_s11 + $0x68] sm:$0xff] }
 0x4e4   : > { %2268 = vmatpush.msra.mxu3 %v5396_v50  ;;  %6656 = vst [vmem:[#allocation27_spill] sm:$0xff] %v5535_v10 }
 0x4e6   : > { %2269 = vmatpush.msra.mxu3 %v5420_v24 }
 0x4e8   : > { %2270 = vmatpush.msra.mxu3 %v5445_v12 }
 0x4ea   : > { %2271 = vmatpush.msra.mxu3 %v5469_v14 }
 0x55f   : > { %v2019_v57 = vpop.f32.mrf.mxu0 }
 0x560   : > { %v2082_v38 = vadd.f32 %v2019_v57, %v5118_v16  ;;  %v2079_v55 = vpop.f32.mrf.mxu1  ;;  %v5489_v57 = vld [vmem:[%s6536_s11 + $0xa8] sm:$0xff] }
 0x561   : > { %v2085_v16 = vadd.f32 %v2079_v55, %v5120_v2  ;;  %v5440_v2 = vld [vmem:[%s6536_s11 + $0xe8] sm:$0xff] }
 0x562   : > { %v3706_v18 = vmul.f32 -1.442695, %v2082_v38  ;;  %2250 = vmatpush.msrb.mxu2 %v5440_v2  ;;  %v5494_v38 = vld [vmem:[%s6536_s11 + $0xb0] sm:$0xff] }
 0x563   : > { %v3708_v52 = vmul.f32 -1.442695, %v2085_v16  ;;  %2272 = vmatpush.msra.mxu3 %v5494_v38  ;;  %v5508_v16 = vld [vmem:[%s6536_s11 + $0x80] sm:$0xff] }
 0x564   : > { %3839 = vpow2.f32 %v3706_v18  ;;  %2251 = vmatpush.msrb.mxu2 %v5464_v62  ;;  %v5513_v18 = vld [vmem:[%s6536_s11 + $0x88] sm:$0xff]  ;;  %2233 = vmatpush.msrb.mxu0 %v5508_v16 }
 0x565   : > { %3841 = vpow2.f32 %v3708_v52  ;;  %v2039_v21 = vpop.f32.mrf.mxu2  ;;  %v5518_v52 = vld [vmem:[%s6536_s11 + $0x90] sm:$0xff] }
 0x566   : > { %v2083_v48 = vadd.f32 %v2039_v21, %v5122_v4  ;;  %2252 = vmatpush.msrb.mxu2 %v5489_v57  ;;  %v5501_v4 = vld [vmem:[%s6536_s11 + $0xb8] sm:$0xff]  ;;  %2273 = vmatpush.msra.mxu3 %v5518_v52 }
 0x567   : > { %2292 = vmatpush.msrb.mxu1 %v5501_v4  ;;  %v5525_v21 = vld [vmem:[%s6536_s11 + $0x98] sm:$0xff] }
 0x568   : > { %v3707_v55 = vmul.f32 -1.442695, %v2083_v48  ;;  %2253 = vmatpush.msrb.mxu2 %v5513_v18  ;;  %v5530_v48 = vld [vmem:[%s6536_s11 + $0x60] sm:$0xff]  ;;  %2274 = vmatpush.msra.mxu3 %v5542_v22  ;;  %v2059_v22 = vpop.f32.mrf.mxu3 }
 0x569   : > { %2293 = vmatpush.msrb.mxu1 %v5525_v21  ;;  %2234 = vmatpush.msrb.mxu0 %v5530_v48 }
 0x56a   : > { %v3840_v59 = vpop.eup %3839  ;;  %3843 = vpow2.f32 %v3707_v55  ;;  %2254 = vmatpush.msrb.mxu2 %v5535_v10  ;;  %2275 = vmatpush.msra.mxu3 %v5566_v56 }
 0x56b   : > { %v3842_v55 = vpop.eup %3841  ;;  %v5554_v8 = vadd.f32 1.0, %v3840_v59  ;;  %2294 = vmatpush.msrb.mxu1 %v5547_v60  ;;  %v5578_v59 = vld [vmem:[%s6536_s11 + $0x20] sm:$0xff]  ;;  %2235 = vmatpush.msrb.mxu0 %v5552_v17  ;;  %v5610_v17 = vld [vmem:[%s6536_s11 + $0x8] sm:$0xff] }
 0x56c   : > { %6663 = vst [vmem:[#allocation34_spill] sm:$0xff] %v5578_v59  ;;  %2255 = vmatpush.msrb.mxu2 %v5561_v28  ;;  %v5598_v60 = vadd.f32 1.0, %v3842_v55  ;;  %v5605_v28 = vld [vmem:[%s6536_s11] sm:$0xff]  ;;  %v5617_v55 = vld [vmem:[%s6536_s11 + $0x10] sm:$0xff]  ;;  %2276 = vmatpush.msra.mxu3 %v5591_v49 }
 0x56d   : > { %3845 = vrcp.f32 %v5554_v8  ;;  %2295 = vmatpush.msrb.mxu1 %v5571_v35  ;;  %2236 = vmatpush.msrb.mxu0 %v5578_v59  ;;  %v5622_v35 = vld [vmem:[%s6536_s11 + $0x18] sm:$0xff]  ;;  %v2084_v59 = vadd.f32 %v2059_v22, %v5125_v46  ;;  %v2101_v46 = vand.u32 2147483648, %v5554_v8  ;;  %vm2095_vm2 = vweird.f32 %v5554_v8 }
 0x56e   : > { %2256 = vmatpush.msrb.mxu2 %v5583_v26  ;;  %6665 = vst [vmem:[#allocation36_spill] sm:$0xff] %v5622_v35  ;;  %3847 = vrcp.f32 %v5598_v60  ;;  %2277 = vmatpush.msra.mxu3 %v5617_v55  ;;  %vm2134_vm12 = vweird.f32 %v5598_v60 }
 0x56f   : > { %2296 = vmatpush.msrb.mxu1 %v5596_v3  ;;  %2237 = vmatpush.msrb.mxu0 %v5605_v28 }
 0x570   : > { %v3844_v56 = vpop.eup %3843  ;;  %2257 = vmatpush.msrb.mxu2 %v5610_v17  ;;  %2482 = vmatpush.msrb.mxu3 %v5313_v7 }
 0x571   : > { %v5626_v10 = vadd.f32 1.0, %v3844_v56  ;;  %2297 = vmatpush.msrb.mxu1 %v5622_v35  ;;  %2442 = vmatpush.msra.mxu0 %v5188_v43 }
 0x572   : > { %2462 = vmatpush.msra.mxu2 %v5193_v5  ;;  %2483 = vmatpush.msrb.mxu3 %v5325_v40  ;;  %v2099_v5 = vand.u32 2147483647, %v5554_v8 }
 0x573   : > { %v3846_v26 = vpop.eup %3845  ;;  %3849 = vrcp.f32 %v5626_v10  ;;  %2502 = vmatpush.msra.mxu1 %v5318_v13  ;;  %2443 = vmatpush.msra.mxu0 %v5200_v44  ;;  %vm2114_vm8 = vweird.f32 %v5626_v10 }
 0x574   : > { %v2091_v56 = vmul.f32 %v3846_v26, %v5554_v8  ;;  %2463 = vmatpush.msra.mxu2 %v5205_v29  ;;  %3851 = vtanh.f32 %v2084_v59  ;;  %v5647_v22 = vpop.eup %3847  ;;  %vm2096_vm1 = vweird.f32 %v3846_v26  ;;  %2484 = vmatpush.msrb.mxu3 %v5337_v45  ;;  %vm2100_vm6 = vcmp.eq.f32.partialorder %v2099_v5, 8.507059e+37 }
 0x575   : > { %2503 = vmatpush.msra.mxu1 %v5330_v9  ;;  %2444 = vmatpush.msra.mxu0 %v5212_v47  ;;  %vm2097_vm5 = vmor %vm2095_vm2, %vm2096_vm1  ;;  %v2120_v59 = vand.u32 2147483648, %v5626_v10  ;;  %vm2135_vm11 = vweird.f32 %v5647_v22 }
 0x576   : > { %v2092_v35 = vsub.f32 1.0, %v2091_v56  ;;  %2464 = vmatpush.msra.mxu2 %v5217_v32  ;;  %2485 = vmatpush.msrb.mxu3 %v5349_v53  ;;  %v2102_v32 = vor.u32 1.1754944e-38, %v2101_v46  ;;  %vm2136_vm13 = vmor %vm2134_vm12, %vm2135_vm11 }
 0x577   : > { %2504 = vmatpush.msra.mxu1 %v5342_v30  ;;  %2445 = vmatpush.msra.mxu0 %v5224_v6 }
 0x578   : > { %v2093_v43 = vmul.f32 %v3846_v26, %v2092_v35  ;;  %2465 = vmatpush.msra.mxu2 %v5229_v58  ;;  %v2130_v35 = vmul.f32 %v5647_v22, %v5598_v60  ;;  %2486 = vmatpush.msrb.mxu3 %v5361_v39 }
 0x579   : > { %v3850_v44 = vpop.eup %3849  ;;  %2505 = vmatpush.msra.mxu1 %v5354_v0  ;;  %2446 = vmatpush.msra.mxu0 %v5236_v61  ;;  %v2118_v61 = vand.u32 2147483647, %v5626_v10 }
 0x57a   : > { %v2110_v29 = vmul.f32 %v3850_v44, %v5626_v10  ;;  %v2094_v47 = vadd.f32 %v3846_v26, %v2093_v43  ;;  %2466 = vmatpush.msra.mxu2 %v5241_v34  ;;  %v3852_v8 = vpop.eup %3851  ;;  %vm2115_vm7 = vweird.f32 %v3850_v44  ;;  %2487 = vmatpush.msrb.mxu3 %v5378_v15 }
 0x57b   : > { %2506 = vmatpush.msra.mxu1 %v5366_v25  ;;  %2447 = vmatpush.msra.mxu0 %v5373_v37  ;;  %vm2116_vm9 = vmor %vm2114_vm8, %vm2115_vm7  ;;  %vm2119_vm10 = vcmp.eq.f32.partialorder %v2118_v61, 8.507059e+37 }
 0x57c   : > { %v2111_v6 = vsub.f32 1.0, %v2110_v29  ;;  %v2098_v58 = vsel %vm2097_vm5, %v3846_v26, %v2094_v47  ;;  %2467 = vmatpush.msra.mxu2 %v5248_v11  ;;  %v2131_v26 = vsub.f32 1.0, %v2130_v35  ;;  %2488 = vmatpush.msrb.mxu3 %v5396_v50  ;;  %v2121_v11 = vor.u32 1.1754944e-38, %v2120_v59  ;;  %v6668_v59 = vld [vmem:[#allocation29_spill] sm:$0xff] }
 0x57d   : > { %v2103_v56 = vsel %vm2100_vm6, %v2102_v32, %v2098_v58  ;;  %2507 = vmatpush.msra.mxu1 %v5383_v20  ;;  %2448 = vmatpush.msra.mxu0 %v5391_v41  ;;  %v2138_v35 = vand.u32 2147483647, %v5598_v60 }
 0x57e   : > { %v2112_v46 = vmul.f32 %v3850_v44, %v2111_v6  ;;  %v2145_v34 = vmul.f32 %v3852_v8, %v2103_v56  ;;  %2468 = vmatpush.msra.mxu2 %v5255_v27  ;;  %2489 = vmatpush.msrb.mxu3 %v5420_v24  ;;  %v2132_v27 = vmul.f32 %v5647_v22, %v2131_v26  ;;  %v6666_v6 = vld [vmem:[#allocation27_spill] sm:$0xff]  ;;  %v6667_v8 = vld [vmem:[#allocation28_spill] sm:$0xff]  ;;  %v6672_v26 = vld [vmem:[#allocation33_spill] sm:$0xff] }
 0x57f   : > { %2508 = vmatpush.msra.mxu1 %v5401_v1  ;;  %2449 = vmatpush.msra.mxu0 %v5410_v33  ;;  %vm2139_vm14 = vcmp.eq.f32.partialorder %v2138_v35, 8.507059e+37  ;;  %v6670_v56 = vld [vmem:[#allocation31_spill] sm:$0xff] }
 0x580   : > { %v2113_v43 = vadd.f32 %v3850_v44, %v2112_v46  ;;  %2469 = vmatpush.msra.mxu2 %v5415_v23  ;;  %2490 = vmatpush.msrb.mxu3 %v5445_v12  ;;  %v2133_v47 = vadd.f32 %v5647_v22, %v2132_v27 }
 0x581   : > { %2509 = vmatpush.msra.mxu1 %v5428_v19  ;;  %2450 = vmatpush.msra.mxu0 %v5435_v36 }
 0x582   : > { %v2117_v5 = vsel %vm2116_vm9, %v3850_v44, %v2113_v43  ;;  %2470 = vmatpush.msra.mxu2 %v5440_v2  ;;  %2491 = vmatpush.msrb.mxu3 %v5469_v14  ;;  %v2137_v32 = vsel %vm2136_vm13, %v5647_v22, %v2133_v47  ;;  %v6674_v43 = vld [vmem:[#allocation34_spill] sm:$0xff] }
 0x583   : > { %v2122_v10 = vsel %vm2119_vm10, %v2121_v11, %v2117_v5  ;;  %2510 = vmatpush.msra.mxu1 %v5452_v42  ;;  %2451 = vmatpush.msra.mxu0 %v5459_v63  ;;  %v6675_v11 = vld [vmem:[#allocation35_spill] sm:$0xff]  ;;  %v6676_v5 = vld [vmem:[#allocation36_spill] sm:$0xff] }
 0x584   : > { %v2144_v29 = vmul.f32 %v2122_v10, %v5298_v51  ;;  %2471 = vmatpush.msra.mxu2 %v5464_v62  ;;  %v2140_v51 = vand.u32 2147483648, %v5598_v60  ;;  %2492 = vmatpush.msrb.mxu3 %v5494_v38  ;;  %v6669_v60 = vld [vmem:[#allocation30_spill] sm:$0xff] }
 0x585   : > { %2511 = vmatpush.msra.mxu1 %v5476_v31  ;;  %2452 = vmatpush.msra.mxu0 %v5484_v54 }
 0x586   : > { %v5687_v44 = vadd.f32 %v2145_v34, %v2144_v29  ;;  %2472 = vmatpush.msra.mxu2 %v5489_v57  ;;  %2493 = vmatpush.msrb.mxu3 %v5518_v52  ;;  %v2141_v58 = vor.u32 1.1754944e-38, %v2140_v51  ;;  %v6671_v34 = vld [vmem:[#allocation32_spill] sm:$0xff] }
 0x587   : > { %2512 = vmatpush.msra.mxu1 %v5501_v4  ;;  %2453 = vmatpush.msra.mxu0 %v5508_v16 }
 0x588   : > { %3853 = vtanh.f32 %v5687_v44  ;;  %2473 = vmatpush.msra.mxu2 %v5513_v18  ;;  %2494 = vmatpush.msrb.mxu3 %v6667_v8  ;;  %v2142_v61 = vsel %vm2139_vm14, %v2141_v58, %v2137_v32 }
 0x589   : > { %2513 = vmatpush.msra.mxu1 %v5525_v21  ;;  %2454 = vmatpush.msra.mxu0 %v5530_v48 }
 0x58a   : > { %2474 = vmatpush.msra.mxu2 %v6666_v6  ;;  %2495 = vmatpush.msrb.mxu3 %v6671_v34 }
 0x58b   : > { %2514 = vmatpush.msra.mxu1 %v6668_v59  ;;  %2455 = vmatpush.msra.mxu0 %v6669_v60 }
 0x58c   : > { %2475 = vmatpush.msra.mxu2 %v6670_v56  ;;  %2496 = vmatpush.msrb.mxu3 %v5591_v49 }
 0x58d   : > { %2515 = vmatpush.msra.mxu1 %v6672_v26  ;;  %2456 = vmatpush.msra.mxu0 %v6674_v43 }
 0x58e   : > { %v3854_v46 = vpop.eup %3853  ;;  %2476 = vmatpush.msra.mxu2 %v6675_v11  ;;  %2497 = vmatpush.msrb.mxu3 %v5617_v55 }
 0x58f   : > { %v5714_v22 = vmul.f32 %v3854_v46, %v2142_v61  ;;  %2516 = vmatpush.msra.mxu1 %v5596_v3  ;;  %2457 = vmatpush.msra.mxu0 %v5605_v28 }
 0x590   : > { %2477 = vmatpush.msra.mxu2 %v5610_v17 }
 0x591   : > { %6673 = vst [vmem:[#allocation27_spill] sm:$0xff] %v5714_v22  ;;  %2238 = vmatmul.f32.vlgmr.msrb.gmra.mxu0 %v5714_v22  ;;  %2258 = vmatmul.f32.vlgmr.msrb.gmra.mxu2 %v5714_v22 }
 0x592   : > { %2278 = vmatmul.f32.vlgmr.msra.gmra.mxu3 %v5714_v22  ;;  %2298 = vmatmul.f32.vlgmr.msrb.gmra.mxu1 %v5714_v22 }
 0x593   : > { %2517 = vmatpush.msra.mxu1 %v6676_v5  ;;  %2702 = vmatpush.msra.mxu3 %v5313_v7 }
 0x595   : > { %2722 = vmatpush.msrb.mxu1 %v5318_v13  ;;  %2703 = vmatpush.msra.mxu3 %v5325_v40  ;;  %v6677_v13 = vld [vmem:[#allocation5_spill] sm:$0xff] }
 0x597   : > { %2723 = vmatpush.msrb.mxu1 %v5330_v9  ;;  %2704 = vmatpush.msra.mxu3 %v5337_v45  ;;  %v6678_v45 = vld [vmem:[#allocation9_spill] sm:$0xff] }
 0x599   : > { %2724 = vmatpush.msrb.mxu1 %v5342_v30  ;;  %2705 = vmatpush.msra.mxu3 %v5349_v53 }
 0x59b   : > { %2725 = vmatpush.msrb.mxu1 %v5354_v0  ;;  %2706 = vmatpush.msra.mxu3 %v5361_v39 }
 0x59d   : > { %2726 = vmatpush.msrb.mxu1 %v5366_v25  ;;  %2707 = vmatpush.msra.mxu3 %v5378_v15  ;;  %v6679_v25 = vld [vmem:[#allocation10_spill] sm:$0xff] }
 0x59f   : > { %2727 = vmatpush.msrb.mxu1 %v5383_v20  ;;  %2708 = vmatpush.msra.mxu3 %v5396_v50 }
 0x5a1   : > { %2728 = vmatpush.msrb.mxu1 %v5401_v1  ;;  %2709 = vmatpush.msra.mxu3 %v5420_v24 }
 0x5a3   : > { %2729 = vmatpush.msrb.mxu1 %v5428_v19  ;;  %2710 = vmatpush.msra.mxu3 %v5445_v12 }
 0x5a5   : > { %2730 = vmatpush.msrb.mxu1 %v5452_v42  ;;  %2711 = vmatpush.msra.mxu3 %v5469_v14  ;;  %v6680_v14 = vld [vmem:[#allocation8_spill] sm:$0xff] }
 0x5a7   : > { %2731 = vmatpush.msrb.mxu1 %v5476_v31  ;;  %2712 = vmatpush.msra.mxu3 %v5494_v38 }
 0x5a9   : > { %2732 = vmatpush.msrb.mxu1 %v5501_v4  ;;  %2713 = vmatpush.msra.mxu3 %v5518_v52 }
 0x5ab   : > { %2733 = vmatpush.msrb.mxu1 %v5525_v21  ;;  %2714 = vmatpush.msra.mxu3 %v6667_v8 }
 0x5ad   : > { %2734 = vmatpush.msrb.mxu1 %v6668_v59  ;;  %2715 = vmatpush.msra.mxu3 %v6671_v34 }
 0x5af   : > { %2735 = vmatpush.msrb.mxu1 %v6672_v26  ;;  %2716 = vmatpush.msra.mxu3 %v5591_v49 }
 0x5b1   : > { %2736 = vmatpush.msrb.mxu1 %v5596_v3  ;;  %2717 = vmatpush.msra.mxu3 %v5617_v55 }
 0x5b3   : > { %2737 = vmatpush.msrb.mxu1 %v6676_v5 }
 0x60e   : > { %v2239_v7 = vpop.f32.mrf.mxu0 }
 0x60f   : > { %v2302_v40 = vadd.f32 %v2239_v7, %v6677_v13  ;;  %v2299_v9 = vpop.f32.mrf.mxu1 }
 0x610   : > { %v2305_v30 = vadd.f32 %v2299_v9, %v6678_v45 }
 0x611   : > { %v3709_v53 = vmul.f32 -1.442695, %v2302_v40 }
 0x612   : > { %v3711_v0 = vmul.f32 -1.442695, %v2305_v30 }
 0x613   : > { %3855 = vpow2.f32 %v3709_v53 }
 0x614   : > { %3857 = vpow2.f32 %v3711_v0  ;;  %v2259_v39 = vpop.f32.mrf.mxu2 }
 0x615   : > { %v2303_v15 = vadd.f32 %v2259_v39, %v6679_v25  ;;  %v2279_v19 = vpop.f32.mrf.mxu3 }
 0x616   : > { %v2304_v31 = vadd.f32 %v2279_v19, %v6680_v14  ;;  %v5794_v19 = vld [vmem:[%s6536_s11 + $0x1c8] sm:$0xff]  ;;  %v5813_v14 = vld [vmem:[%s6536_s11 + $0x180] sm:$0xff] }
 0x617   : > { %v3710_v49 = vmul.f32 -1.442695, %v2303_v15 }
 0x619   : > { %v3856_v20 = vpop.eup %3855  ;;  %3859 = vpow2.f32 %v3710_v49 }
 0x61a   : > { %v3858_v3 = vpop.eup %3857  ;;  %v2309_v50 = vadd.f32 1.0, %v3856_v20 }
 0x61b   : > { %v2348_v1 = vadd.f32 1.0, %v3858_v3 }
 0x61c   : > { %3861 = vrcp.f32 %v2309_v50  ;;  %v2321_v52 = vand.u32 2147483648, %v2309_v50  ;;  %v2319_v27 = vand.u32 2147483647, %v2309_v50  ;;  %vm2315_vm0 = vweird.f32 %v2309_v50 }
 0x61d   : > { %3863 = vrcp.f32 %v2348_v1  ;;  %v2360_v39 = vand.u32 2147483648, %v2348_v1  ;;  %vm2354_vm10 = vweird.f32 %v2348_v1  ;;  %v2358_v25 = vand.u32 2147483647, %v2348_v1 }
 0x61e   : > { %v2322_v35 = vor.u32 1.1754944e-38, %v2321_v52  ;;  %vm2320_vm2 = vcmp.eq.f32.partialorder %v2319_v27, 8.507059e+37  ;;  %v5837_v52 = vld [vmem:[%s6536_s11 + $0x148] sm:$0xff]  ;;  %v6682_v27 = vld [vmem:[#allocation6_spill] sm:$0xff] }
 0x61f   : > { %v3860_v24 = vpop.eup %3859  ;;  %v2361_v49 = vor.u32 1.1754944e-38, %v2360_v39  ;;  %vm2359_vm12 = vcmp.eq.f32.partialorder %v2358_v25, 8.507059e+37 }
 0x620   : > { %v2328_v12 = vadd.f32 1.0, %v3860_v24  ;;  %v5789_v24 = vld [vmem:[%s6536_s11 + $0x1c0] sm:$0xff] }
 0x622   : > { %v3862_v42 = vpop.eup %3861  ;;  %3865 = vrcp.f32 %v2328_v12  ;;  %v2340_v59 = vand.u32 2147483648, %v2328_v12  ;;  %v2338_v34 = vand.u32 2147483647, %v2328_v12  ;;  %vm2334_vm6 = vweird.f32 %v2328_v12 }
 0x623   : > { %v2311_v38 = vmul.f32 %v3862_v42, %v2309_v50  ;;  %3867 = vtanh.f32 %v2304_v31  ;;  %v3864_v21 = vpop.eup %3863  ;;  %vm2316_vm15 = vweird.f32 %v3862_v42  ;;  %v5818_v31 = vld [vmem:[%s6536_s11 + $0x188] sm:$0xff] }
 0x624   : > { %v2350_v51 = vmul.f32 %v3864_v21, %v2348_v1  ;;  %vm2317_vm1 = vmor %vm2315_vm0, %vm2316_vm15  ;;  %v2341_v13 = vor.u32 1.1754944e-38, %v2340_v59  ;;  %vm2339_vm8 = vcmp.eq.f32.partialorder %v2338_v34, 8.507059e+37  ;;  %vm2355_vm9 = vweird.f32 %v3864_v21  ;;  %v5782_v1 = vld [vmem:[%s6536_s11 + $0x1e8] sm:$0xff] }
 0x625   : > { %v2312_v4 = vsub.f32 1.0, %v2311_v38  ;;  %vm2356_vm11 = vmor %vm2354_vm10, %vm2355_vm9  ;;  %2682 = vmatpush.msrb.mxu2 %v5782_v1  ;;  %v5825_v38 = vld [vmem:[%s6536_s11 + $0x160] sm:$0xff] }
 0x626   : > { %v2351_v5 = vsub.f32 1.0, %v2350_v51 }
 0x627   : > { %v2313_v55 = vmul.f32 %v3862_v42, %v2312_v4  ;;  %2683 = vmatpush.msrb.mxu2 %v5794_v19  ;;  %v5830_v4 = vld [vmem:[%s6536_s11 + $0x168] sm:$0xff] }
 0x628   : > { %v3866_v10 = vpop.eup %3865  ;;  %v2352_v9 = vmul.f32 %v3864_v21, %v2351_v5 }
 0x629   : > { %v2330_v29 = vmul.f32 %v3866_v10, %v2328_v12  ;;  %v2314_v47 = vadd.f32 %v3862_v42, %v2313_v55  ;;  %v3868_v8 = vpop.eup %3867  ;;  %vm2335_vm5 = vweird.f32 %v3866_v10  ;;  %v5801_v12 = vld [vmem:[%s6536_s11 + $0x1a0] sm:$0xff] }
 0x62a   : > { %vm2336_vm7 = vmor %vm2334_vm6, %vm2335_vm5  ;;  %v2353_v0 = vadd.f32 %v3864_v21, %v2352_v9 }
 0x62b   : > { %v2331_v32 = vsub.f32 1.0, %v2330_v29  ;;  %v2318_v58 = vsel %vm2317_vm1, %v3862_v42, %v2314_v47  ;;  %v5806_v42 = vld [vmem:[%s6536_s11 + $0x1a8] sm:$0xff]  ;;  %v6683_v47 = vld [vmem:[#allocation12_spill] sm:$0xff] }
 0x62c   : > { %v2323_v46 = vsel %vm2320_vm2, %v2322_v35, %v2318_v58  ;;  %v2357_v15 = vsel %vm2356_vm11, %v3864_v21, %v2353_v0  ;;  %2684 = vmatpush.msrb.mxu2 %v5806_v42  ;;  %v5844_v21 = vld [vmem:[%s6536_s11 + $0x128] sm:$0xff] }
 0x62d   : > { %v2332_v61 = vmul.f32 %v3866_v10, %v2331_v32  ;;  %v2365_v26 = vmul.f32 %v3868_v8, %v2323_v46  ;;  %v2362_v3 = vsel %vm2359_vm12, %v2361_v49, %v2357_v15  ;;  %v6684_v32 = vld [vmem:[#allocation13_spill] sm:$0xff] }
 0x62e   : > { %2685 = vmatpush.msrb.mxu2 %v5818_v31 }
 0x62f   : > { %v2333_v7 = vadd.f32 %v3866_v10, %v2332_v61 }
 0x630   : > { %2686 = vmatpush.msrb.mxu2 %v5830_v4 }
 0x631   : > { %v2337_v40 = vsel %vm2336_vm7, %v3866_v10, %v2333_v7 }
 0x632   : > { %v2342_v45 = vsel %vm2339_vm8, %v2341_v13, %v2337_v40  ;;  %2687 = vmatpush.msrb.mxu2 %v5837_v52 }
 0x633   : > { %v2364_v30 = vmul.f32 %v2342_v45, %v5687_v44  ;;  %v5777_v44 = vld [vmem:[%s6536_s11 + $0x1e0] sm:$0xff] }
 0x634   : > { %2662 = vmatpush.msrb.mxu0 %v5777_v44  ;;  %2688 = vmatpush.msrb.mxu2 %v5844_v21 }
 0x635   : > { %v5765_v53 = vadd.f32 %v2365_v26, %v2364_v30 }
 0x636   : > { %2663 = vmatpush.msrb.mxu0 %v5789_v24  ;;  %2689 = vmatpush.msrb.mxu2 %v5415_v23 }
 0x637   : > { %3869 = vtanh.f32 %v5765_v53 }
 0x638   : > { %2664 = vmatpush.msrb.mxu0 %v5801_v12  ;;  %2690 = vmatpush.msrb.mxu2 %v5440_v2 }
 0x63a   : > { %2665 = vmatpush.msrb.mxu0 %v5813_v14  ;;  %2691 = vmatpush.msrb.mxu2 %v5464_v62 }
 0x63c   : > { %2666 = vmatpush.msrb.mxu0 %v5825_v38  ;;  %2692 = vmatpush.msrb.mxu2 %v5489_v57 }
 0x63d   : > { %v3870_v20 = vpop.eup %3869 }
 0x63e   : > { %v5768_v50 = vmul.f32 %v3870_v20, %v2362_v3  ;;  %2667 = vmatpush.msrb.mxu0 %v5373_v37  ;;  %2693 = vmatpush.msrb.mxu2 %v5513_v18  ;;  %v6685_v18 = vld [vmem:[#allocation7_spill] sm:$0xff] }
 0x640   : > { %6681 = vst [vmem:[#allocation28_spill] sm:$0xff] %v5768_v50  ;;  %2458 = vmatmul.f32.vlgmr.msra.gmra.mxu0 %v5768_v50  ;;  %2478 = vmatmul.f32.vlgmr.msra.gmra.mxu2 %v5768_v50 }
 0x641   : > { %2498 = vmatmul.f32.vlgmr.msrb.gmra.mxu3 %v5768_v50  ;;  %2518 = vmatmul.f32.vlgmr.msra.gmra.mxu1 %v5768_v50  ;;  %v6185_v50 = vld [vmem:[%s6536_s11 + $0x38] sm:$0xff] }
 0x642   : > { %2668 = vmatpush.msrb.mxu0 %v5391_v41  ;;  %2694 = vmatpush.msrb.mxu2 %v6666_v6 }
 0x644   : > { %2669 = vmatpush.msrb.mxu0 %v5410_v33  ;;  %2695 = vmatpush.msrb.mxu2 %v6670_v56 }
 0x646   : > { %2670 = vmatpush.msrb.mxu0 %v5435_v36  ;;  %2696 = vmatpush.msrb.mxu2 %v6675_v11 }
 0x648   : > { %2671 = vmatpush.msrb.mxu0 %v5459_v63  ;;  %2697 = vmatpush.msrb.mxu2 %v5610_v17 }
 0x64a   : > { %2672 = vmatpush.msrb.mxu0 %v5484_v54  ;;  %2902 = vmatpush.msra.mxu2 %v5782_v1 }
 0x64c   : > { %2673 = vmatpush.msrb.mxu0 %v5508_v16  ;;  %2903 = vmatpush.msra.mxu2 %v5794_v19 }
 0x64e   : > { %2674 = vmatpush.msrb.mxu0 %v5530_v48  ;;  %2904 = vmatpush.msra.mxu2 %v5806_v42 }
 0x650   : > { %2675 = vmatpush.msrb.mxu0 %v6669_v60  ;;  %2905 = vmatpush.msra.mxu2 %v5818_v31 }
 0x652   : > { %2676 = vmatpush.msrb.mxu0 %v6674_v43  ;;  %2906 = vmatpush.msra.mxu2 %v5830_v4 }
 0x654   : > { %2677 = vmatpush.msrb.mxu0 %v5605_v28  ;;  %2907 = vmatpush.msra.mxu2 %v5837_v52 }
 0x656   : > { %2882 = vmatpush.msra.mxu0 %v5777_v44  ;;  %2908 = vmatpush.msra.mxu2 %v5844_v21 }
 0x658   : > { %2883 = vmatpush.msra.mxu0 %v5789_v24 }
 0x65a   : > { %2884 = vmatpush.msra.mxu0 %v5801_v12 }
 0x65c   : > { %2885 = vmatpush.msra.mxu0 %v5813_v14 }
 0x65e   : > { %2886 = vmatpush.msra.mxu0 %v5825_v38 }
 0x6bd   : > { %v2459_v55 = vpop.f32.mrf.mxu0 }
 0x6be   : > { %v2522_v10 = vadd.f32 %v2459_v55, %v6682_v27  ;;  %v2519_v29 = vpop.f32.mrf.mxu1 }
 0x6bf   : > { %v2525_v51 = vadd.f32 %v2519_v29, %v6683_v47 }
 0x6c0   : > { %v3712_v37 = vmul.f32 -1.442695, %v2522_v10 }
 0x6c1   : > { %v3714_v35 = vmul.f32 -1.442695, %v2525_v51 }
 0x6c2   : > { %3871 = vpow2.f32 %v3712_v37 }
 0x6c3   : > { %3873 = vpow2.f32 %v3714_v35  ;;  %v2479_v41 = vpop.f32.mrf.mxu2 }
 0x6c4   : > { %v2523_v58 = vadd.f32 %v2479_v41, %v6684_v32  ;;  %v2499_v54 = vpop.f32.mrf.mxu3  ;;  %v5907_v41 = vld [vmem:[%s6536_s11 + $0x1f8] sm:$0xff]  ;;  %v5914_v32 = vld [vmem:[%s6536_s11 + $0x1d0] sm:$0xff] }
 0x6c5   : > { %v2524_v48 = vadd.f32 %v2499_v54, %v6685_v18  ;;  %2942 = vmatpush.msra.mxu1 %v5907_v41  ;;  %v5962_v54 = vld [vmem:[%s6536_s11 + $0x140] sm:$0xff] }
 0x6c6   : > { %v3713_v33 = vmul.f32 -1.442695, %v2523_v58  ;;  %v5919_v58 = vld [vmem:[%s6536_s11 + $0x1d8] sm:$0xff]  ;;  %2887 = vmatpush.msra.mxu0 %v5962_v54  ;;  %v5980_v18 = vld [vmem:[%s6536_s11 + $0x120] sm:$0xff] }
 0x6c7   : > { %2943 = vmatpush.msra.mxu1 %v5919_v58 }
 0x6c8   : > { %v3872_v23 = vpop.eup %3871  ;;  %3875 = vpow2.f32 %v3713_v33  ;;  %v5926_v33 = vld [vmem:[%s6536_s11 + $0x1b0] sm:$0xff]  ;;  %2888 = vmatpush.msra.mxu0 %v5980_v18 }
 0x6c9   : > { %v3874_v36 = vpop.eup %3873  ;;  %v2529_v2 = vadd.f32 1.0, %v3872_v23  ;;  %v5931_v23 = vld [vmem:[%s6536_s11 + $0x1b8] sm:$0xff] }
 0x6ca   : > { %v5865_v63 = vadd.f32 1.0, %v3874_v36  ;;  %2944 = vmatpush.msra.mxu1 %v5931_v23  ;;  %v5938_v36 = vld [vmem:[%s6536_s11 + $0x190] sm:$0xff] }
 0x6cb   : > { %3877 = vrcp.f32 %v2529_v2  ;;  %v2541_v28 = vand.u32 2147483648, %v2529_v2  ;;  %v2539_v43 = vand.u32 2147483647, %v2529_v2  ;;  %vm2535_vm14 = vweird.f32 %v2529_v2 }
 0x6cc   : > { %3879 = vrcp.f32 %v5865_v63  ;;  %v2580_v27 = vand.u32 2147483648, %v5865_v63  ;;  %vm2574_vm8 = vweird.f32 %v5865_v63  ;;  %v2578_v10 = vand.u32 2147483647, %v5865_v63 }
 0x6cd   : > { %v2542_v61 = vor.u32 1.1754944e-38, %v2541_v28  ;;  %vm2540_vm0 = vcmp.eq.f32.partialorder %v2539_v43, 8.507059e+37  ;;  %v6687_v28 = vld [vmem:[#allocation14_spill] sm:$0xff]  ;;  %v5999_v43 = vld [vmem:[%s6536_s11 + $0x100] sm:$0xff] }
 0x6ce   : > { %v3876_v62 = vpop.eup %3875  ;;  %v2581_v47 = vor.u32 1.1754944e-38, %v2580_v27  ;;  %vm2579_vm10 = vcmp.eq.f32.partialorder %v2578_v10, 8.507059e+37  ;;  %2889 = vmatpush.msra.mxu0 %v5999_v43  ;;  %v6090_v27 = vld [vmem:[%s6536_s11 + $0xb8] sm:$0xff] }
 0x6cf   : > { %v2548_v57 = vadd.f32 1.0, %v3876_v62  ;;  %v5955_v62 = vld [vmem:[%s6536_s11 + $0x178] sm:$0xff] }
 0x6d1   : > { %v3878_v16 = vpop.eup %3877  ;;  %3881 = vrcp.f32 %v2548_v57  ;;  %v2560_v7 = vand.u32 2147483648, %v2548_v57  ;;  %v2558_v9 = vand.u32 2147483647, %v2548_v57  ;;  %vm2554_vm2 = vweird.f32 %v2548_v57 }
 0x6d2   : > { %v2531_v6 = vmul.f32 %v3878_v16, %v2529_v2  ;;  %3883 = vtanh.f32 %v2524_v48  ;;  %v3880_v17 = vpop.eup %3879  ;;  %vm2536_vm13 = vweird.f32 %v3878_v16  ;;  %v5943_v2 = vld [vmem:[%s6536_s11 + $0x198] sm:$0xff]  ;;  %v5985_v48 = vld [vmem:[%s6536_s11 + $0x130] sm:$0xff] }
 0x6d3   : > { %v2570_v46 = vmul.f32 %v3880_v17, %v5865_v63  ;;  %vm2537_vm15 = vmor %vm2535_vm14, %vm2536_vm13  ;;  %v2561_v39 = vor.u32 1.1754944e-38, %v2560_v7  ;;  %vm2559_vm6 = vcmp.eq.f32.partialorder %v2558_v9, 8.507059e+37  ;;  %vm2575_vm7 = vweird.f32 %v3880_v17  ;;  %2945 = vmatpush.msra.mxu1 %v5943_v2  ;;  %v5950_v63 = vld [vmem:[%s6536_s11 + $0x170] sm:$0xff]  ;;  %v6048_v9 = vld [vmem:[%s6536_s11 + $0xc0] sm:$0xff] }
 0x6d4   : > { %v2532_v60 = vsub.f32 1.0, %v2531_v6  ;;  %vm2576_vm9 = vmor %vm2574_vm8, %vm2575_vm7  ;;  %v5990_v6 = vld [vmem:[%s6536_s11 + $0x138] sm:$0xff]  ;;  %v6034_v7 = vld [vmem:[%s6536_s11 + $0xf0] sm:$0xff] }
 0x6d5   : > { %v2571_v30 = vsub.f32 1.0, %v2570_v46  ;;  %2946 = vmatpush.msra.mxu1 %v5955_v62 }
 0x6d6   : > { %v2533_v56 = vmul.f32 %v3878_v16, %v2532_v60 }
 0x6d7   : > { %v3882_v11 = vpop.eup %3881  ;;  %v2572_v15 = vmul.f32 %v3880_v17, %v2571_v30  ;;  %v6058_v30 = vld [vmem:[%s6536_s11 + $0xd0] sm:$0xff] }
 0x6d8   : > { %v2550_v8 = vmul.f32 %v3882_v11, %v2548_v57  ;;  %v2534_v59 = vadd.f32 %v3878_v16, %v2533_v56  ;;  %v3884_v5 = vpop.eup %3883  ;;  %vm2555_vm1 = vweird.f32 %v3882_v11  ;;  %v5967_v57 = vld [vmem:[%s6536_s11 + $0x150] sm:$0xff] }
 0x6d9   : > { %vm2556_vm5 = vmor %vm2554_vm2, %vm2555_vm1  ;;  %v2573_v55 = vadd.f32 %v3880_v17, %v2572_v15 }
 0x6da   : > { %v2551_v34 = vsub.f32 1.0, %v2550_v8  ;;  %v2538_v26 = vsel %vm2537_vm15, %v3878_v16, %v2534_v59  ;;  %v5972_v16 = vld [vmem:[%s6536_s11 + $0x158] sm:$0xff]  ;;  %v6009_v8 = vld [vmem:[%s6536_s11 + $0x110] sm:$0xff] }
 0x6db   : > { %v2543_v13 = vsel %vm2540_vm0, %v2542_v61, %v2538_v26  ;;  %v2577_v29 = vsel %vm2576_vm9, %v3880_v17, %v2573_v55  ;;  %2947 = vmatpush.msra.mxu1 %v5972_v16  ;;  %v6688_v59 = vld [vmem:[#allocation11_spill] sm:$0xff]  ;;  %v6024_v26 = vld [vmem:[%s6536_s11 + $0xe0] sm:$0xff]  ;;  %v6083_v55 = vld [vmem:[%s6536_s11 + $0xb0] sm:$0xff] }
 0x6dc   : > { %v2552_v40 = vmul.f32 %v3882_v11, %v2551_v34  ;;  %v2585_v45 = vmul.f32 %v3884_v5, %v2543_v13  ;;  %v2582_v37 = vsel %vm2579_vm10, %v2581_v47, %v2577_v29  ;;  %v6017_v61 = vld [vmem:[%s6536_s11 + $0x118] sm:$0xff]  ;;  %v6029_v5 = vld [vmem:[%s6536_s11 + $0xe8] sm:$0xff]  ;;  %2890 = vmatpush.msra.mxu0 %v6024_v26  ;;  %v6097_v29 = vld [vmem:[%s6536_s11 + $0x80] sm:$0xff] }
 0x6dd   : > { %2948 = vmatpush.msra.mxu1 %v5990_v6  ;;  %v6102_v47 = vld [vmem:[%s6536_s11 + $0x88] sm:$0xff] }
 0x6de   : > { %v2553_v0 = vadd.f32 %v3882_v11, %v2552_v40  ;;  %v6041_v40 = vld [vmem:[%s6536_s11 + $0xf8] sm:$0xff]  ;;  %2891 = vmatpush.msra.mxu0 %v6048_v9 }
 0x6df   : > { %2949 = vmatpush.msra.mxu1 %v6017_v61 }
 0x6e0   : > { %v2557_v25 = vsel %vm2556_vm5, %v3882_v11, %v2553_v0  ;;  %v6004_v11 = vld [vmem:[%s6536_s11 + $0x108] sm:$0xff] }
 0x6e1   : > { %v2562_v49 = vsel %vm2559_vm6, %v2561_v39, %v2557_v25  ;;  %2909 = vmatpush.msra.mxu2 %v6004_v11  ;;  %2950 = vmatpush.msra.mxu1 %v6041_v40  ;;  %v6065_v39 = vld [vmem:[%s6536_s11 + $0xd8] sm:$0xff] }
 0x6e2   : > { %v2584_v20 = vmul.f32 %v2562_v49, %v5765_v53  ;;  %v5902_v53 = vld [vmem:[%s6536_s11 + $0x1f0] sm:$0xff]  ;;  %v6689_v25 = vld [vmem:[#allocation15_spill] sm:$0xff]  ;;  %v6073_v49 = vld [vmem:[%s6536_s11 + $0xa0] sm:$0xff] }
 0x6e3   : > { %2922 = vmatpush.msrb.mxu3 %v5902_v53  ;;  %2910 = vmatpush.msra.mxu2 %v6029_v5 }
 0x6e4   : > { %v5887_v3 = vadd.f32 %v2585_v45, %v2584_v20  ;;  %v6053_v45 = vld [vmem:[%s6536_s11 + $0xc8] sm:$0xff]  ;;  %2951 = vmatpush.msra.mxu1 %v6065_v39  ;;  %2892 = vmatpush.msra.mxu0 %v6073_v49 }
 0x6e5   : > { %2923 = vmatpush.msrb.mxu3 %v5914_v32  ;;  %2911 = vmatpush.msra.mxu2 %v6053_v45  ;;  %v6078_v20 = vld [vmem:[%s6536_s11 + $0xa8] sm:$0xff] }
 0x6e6   : > { %3885 = vtanh.f32 %v5887_v3  ;;  %2952 = vmatpush.msra.mxu1 %v6090_v27  ;;  %2893 = vmatpush.msra.mxu0 %v6097_v29 }
 0x6e7   : > { %2924 = vmatpush.msrb.mxu3 %v5926_v33  ;;  %2912 = vmatpush.msra.mxu2 %v6078_v20 }
 0x6e9   : > { %2925 = vmatpush.msrb.mxu3 %v5938_v36  ;;  %2913 = vmatpush.msra.mxu2 %v6102_v47 }
 0x6eb   : > { %2926 = vmatpush.msrb.mxu3 %v5950_v63 }
 0x6ec   : > { %v3886_v51 = vpop.eup %3885 }
 0x6ed   : > { %v5893_v35 = vmul.f32 %v3886_v51, %v2582_v37  ;;  %2927 = vmatpush.msrb.mxu3 %v5967_v57  ;;  %v6107_v51 = vld [vmem:[%s6536_s11 + $0x90] sm:$0xff]  ;;  %v6114_v37 = vld [vmem:[%s6536_s11 + $0x98] sm:$0xff] }
 0x6ee   : > { %2953 = vmatpush.msra.mxu1 %v6114_v37 }
 0x6ef   : > { %6686 = vst [vmem:[#allocation29_spill] sm:$0xff] %v5893_v35  ;;  %2678 = vmatmul.f32.vlgmr.msrb.gmra.mxu0 %v5893_v35  ;;  %2698 = vmatmul.f32.vlgmr.msrb.gmra.mxu2 %v5893_v35 }
 0x6f0   : > { %2718 = vmatmul.f32.vlgmr.msra.gmra.mxu3 %v5893_v35  ;;  %2738 = vmatmul.f32.vlgmr.msrb.gmra.mxu1 %v5893_v35  ;;  %v6180_v35 = vld [vmem:[%s6536_s11 + $0x30] sm:$0xff] }
 0x6f1   : > { %2928 = vmatpush.msrb.mxu3 %v5985_v48 }
 0x6f3   : > { %2929 = vmatpush.msrb.mxu3 %v6009_v8 }
 0x6f5   : > { %2930 = vmatpush.msrb.mxu3 %v6034_v7 }
 0x6f7   : > { %2931 = vmatpush.msrb.mxu3 %v6058_v30 }
 0x6f9   : > { %2932 = vmatpush.msrb.mxu3 %v6083_v55 }
 0x6fb   : > { %2933 = vmatpush.msrb.mxu3 %v6107_v51 }
 0x76c   : > { %v2679_v60 = vpop.f32.mrf.mxu0 }
 0x76d   : > { %v2742_v17 = vadd.f32 %v2679_v60, %v6687_v28  ;;  %v2739_v56 = vpop.f32.mrf.mxu1  ;;  %v6119_v60 = vld [vmem:[%s6536_s11 + $0x60] sm:$0xff]  ;;  %v6124_v28 = vld [vmem:[%s6536_s11 + $0x68] sm:$0xff] }
 0x76e   : > { %v2745_v46 = vadd.f32 %v2739_v56, %v6688_v59  ;;  %6690 = vst [vmem:[#allocation30_spill] sm:$0xff] %v6124_v28  ;;  %v6131_v56 = vld [vmem:[%s6536_s11 + $0x70] sm:$0xff]  ;;  %v6136_v59 = vld [vmem:[%s6536_s11 + $0x78] sm:$0xff]  ;;  %2894 = vmatpush.msra.mxu0 %v6119_v60  ;;  %2914 = vmatpush.msra.mxu2 %v6124_v28 }
 0x76f   : > { %v3715_v34 = vmul.f32 -1.442695, %v2742_v17  ;;  %6691 = vst [vmem:[#allocation31_spill] sm:$0xff] %v6131_v56  ;;  %2934 = vmatpush.msrb.mxu3 %v6131_v56  ;;  %2954 = vmatpush.msra.mxu1 %v6136_v59 }
 0x770   : > { %v3717_v13 = vmul.f32 -1.442695, %v2745_v46  ;;  %6692 = vst [vmem:[#allocation32_spill] sm:$0xff] %v6136_v59  ;;  %v6141_v46 = vld [vmem:[%s6536_s11 + $0x40] sm:$0xff] }
 0x771   : > { %3887 = vpow2.f32 %v3715_v34  ;;  %6693 = vst [vmem:[#allocation33_spill] sm:$0xff] %v6141_v46  ;;  %2895 = vmatpush.msra.mxu0 %v6141_v46  ;;  %v6199_v46 = vld [vmem:[%s6536_s11 + $0x8] sm:$0xff] }
 0x772   : > { %3889 = vpow2.f32 %v3717_v13  ;;  %v2699_v0 = vpop.f32.mrf.mxu2 }
 0x773   : > { %v2743_v15 = vadd.f32 %v2699_v0, %v6689_v25  ;;  %v6150_v0 = vld [vmem:[%s6536_s11 + $0x48] sm:$0xff]  ;;  %v6155_v25 = vld [vmem:[%s6536_s11 + $0x50] sm:$0xff]  ;;  %v2719_v59 = vpop.f32.mrf.mxu3 }
 0x774   : > { %6694 = vst [vmem:[#allocation34_spill] sm:$0xff] %v6150_v0  ;;  %2915 = vmatpush.msra.mxu2 %v6150_v0  ;;  %2935 = vmatpush.msrb.mxu3 %v6155_v25  ;;  %v6194_v0 = vld [vmem:[%s6536_s11] sm:$0xff] }
 0x775   : > { %v3716_v10 = vmul.f32 -1.442695, %v2743_v15  ;;  %6695 = vst [vmem:[#allocation35_spill] sm:$0xff] %v6155_v25  ;;  %v6160_v15 = vld [vmem:[%s6536_s11 + $0x58] sm:$0xff] }
 0x776   : > { %6696 = vst [vmem:[#allocation36_spill] sm:$0xff] %v6160_v15  ;;  %2955 = vmatpush.msra.mxu1 %v6160_v15  ;;  %v6211_v15 = vld [vmem:[%s6536_s11 + $0x18] sm:$0xff]  ;;  %2936 = vmatpush.msrb.mxu3 %v6180_v35 }
 0x777   : > { %v3888_v17 = vpop.eup %3887  ;;  %3891 = vpow2.f32 %v3716_v10  ;;  %v6167_v10 = vld [vmem:[%s6536_s11 + $0x20] sm:$0xff]  ;;  %6699 = vst [vmem:[#allocation10_spill] sm:$0xff] %v6211_v15 }
 0x778   : > { %v3890_v34 = vpop.eup %3889  ;;  %v6143_v13 = vadd.f32 1.0, %v3888_v17  ;;  %6697 = vst [vmem:[#allocation5_spill] sm:$0xff] %v6167_v10  ;;  %v6172_v17 = vld [vmem:[%s6536_s11 + $0x28] sm:$0xff]  ;;  %2896 = vmatpush.msra.mxu0 %v6167_v10  ;;  %2956 = vmatpush.msra.mxu1 %v6185_v50  ;;  %v6700_v10 = vld [vmem:[#allocation16_spill] sm:$0xff] }
 0x779   : > { %6698 = vst [vmem:[#allocation9_spill] sm:$0xff] %v6172_v17  ;;  %v6187_v22 = vadd.f32 1.0, %v3890_v34  ;;  %2916 = vmatpush.msra.mxu2 %v6172_v17  ;;  %v6206_v34 = vld [vmem:[%s6536_s11 + $0x10] sm:$0xff]  ;;  %v2744_v28 = vadd.f32 %v2719_v59, %v6700_v10  ;;  %v3268_v10 = vld [vmem:[%s6537_s12 + $0x48] sm:$0xff] }
 0x77a   : > { %3893 = vrcp.f32 %v6143_v13  ;;  %2897 = vmatpush.msra.mxu0 %v6194_v0  ;;  %2937 = vmatpush.msrb.mxu3 %v6206_v34  ;;  %v2761_v59 = vand.u32 2147483648, %v6143_v13  ;;  %vm2755_vm12 = vweird.f32 %v6143_v13 }
 0x77b   : > { %2917 = vmatpush.msra.mxu2 %v6199_v46  ;;  %3895 = vrcp.f32 %v6187_v22  ;;  %2957 = vmatpush.msra.mxu1 %v6211_v15  ;;  %vm2794_vm6 = vweird.f32 %v6187_v22 }
 0x77c   : > { %3102 = vmatpush.msrb.mxu0 %v5777_v44  ;;  %3142 = vmatpush.msra.mxu3 %v5902_v53 }
 0x77d   : > { %v3892_v25 = vpop.eup %3891  ;;  %3122 = vmatpush.msrb.mxu2 %v5782_v1  ;;  %3162 = vmatpush.msrb.mxu1 %v5907_v41  ;;  %v2762_v41 = vor.u32 1.1754944e-38, %v2761_v59 }
 0x77e   : > { %v6215_v56 = vadd.f32 1.0, %v3892_v25  ;;  %3103 = vmatpush.msrb.mxu0 %v5789_v24  ;;  %3143 = vmatpush.msra.mxu3 %v5914_v32  ;;  %v2759_v24 = vand.u32 2147483647, %v6143_v13 }
 0x77f   : > { %3123 = vmatpush.msrb.mxu2 %v5794_v19  ;;  %3163 = vmatpush.msrb.mxu1 %v5919_v58 }
 0x780   : > { %v3894_v17 = vpop.eup %3893  ;;  %3897 = vrcp.f32 %v6215_v56  ;;  %3104 = vmatpush.msrb.mxu0 %v5801_v12  ;;  %3144 = vmatpush.msra.mxu3 %v5926_v33  ;;  %vm2760_vm14 = vcmp.eq.f32.partialorder %v2759_v24, 8.507059e+37  ;;  %v2780_v58 = vand.u32 2147483648, %v6215_v56  ;;  %vm2774_vm0 = vweird.f32 %v6215_v56 }
 0x781   : > { %v2751_v25 = vmul.f32 %v3894_v17, %v6143_v13  ;;  %3899 = vtanh.f32 %v2744_v28  ;;  %3124 = vmatpush.msrb.mxu2 %v5806_v42  ;;  %v6236_v44 = vpop.eup %3895  ;;  %vm2756_vm11 = vweird.f32 %v3894_v17  ;;  %3164 = vmatpush.msrb.mxu1 %v5931_v23  ;;  %v3270_v28 = vld [vmem:[%s6537_s12 + $0x58] sm:$0xff] }
 0x782   : > { %3105 = vmatpush.msrb.mxu0 %v5813_v14  ;;  %3145 = vmatpush.msra.mxu3 %v5938_v36  ;;  %v2790_v42 = vmul.f32 %v6236_v44, %v6187_v22  ;;  %vm2757_vm13 = vmor %vm2755_vm12, %vm2756_vm11  ;;  %vm2795_vm5 = vweird.f32 %v6236_v44 }
 0x783   : > { %v2752_v15 = vsub.f32 1.0, %v2751_v25  ;;  %3125 = vmatpush.msrb.mxu2 %v5818_v31  ;;  %3165 = vmatpush.msrb.mxu1 %v5943_v2  ;;  %vm2796_vm7 = vmor %vm2794_vm6, %vm2795_vm5  ;;  %v3266_v25 = vld [vmem:[%s6537_s12 + $0x38] sm:$0xff] }
 0x784   : > { %3106 = vmatpush.msrb.mxu0 %v5825_v38  ;;  %3146 = vmatpush.msra.mxu3 %v5950_v63  ;;  %v2778_v38 = vand.u32 2147483647, %v6215_v56  ;;  %v2791_v36 = vsub.f32 1.0, %v2790_v42 }
 0x785   : > { %v2753_v1 = vmul.f32 %v3894_v17, %v2752_v15  ;;  %3126 = vmatpush.msrb.mxu2 %v5830_v4  ;;  %3166 = vmatpush.msrb.mxu1 %v5955_v62 }
 0x786   : > { %v3898_v19 = vpop.eup %3897  ;;  %3107 = vmatpush.msrb.mxu0 %v5962_v54  ;;  %3147 = vmatpush.msra.mxu3 %v5967_v57  ;;  %vm2779_vm2 = vcmp.eq.f32.partialorder %v2778_v38, 8.507059e+37 }
 0x787   : > { %v2770_v53 = vmul.f32 %v3898_v19, %v6215_v56  ;;  %v2754_v12 = vadd.f32 %v3894_v17, %v2753_v1  ;;  %v3900_v32 = vpop.eup %3899  ;;  %3127 = vmatpush.msrb.mxu2 %v5837_v52  ;;  %vm2775_vm15 = vweird.f32 %v3898_v19  ;;  %3167 = vmatpush.msrb.mxu1 %v5972_v16  ;;  %v2781_v52 = vor.u32 1.1754944e-38, %v2780_v58 }
 0x788   : > { %3108 = vmatpush.msrb.mxu0 %v5980_v18  ;;  %3148 = vmatpush.msra.mxu3 %v5985_v48  ;;  %vm2776_vm1 = vmor %vm2774_vm0, %vm2775_vm15  ;;  %v2798_v18 = vand.u32 2147483647, %v6187_v22 }
 0x789   : > { %v2771_v14 = vsub.f32 1.0, %v2770_v53  ;;  %v2758_v31 = vsel %vm2757_vm13, %v3894_v17, %v2754_v12  ;;  %3128 = vmatpush.msrb.mxu2 %v5844_v21  ;;  %3168 = vmatpush.msrb.mxu1 %v5990_v6  ;;  %v2792_v21 = vmul.f32 %v6236_v44, %v2791_v36  ;;  %v6701_v6 = vld [vmem:[#allocation30_spill] sm:$0xff]  ;;  %v3263_v12 = vld [vmem:[%s6537_s12 + $0x20] sm:$0xff] }
 0x78a   : > { %v2763_v33 = vsel %vm2760_vm14, %v2762_v41, %v2758_v31  ;;  %3109 = vmatpush.msrb.mxu0 %v5999_v43  ;;  %3149 = vmatpush.msra.mxu3 %v6009_v8  ;;  %v6703_v8 = vld [vmem:[#allocation32_spill] sm:$0xff]  ;;  %vm2799_vm8 = vcmp.eq.f32.partialorder %v2798_v18, 8.507059e+37  ;;  %v3262_v31 = vld [vmem:[%s6537_s12 + $0x18] sm:$0xff] }
 0x78b   : > { %v2772_v23 = vmul.f32 %v3898_v19, %v2771_v14  ;;  %v2805_v4 = vmul.f32 %v3900_v32, %v2763_v33  ;;  %3129 = vmatpush.msrb.mxu2 %v6004_v11  ;;  %3169 = vmatpush.msrb.mxu1 %v6017_v61  ;;  %v2793_v16 = vadd.f32 %v6236_v44, %v2792_v21  ;;  %v6702_v11 = vld [vmem:[#allocation31_spill] sm:$0xff]  ;;  %v6705_v61 = vld [vmem:[#allocation34_spill] sm:$0xff]  ;;  %v6714_v33 = vld [vmem:[#allocation20_spill] sm:$0xff] }
 0x78c   : > { %3110 = vmatpush.msrb.mxu0 %v6024_v26  ;;  %3150 = vmatpush.msra.mxu3 %v6034_v7  ;;  %v6706_v7 = vld [vmem:[#allocation35_spill] sm:$0xff]  ;;  %v3261_v32 = vld [vmem:[%s6537_s12 + $0x10] sm:$0xff] }
 0x78d   : > { %v2773_v2 = vadd.f32 %v3898_v19, %v2772_v23  ;;  %3130 = vmatpush.msrb.mxu2 %v6029_v5  ;;  %3170 = vmatpush.msrb.mxu1 %v6041_v40  ;;  %v2797_v48 = vsel %vm2796_vm7, %v6236_v44, %v2793_v16  ;;  %v6707_v40 = vld [vmem:[#allocation36_spill] sm:$0xff]  ;;  %v3265_v44 = vld [vmem:[%s6537_s12 + $0x30] sm:$0xff] }
 0x78e   : > { %3111 = vmatpush.msrb.mxu0 %v6048_v9  ;;  %3151 = vmatpush.msra.mxu3 %v6058_v30  ;;  %v6709_v30 = vld [vmem:[#allocation9_spill] sm:$0xff] }
 0x78f   : > { %v2777_v63 = vsel %vm2776_vm1, %v3898_v19, %v2773_v2  ;;  %3131 = vmatpush.msrb.mxu2 %v6053_v45  ;;  %3171 = vmatpush.msrb.mxu1 %v6065_v39  ;;  %v6708_v45 = vld [vmem:[#allocation5_spill] sm:$0xff]  ;;  %v6710_v39 = vld [vmem:[#allocation10_spill] sm:$0xff]  ;;  %v3259_v2 = vld [vmem:[%s6537_s12] sm:$0xff] }
 0x790   : > { %v2782_v62 = vsel %vm2779_vm2, %v2781_v52, %v2777_v63  ;;  %3112 = vmatpush.msrb.mxu0 %v6073_v49  ;;  %3152 = vmatpush.msra.mxu3 %v6083_v55  ;;  %v3272_v49 = vld [vmem:[%s6537_s12 + $0x68] sm:$0xff] }
 0x791   : > { %v2804_v54 = vmul.f32 %v2782_v62, %v5887_v3  ;;  %3132 = vmatpush.msrb.mxu2 %v6078_v20  ;;  %v2800_v3 = vand.u32 2147483648, %v6187_v22  ;;  %3172 = vmatpush.msrb.mxu1 %v6090_v27  ;;  %v6704_v22 = vld [vmem:[#allocation33_spill] sm:$0xff] }
 0x792   : > { %3113 = vmatpush.msrb.mxu0 %v6097_v29  ;;  %3153 = vmatpush.msra.mxu3 %v6107_v51  ;;  %v6711_v55 = vld [vmem:[#allocation17_spill] sm:$0xff]  ;;  %v6712_v51 = vld [vmem:[#allocation18_spill] sm:$0xff] }
 0x793   : > { %v6276_v57 = vadd.f32 %v2805_v4, %v2804_v54  ;;  %3133 = vmatpush.msrb.mxu2 %v6102_v47  ;;  %3173 = vmatpush.msrb.mxu1 %v6114_v37  ;;  %v2801_v43 = vor.u32 1.1754944e-38, %v2800_v3  ;;  %v3271_v47 = vld [vmem:[%s6537_s12 + $0x60] sm:$0xff]  ;;  %v3264_v19 = vld [vmem:[%s6537_s12 + $0x28] sm:$0xff] }
 0x794   : > { %3114 = vmatpush.msrb.mxu0 %v6119_v60  ;;  %3154 = vmatpush.msra.mxu3 %v6702_v11  ;;  %v3260_v4 = vld [vmem:[%s6537_s12 + $0x8] sm:$0xff] }
 0x795   : > { %3901 = vtanh.f32 %v6276_v57  ;;  %3134 = vmatpush.msrb.mxu2 %v6701_v6  ;;  %3174 = vmatpush.msrb.mxu1 %v6703_v8  ;;  %v2802_v5 = vsel %vm2799_vm8, %v2801_v43, %v2797_v48 }
 0x796   : > { %3115 = vmatpush.msrb.mxu0 %v6704_v22  ;;  %3155 = vmatpush.msra.mxu3 %v6706_v7 }
 0x797   : > { %3135 = vmatpush.msrb.mxu2 %v6705_v61  ;;  %3175 = vmatpush.msrb.mxu1 %v6707_v40 }
 0x798   : > { %3116 = vmatpush.msrb.mxu0 %v6708_v45  ;;  %3156 = vmatpush.msra.mxu3 %v6180_v35  ;;  %v3273_v35 = vld [vmem:[%s6537_s12 + $0x70] sm:$0xff] }
 0x799   : > { %3136 = vmatpush.msrb.mxu2 %v6709_v30  ;;  %3176 = vmatpush.msrb.mxu1 %v6185_v50  ;;  %v3274_v50 = vld [vmem:[%s6537_s12 + $0x78] sm:$0xff] }
 0x79a   : > { %3117 = vmatpush.msrb.mxu0 %v6194_v0  ;;  %3157 = vmatpush.msra.mxu3 %v6206_v34  ;;  %v6713_v0 = vld [vmem:[#allocation19_spill] sm:$0xff]  ;;  %v3267_v34 = vld [vmem:[%s6537_s12 + $0x40] sm:$0xff] }
 0x79b   : > { %v3902_v26 = vpop.eup %3901  ;;  %3137 = vmatpush.msrb.mxu2 %v6199_v46  ;;  %3177 = vmatpush.msrb.mxu1 %v6710_v39  ;;  %v3269_v46 = vld [vmem:[%s6537_s12 + $0x50] sm:$0xff] }
 0x79c   : > { %v6303_v9 = vmul.f32 %v3902_v26, %v2802_v5 }
 0x79e   : > { %2898 = vmatmul.f32.vlgmr.msra.gmra.mxu0 %v6303_v9  ;;  %2918 = vmatmul.f32.vlgmr.msra.gmra.mxu2 %v6303_v9 }
 0x79f   : > { %2938 = vmatmul.f32.vlgmr.msrb.gmra.mxu3 %v6303_v9  ;;  %2958 = vmatmul.f32.vlgmr.msra.gmra.mxu1 %v6303_v9 }
 0x7a0   : > { %3279 = vmatpush.msra.mxu0 %v3274_v50 }
 0x7a2   : > { %3280 = vmatpush.msra.mxu0 %v3273_v35 }
 0x7a4   : > { %3281 = vmatpush.msra.mxu0 %v3272_v49 }
 0x7a6   : > { %3282 = vmatpush.msra.mxu0 %v3271_v47 }
 0x7a8   : > { %3283 = vmatpush.msra.mxu0 %v3270_v28  ;;  %v6716_v28 = vld [vmem:[#allocation26_spill] sm:$0xff] }
 0x7aa   : > { %3284 = vmatpush.msra.mxu0 %v3269_v46  ;;  %v6718_v46 = vld [vmem:[#allocation28_spill] sm:$0xff] }
 0x7ac   : > { %3285 = vmatpush.msra.mxu0 %v3268_v10  ;;  %v3329_v10 = vld [vmem:[%s6539_s14 + $0x8] sm:$0xff] }
 0x7ae   : > { %3286 = vmatpush.msra.mxu0 %v3267_v34  ;;  %v6720_v34 = vld [vmem:[#allocation21_spill] sm:$0xff] }
 0x7b0   : > { %3287 = vmatpush.msra.mxu0 %v3266_v25 }
 0x7b2   : > { %3288 = vmatpush.msra.mxu0 %v3265_v44  ;;  %v6721_v44 = vld [vmem:[#allocation22_spill] sm:$0xff] }
 0x7b4   : > { %3289 = vmatpush.msra.mxu0 %v3264_v19 }
 0x7b6   : > { %3290 = vmatpush.msra.mxu0 %v3263_v12 }
 0x7b8   : > { %3291 = vmatpush.msra.mxu0 %v3262_v31 }
 0x7ba   : > { %3292 = vmatpush.msra.mxu0 %v3261_v32 }
 0x7bc   : > { %3293 = vmatpush.msra.mxu0 %v3260_v4 }
 0x7be   : > { %3294 = vmatpush.msra.mxu0 %v3259_v2 }
 0x81b   : > { %v2899_v20 = vpop.f32.mrf.mxu0 }
 0x81c   : > { %v2962_v27 = vadd.f32 %v2899_v20, %v6711_v55  ;;  %v2959_v29 = vpop.f32.mrf.mxu1 }
 0x81d   : > { %v2965_v37 = vadd.f32 %v2959_v29, %v6712_v51 }
 0x81e   : > { %v3718_v60 = vmul.f32 -1.442695, %v2962_v27 }
 0x81f   : > { %v3720_v56 = vmul.f32 -1.442695, %v2965_v37 }
 0x820   : > { %3903 = vpow2.f32 %v3718_v60 }
 0x821   : > { %3905 = vpow2.f32 %v3720_v56  ;;  %v2919_v13 = vpop.f32.mrf.mxu2  ;;  %v6717_v56 = vld [vmem:[#allocation27_spill] sm:$0xff] }
 0x822   : > { %v2963_v15 = vadd.f32 %v2919_v13, %v6713_v0  ;;  %v2939_v41 = vpop.f32.mrf.mxu3  ;;  %v6719_v13 = vld [vmem:[#allocation29_spill] sm:$0xff]  ;;  %v3331_v0 = vld [vmem:[%s6539_s14 + $0x18] sm:$0xff] }
 0x823   : > { %v2964_v23 = vadd.f32 %v2939_v41, %v6714_v33  ;;  %3372 = vmatpush.msra.mxu2 %v3331_v0 }
 0x824   : > { %v3719_v17 = vmul.f32 -1.442695, %v2963_v15  ;;  %v3330_v15 = vld [vmem:[%s6539_s14 + $0x10] sm:$0xff] }
 0x825   : > { %3373 = vmatpush.msra.mxu2 %v3330_v15 }
 0x826   : > { %v3904_v59 = vpop.eup %3903  ;;  %3907 = vpow2.f32 %v3719_v17 }
 0x827   : > { %v3906_v1 = vpop.eup %3905  ;;  %v2969_v24 = vadd.f32 1.0, %v3904_v59  ;;  %3374 = vmatpush.msra.mxu2 %v3329_v10 }
 0x828   : > { %v6353_v53 = vadd.f32 1.0, %v3906_v1 }
 0x829   : > { %3909 = vrcp.f32 %v2969_v24  ;;  %v2981_v52 = vand.u32 2147483648, %v2969_v24  ;;  %v2979_v62 = vand.u32 2147483647, %v2969_v24  ;;  %vm2975_vm10 = vweird.f32 %v2969_v24 }
 0x82a   : > { %3911 = vrcp.f32 %v6353_v53  ;;  %v3020_v55 = vand.u32 2147483648, %v6353_v53  ;;  %vm3014_vm2 = vweird.f32 %v6353_v53  ;;  %v3018_v27 = vand.u32 2147483647, %v6353_v53 }
 0x82b   : > { %v2982_v48 = vor.u32 1.1754944e-38, %v2981_v52  ;;  %vm2980_vm12 = vcmp.eq.f32.partialorder %v2979_v62, 8.507059e+37 }
 0x82c   : > { %v3908_v42 = vpop.eup %3907  ;;  %v3021_v47 = vor.u32 1.1754944e-38, %v3020_v55  ;;  %vm3019_vm6 = vcmp.eq.f32.partialorder %v3018_v27, 8.507059e+37 }
 0x82d   : > { %v2988_v14 = vadd.f32 1.0, %v3908_v42  ;;  %v6722_v42 = vld [vmem:[#allocation23_spill] sm:$0xff] }
 0x82f   : > { %v3910_v58 = vpop.eup %3909  ;;  %3913 = vrcp.f32 %v2988_v14  ;;  %v3000_v8 = vand.u32 2147483648, %v2988_v14  ;;  %v2998_v26 = vand.u32 2147483647, %v2988_v14  ;;  %vm2994_vm14 = vweird.f32 %v2988_v14 }
 0x830   : > { %v2971_v38 = vmul.f32 %v3910_v58, %v2969_v24  ;;  %3915 = vtanh.f32 %v2964_v23  ;;  %v3912_v63 = vpop.eup %3911  ;;  %vm2976_vm9 = vweird.f32 %v3910_v58 }
 0x831   : > { %v3010_v18 = vmul.f32 %v3912_v63, %v6353_v53  ;;  %vm2977_vm11 = vmor %vm2975_vm10, %vm2976_vm9  ;;  %v3001_v45 = vor.u32 1.1754944e-38, %v3000_v8  ;;  %vm2999_vm0 = vcmp.eq.f32.partialorder %v2998_v26, 8.507059e+37  ;;  %vm3015_vm1 = vweird.f32 %v3912_v63  ;;  %v6403_v53 = vld [vmem:[%s6538_s13] ss:$0 sm:$0xff] }
 0x832   : > { %v2972_v36 = vsub.f32 1.0, %v2971_v38  ;;  %vm3016_vm5 = vmor %vm3014_vm2, %vm3015_vm1 }
 0x833   : > { %v3011_v7 = vsub.f32 1.0, %v3010_v18 }
 0x834   : > { %v2973_v21 = vmul.f32 %v3910_v58, %v2972_v36 }
 0x835   : > { %v3914_v54 = vpop.eup %3913  ;;  %v3012_v39 = vmul.f32 %v3912_v63, %v3011_v7 }
 0x836   : > { %v2990_v16 = vmul.f32 %v3914_v54, %v2988_v14  ;;  %v2974_v3 = vadd.f32 %v3910_v58, %v2973_v21  ;;  %v3916_v11 = vpop.eup %3915  ;;  %vm2995_vm13 = vweird.f32 %v3914_v54 }
 0x837   : > { %vm2996_vm15 = vmor %vm2994_vm14, %vm2995_vm13  ;;  %v3013_v20 = vadd.f32 %v3912_v63, %v3012_v39 }
 0x838   : > { %v2991_v6 = vsub.f32 1.0, %v2990_v16  ;;  %v2978_v43 = vsel %vm2977_vm11, %v3910_v58, %v2974_v3  ;;  %v6723_v16 = vld [vmem:[#allocation24_spill] sm:$0xff] }
 0x839   : > { %v2983_v22 = vsel %vm2980_vm12, %v2982_v48, %v2978_v43  ;;  %v3017_v29 = vsel %vm3016_vm5, %v3912_v63, %v3013_v20 }
 0x83a   : > { %v2992_v61 = vmul.f32 %v3914_v54, %v2991_v6  ;;  %v3025_v5 = vmul.f32 %v3916_v11, %v2983_v22  ;;  %v3022_v37 = vsel %vm3019_vm6, %v3021_v47, %v3017_v29 }
 0x83c   : > { %v2993_v40 = vadd.f32 %v3914_v54, %v2992_v61 }
 0x83e   : > { %v2997_v30 = vsel %vm2996_vm15, %v3914_v54, %v2993_v40 }
 0x83f   : > { %v3002_v50 = vsel %vm2999_vm0, %v3001_v45, %v2997_v30 }
 0x840   : > { %v3024_v35 = vmul.f32 %v3002_v50, %v6276_v57  ;;  %v6715_v57 = vld [vmem:[#allocation25_spill] sm:$0xff] }
 0x842   : > { %v6374_v49 = vadd.f32 %v3025_v5, %v3024_v35 }
 0x844   : > { %3917 = vtanh.f32 %v6374_v49 }
 0x84a   : > { %v3918_v51 = vpop.eup %3917 }
 0x84b   : > { %v3028_v60 = vmul.f32 %v3918_v51, %v3022_v37 }
 0x84d   : > { %3118 = vmatmul.f32.vlgmr.msrb.gmra.mxu0 %v3028_v60  ;;  %3138 = vmatmul.f32.vlgmr.msrb.gmra.mxu2 %v3028_v60 }
 0x84e   : > { %3158 = vmatmul.f32.vlgmr.msra.gmra.mxu3 %v3028_v60  ;;  %3178 = vmatmul.f32.vlgmr.msrb.gmra.mxu1 %v3028_v60 }
 0x855   : > { %3295 = vmatmul.f32.vlgmr.msra.gmra.mxu0 %v6715_v57 }
 0x85d   : > { %3298 = vmatmul.f32.gmra.mxu0 %v6716_v28 }
 0x865   : > { %3301 = vmatmul.f32.gmra.mxu0 %v6717_v56 }
 0x86d   : > { %3304 = vmatmul.f32.gmra.mxu0 %v6718_v46 }
 0x875   : > { %3307 = vmatmul.f32.gmra.mxu0 %v6719_v13 }
 0x87d   : > { %3310 = vmatmul.f32.gmra.mxu0 %v6303_v9  ;;  %v3328_v9 = vld [vmem:[%s6539_s14] sm:$0xff] }
 0x87e   : > { %3375 = vmatpush.msra.mxu2 %v3328_v9 }
 0x885   : > { %3313 = vmatmul.f32.gmra.mxu0 %v3028_v60 }
 0x8ca   : > { %v3119_v17 = vpop.f32.mrf.mxu0 }
 0x8cb   : > { %v3182_v25 = vadd.f32 %v3119_v17, %v6720_v34  ;;  %v3179_v59 = vpop.f32.mrf.mxu1 }
 0x8cc   : > { %v3185_v1 = vadd.f32 %v3179_v59, %v6721_v44 }
 0x8cd   : > { %v3721_v24 = vmul.f32 -1.442695, %v3182_v25 }
 0x8ce   : > { %v3723_v19 = vmul.f32 -1.442695, %v3185_v1 }
 0x8cf   : > { %3919 = vpow2.f32 %v3721_v24 }
 0x8d0   : > { %3921 = vpow2.f32 %v3723_v19  ;;  %v3139_v12 = vpop.f32.mrf.mxu2 }
 0x8d1   : > { %v3183_v41 = vadd.f32 %v3139_v12, %v6722_v42  ;;  %v3159_v52 = vpop.f32.mrf.mxu3 }
 0x8d2   : > { %v3296_v14 = vpop.f32.mrf.mxu0  ;;  %v3184_v3 = vadd.f32 %v3159_v52, %v6723_v16 }
 0x8d3   : > { %v3722_v31 = vmul.f32 -1.442695, %v3183_v41  ;;  %v3297_v32 = vadd.f32 %v6403_v53, %v3296_v14 }
 0x8d5   : > { %v3920_v58 = vpop.eup %3919  ;;  %3923 = vpow2.f32 %v3722_v31  ;;  %v3320_v33 = vmax.f32 %v3297_v32, 0.0 }
 0x8d6   : > { %v3922_v23 = vpop.eup %3921  ;;  %v3189_v38 = vadd.f32 1.0, %v3920_v58 }
 0x8d7   : > { %3724 = vmatmul.msk.f32.vlgmr.msra.gmra.mxu2 %vm715_vm4, %v3320_v33  ;;  %v6408_v4 = vadd.f32 1.0, %v3922_v23  ;;  %v6432_v33 = vld [vmem:[%s6540_s15] ss:$0 sm:$0xff] }
 0x8d8   : > { %3925 = vrcp.f32 %v3189_v38  ;;  %v3201_v6 = vand.u32 2147483648, %v3189_v38  ;;  %v3199_v22 = vand.u32 2147483647, %v3189_v38  ;;  %vm3195_vm8 = vweird.f32 %v3189_v38 }
 0x8d9   : > { %3927 = vrcp.f32 %v6408_v4  ;;  %v3240_v25 = vand.u32 2147483648, %v6408_v4  ;;  %vm3234_vm0 = vweird.f32 %v6408_v4  ;;  %v3238_v59 = vand.u32 2147483647, %v6408_v4 }
 0x8da   : > { %v3299_v36 = vpop.f32.mrf.mxu0  ;;  %v3202_v30 = vor.u32 1.1754944e-38, %v3201_v6  ;;  %vm3200_vm10 = vcmp.eq.f32.partialorder %v3199_v22, 8.507059e+37 }
 0x8db   : > { %v3924_v2 = vpop.eup %3923  ;;  %v3300_v63 = vadd.f32 %v6403_v53, %v3299_v36  ;;  %vm3239_vm2 = vcmp.eq.f32.partialorder %v3238_v59, 8.507059e+37 }
 0x8dc   : > { %v3208_v21 = vadd.f32 1.0, %v3924_v2 }
 0x8dd   : > { %v3321_v62 = vmax.f32 %v3300_v63, 0.0 }
 0x8de   : > { %v3926_v54 = vpop.eup %3925  ;;  %3929 = vrcp.f32 %v3208_v21  ;;  %v3220_v20 = vand.u32 2147483648, %v3208_v21  ;;  %v3218_v29 = vand.u32 2147483647, %v3208_v21  ;;  %vm3214_vm12 = vweird.f32 %v3208_v21 }
 0x8df   : > { %v3191_v18 = vmul.f32 %v3926_v54, %v3189_v38  ;;  %3725 = vmatmul.msk.f32.gmra.mxu2 %vm715_vm4, %v3321_v62  ;;  %3931 = vtanh.f32 %v3184_v3  ;;  %v3928_v11 = vpop.eup %3927  ;;  %vm3196_vm7 = vweird.f32 %v3926_v54 }
 0x8e0   : > { %v3230_v45 = vmul.f32 %v3928_v11, %v6408_v4  ;;  %vm3197_vm9 = vmor %vm3195_vm8, %vm3196_vm7  ;;  %v3221_v28 = vor.u32 1.1754944e-38, %v3220_v20  ;;  %vm3219_vm14 = vcmp.eq.f32.partialorder %v3218_v29, 8.507059e+37  ;;  %vm3235_vm15 = vweird.f32 %v3928_v11 }
 0x8e1   : > { %v3192_v48 = vsub.f32 1.0, %v3191_v18  ;;  %vm3236_vm1 = vmor %vm3234_vm0, %vm3235_vm15 }
 0x8e2   : > { %v3302_v43 = vpop.f32.mrf.mxu0  ;;  %v3231_v37 = vsub.f32 1.0, %v3230_v45 }
 0x8e3   : > { %v3193_v8 = vmul.f32 %v3926_v54, %v3192_v48  ;;  %v3303_v61 = vadd.f32 %v6403_v53, %v3302_v43 }
 0x8e4   : > { %v3930_v26 = vpop.eup %3929  ;;  %v3232_v0 = vmul.f32 %v3928_v11, %v3231_v37 }
 0x8e5   : > { %v3210_v5 = vmul.f32 %v3930_v26, %v3208_v21  ;;  %v3194_v7 = vadd.f32 %v3926_v54, %v3193_v8  ;;  %v3322_v40 = vmax.f32 %v3303_v61, 0.0  ;;  %v3932_v35 = vpop.eup %3931  ;;  %vm3215_vm11 = vweird.f32 %v3930_v26 }
 0x8e6   : > { %vm3216_vm13 = vmor %vm3214_vm12, %vm3215_vm11  ;;  %v3233_v17 = vadd.f32 %v3928_v11, %v3232_v0 }
 0x8e7   : > { %v3211_v39 = vsub.f32 1.0, %v3210_v5  ;;  %v3198_v50 = vsel %vm3197_vm9, %v3926_v54, %v3194_v7  ;;  %3726 = vmatmul.msk.f32.gmra.mxu2 %vm715_vm4, %v3322_v40  ;;  %v6724_v7 = vld [vmem:[#allocation4_spill] sm:$0xff] }
 0x8e8   : > { %v3203_v55 = vsel %vm3200_vm10, %v3202_v30, %v3198_v50  ;;  %v3237_v1 = vsel %vm3236_vm1, %v3928_v11, %v3233_v17  ;;  %vm3401_vm5 = vcmp.ge.s32.totalorder %v6724_v7, 8 }
 0x8e9   : > { %v3212_v27 = vmul.f32 %v3930_v26, %v3211_v39  ;;  %v3245_v47 = vmul.f32 %v3932_v35, %v3203_v55  ;;  %vm6450_vm7 = vmand %vm3401_vm5, %vm698_vm3 }
 0x8ea   : > { %v3305_v51 = vpop.f32.mrf.mxu0 }
 0x8eb   : > { %v3213_v60 = vadd.f32 %v3930_v26, %v3212_v27  ;;  %v3306_v57 = vadd.f32 %v6403_v53, %v3305_v51 }
 0x8ed   : > { %v3217_v56 = vsel %vm3216_vm13, %v3930_v26, %v3213_v60  ;;  %v3323_v46 = vmax.f32 %v3306_v57, 0.0 }
 0x8ee   : > { %v3222_v13 = vsel %vm3219_vm14, %v3221_v28, %v3217_v56 }
 0x8ef   : > { %v3244_v15 = vmul.f32 %v3222_v13, %v6374_v49  ;;  %3727 = vmatmul.msk.f32.gmra.mxu2 %vm715_vm4, %v3323_v46  ;;  %v3241_v49 = vor.u32 1.1754944e-38, %v3240_v25 }
 0x8f1   : > { %v3246_v10 = vadd.f32 %v3245_v47, %v3244_v15  ;;  %v3242_v19 = vsel %vm3239_vm2, %v3241_v49, %v3237_v1 }
 0x8f2   : > { %v3308_v9 = vpop.f32.mrf.mxu0 }
 0x8f3   : > { %3933 = vtanh.f32 %v3246_v10  ;;  %v3309_v34 = vadd.f32 %v6403_v53, %v3308_v9 }
 0x8f5   : > { %v3324_v44 = vmax.f32 %v3309_v34, 0.0 }
 0x8f7   : > { %3728 = vmatmul.msk.f32.gmra.mxu2 %vm715_vm4, %v3324_v44 }
 0x8f9   : > { %v3934_v24 = vpop.eup %3933 }
 0x8fa   : > { %v3311_v12 = vpop.f32.mrf.mxu0  ;;  %v3248_v42 = vmul.f32 %v3934_v24, %v3242_v19 }
 0x8fb   : > { %v3312_v41 = vadd.f32 %v6403_v53, %v3311_v12 }
 0x8fc   : > { %3316 = vmatmul.f32.gmra.mxu0 %v3248_v42 }
 0x8fd   : > { %v3325_v14 = vmax.f32 %v3312_v41, 0.0 }
 0x8ff   : > { %3729 = vmatmul.msk.f32.gmra.mxu2 %vm715_vm4, %v3325_v14 }
 0x902   : > { %v3314_v31 = vpop.f32.mrf.mxu0 }
 0x903   : > { %v3315_v32 = vadd.f32 %v6403_v53, %v3314_v31 }
 0x905   : > { %v3326_v58 = vmax.f32 %v3315_v32, 0.0 }
 0x907   : > { %3730 = vmatmul.msk.f32.gmra.mxu2 %vm715_vm4, %v3326_v58 }
 0x95a   : > { %v3377_v23 = vpop.f32.mrf.mxu2 }
 0x95b   : > { %v3378_v38 = vadd.f32 %v6432_v33, %v3377_v23 }
 0x95d   : > { %v3427_v4 = vand.u32 2147483647, %v3378_v38  ;;  %v3403_v20 = vmax.f32 %v3378_v38, 0.0  ;;  %vm3411_vm8 = vcmp.ne.f32.partialorder %v3378_v38, %v3378_v38 }
 0x95f   : > { %v3435_v36 = vsub.f32 0.0, %v3427_v4 }
 0x961   : > { %v3443_v2 = vmul.f32 1.442695, %v3435_v36 }
 0x962   : > { %v3380_v52 = vpop.f32.mrf.mxu2 }
 0x963   : > { %3935 = vpow2.f32 %v3443_v2  ;;  %v6436_v63 = vadd.f32 %v6432_v33, %v3380_v52 }
 0x965   : > { %v3428_v21 = vand.u32 2147483647, %v6436_v63  ;;  %v3404_v44 = vmax.f32 %v6436_v63, 0.0  ;;  %vm3412_vm9 = vcmp.ne.f32.partialorder %v6436_v63, %v6436_v63 }
 0x967   : > { %v3436_v62 = vsub.f32 0.0, %v3428_v21 }
 0x969   : > { %v3936_v54 = vpop.eup %3935  ;;  %v3445_v16 = vmul.f32 1.442695, %v3436_v62 }
 0x96a   : > { %v3459_v3 = vadd.f32 1.0, %v3936_v54  ;;  %v3383_v18 = vpop.f32.mrf.mxu2  ;;  %v3462_v48 = vmul.f32 -0.5, %v3936_v54  ;;  %v3465_v22 = vand.u32 2147483647, %v3936_v54 }
 0x96b   : > { %3937 = vpow2.f32 %v3445_v16  ;;  %v6440_v6 = vadd.f32 %v6432_v33, %v3383_v18 }
 0x96c   : > { %3939 = vlog2.f32 %v3459_v3  ;;  %v3463_v11 = vadd.f32 1.0, %v3462_v48  ;;  %vm3466_vm6 = vcmp.lt.f32.partialorder %v3465_v22, 0.0004427343 }
 0x96d   : > { %v3429_v43 = vand.u32 2147483647, %v6440_v6  ;;  %v3405_v21 = vmax.f32 %v6440_v6, 0.0  ;;  %vm3413_vm10 = vcmp.ne.f32.partialorder %v6440_v6, %v6440_v6 }
 0x96e   : > { %v3464_v50 = vmul.f32 %v3936_v54, %v3463_v11 }
 0x96f   : > { %v3437_v8 = vsub.f32 0.0, %v3429_v43 }
 0x971   : > { %v3938_v61 = vpop.eup %3937  ;;  %v3447_v26 = vmul.f32 1.442695, %v3437_v8 }
 0x972   : > { %v3940_v5 = vpop.eup %3939  ;;  %v3468_v40 = vadd.f32 1.0, %v3938_v61  ;;  %v3471_v45 = vmul.f32 -0.5, %v3938_v61  ;;  %v3386_v30 = vpop.f32.mrf.mxu2  ;;  %v3474_v57 = vand.u32 2147483647, %v3938_v61 }
 0x973   : > { %v3461_v39 = vmul.f32 0.6931472, %v3940_v5  ;;  %3941 = vpow2.f32 %v3447_v26  ;;  %v6445_v35 = vadd.f32 %v6432_v33, %v3386_v30 }
 0x974   : > { %3943 = vlog2.f32 %v3468_v40  ;;  %v3472_v51 = vadd.f32 1.0, %v3471_v45  ;;  %vm3475_vm3 = vcmp.lt.f32.partialorder %v3474_v57, 0.0004427343 }
 0x975   : > { %v3467_v55 = vsel %vm3466_vm6, %v3464_v50, %v3461_v39  ;;  %v3430_v27 = vand.u32 2147483647, %v6445_v35  ;;  %v3406_v30 = vmax.f32 %v6445_v35, 0.0  ;;  %vm3414_vm12 = vcmp.ne.f32.partialorder %v6445_v35, %v6445_v35 }
 0x976   : > { %v3531_v47 = vadd.f32 %v3467_v55, %v3403_v20  ;;  %v3473_v15 = vmul.f32 %v3938_v61, %v3472_v51 }
 0x977   : > { %v3438_v37 = vsub.f32 0.0, %v3430_v27 }
 0x978   : > { %v3539_v60 = vsel %vm3411_vm8, %v3378_v38, %v3531_v47 }
 0x979   : > { %v3942_v28 = vpop.eup %3941  ;;  %v3547_v56 = vsel %vm6450_vm7, %v3539_v60, %v3378_v38  ;;  %v3449_v46 = vmul.f32 1.442695, %v3438_v37  ;;  %v3317_v13 = vpop.f32.mrf.mxu0 }
 0x97a   : > { %v3944_v0 = vpop.eup %3943  ;;  %3555 = vst [vmem:[%s6459_s22] sm:$0xff] %v3547_v56  ;;  %v3477_v10 = vadd.f32 1.0, %v3942_v28  ;;  %v3318_v9 = vadd.f32 %v6403_v53, %v3317_v13  ;;  %v3389_v17 = vpop.f32.mrf.mxu2  ;;  %v3480_v25 = vmul.f32 -0.5, %v3942_v28  ;;  %v3483_v41 = vand.u32 2147483647, %v3942_v28 }
 0x97b   : > { %v3470_v34 = vmul.f32 0.6931472, %v3944_v0  ;;  %3945 = vpow2.f32 %v3449_v46  ;;  %v6466_v59 = vadd.f32 %v6432_v33, %v3389_v17 }
 0x97c   : > { %3947 = vlog2.f32 %v3477_v10  ;;  %v3327_v1 = vmax.f32 %v3318_v9, 0.0  ;;  %v3481_v53 = vadd.f32 1.0, %v3480_v25 }
 0x97d   : > { %v3476_v49 = vsel %vm3475_vm3, %v3473_v15, %v3470_v34  ;;  %v3431_v24 = vand.u32 2147483647, %v6466_v59  ;;  %v3407_v0 = vmax.f32 %v6466_v59, 0.0  ;;  %vm3415_vm14 = vcmp.ne.f32.partialorder %v6466_v59, %v6466_v59 }
 0x97e   : > { %v3532_v19 = vadd.f32 %v3476_v49, %v3404_v44  ;;  %3731 = vmatmul.msk.f32.gmra.mxu2 %vm715_vm4, %v3327_v1  ;;  %v3482_v2 = vmul.f32 %v3942_v28, %v3481_v53  ;;  %vm3484_vm4 = vcmp.lt.f32.partialorder %v3483_v41, 0.0004427343 }
 0x97f   : > { %v3439_v12 = vsub.f32 0.0, %v3431_v24 }
 0x980   : > { %v3540_v42 = vsel %vm3412_vm9, %v6436_v63, %v3532_v19 }
 0x981   : > { %v3946_v14 = vpop.eup %3945  ;;  %v3548_v31 = vsel %vm6450_vm7, %v3540_v42, %v6436_v63  ;;  %v3451_v32 = vmul.f32 1.442695, %v3439_v12 }
 0x982   : > { %v3948_v58 = vpop.eup %3947  ;;  %3556 = vst [vmem:[%s6459_s22 + $0x8] sm:$0xff] %v3548_v31  ;;  %v3486_v23 = vadd.f32 1.0, %v3946_v14  ;;  %v3489_v38 = vmul.f32 -0.5, %v3946_v14  ;;  %v3392_v4 = vpop.f32.mrf.mxu2  ;;  %v3492_v48 = vand.u32 2147483647, %v3946_v14 }
 0x983   : > { %v3479_v36 = vmul.f32 0.6931472, %v3948_v58  ;;  %3949 = vpow2.f32 %v3451_v32  ;;  %v6479_v52 = vadd.f32 %v6432_v33, %v3392_v4 }
 0x984   : > { %3951 = vlog2.f32 %v3486_v23  ;;  %v3490_v16 = vadd.f32 1.0, %v3489_v38  ;;  %vm3493_vm11 = vcmp.lt.f32.partialorder %v3492_v48, 0.0004427343 }
 0x985   : > { %v3485_v62 = vsel %vm3484_vm4, %v3482_v2, %v3479_v36  ;;  %v3432_v63 = vand.u32 2147483647, %v6479_v52  ;;  %v3408_v53 = vmax.f32 %v6479_v52, 0.0  ;;  %vm3416_vm0 = vcmp.ne.f32.partialorder %v6479_v52, %v6479_v52 }
 0x986   : > { %v3533_v54 = vadd.f32 %v3485_v62, %v3405_v21  ;;  %v3491_v61 = vmul.f32 %v3946_v14, %v3490_v16 }
 0x987   : > { %v3440_v3 = vsub.f32 0.0, %v3432_v63 }
 0x988   : > { %v3541_v18 = vsel %vm3413_vm10, %v6440_v6, %v3533_v54 }
 0x989   : > { %v3950_v43 = vpop.eup %3949  ;;  %v3549_v11 = vsel %vm6450_vm7, %v3541_v18, %v6440_v6  ;;  %v3453_v8 = vmul.f32 1.442695, %v3440_v3 }
 0x98a   : > { %v3952_v22 = vpop.eup %3951  ;;  %3557 = vst [vmem:[%s6459_s22 + $0x10] sm:$0xff] %v3549_v11  ;;  %v3495_v26 = vadd.f32 1.0, %v3950_v43  ;;  %v3395_v5 = vpop.f32.mrf.mxu2  ;;  %v3498_v40 = vmul.f32 -0.5, %v3950_v43  ;;  %v3501_v47 = vand.u32 2147483647, %v3950_v43 }
 0x98b   : > { %v3488_v7 = vmul.f32 0.6931472, %v3952_v22  ;;  %3953 = vpow2.f32 %v3453_v8  ;;  %v3396_v45 = vadd.f32 %v6432_v33, %v3395_v5 }
 0x98c   : > { %3955 = vlog2.f32 %v3495_v26  ;;  %v3499_v6 = vadd.f32 1.0, %v3498_v40  ;;  %vm3502_vm13 = vcmp.lt.f32.partialorder %v3501_v47, 0.0004427343 }
 0x98d   : > { %v3494_v39 = vsel %vm3493_vm11, %v3491_v61, %v3488_v7  ;;  %v3433_v50 = vand.u32 2147483647, %v3396_v45  ;;  %v3409_v38 = vmax.f32 %v3396_v45, 0.0  ;;  %vm3417_vm2 = vcmp.ne.f32.partialorder %v3396_v45, %v3396_v45 }
 0x98e   : > { %v3534_v20 = vadd.f32 %v3494_v39, %v3406_v30  ;;  %v3500_v46 = vmul.f32 %v3950_v43, %v3499_v6 }
 0x98f   : > { %v3441_v55 = vsub.f32 0.0, %v3433_v50 }
 0x990   : > { %v3542_v27 = vsel %vm3414_vm12, %v6445_v35, %v3534_v20 }
 0x991   : > { %v3954_v51 = vpop.eup %3953  ;;  %v3550_v37 = vsel %vm6450_vm7, %v3542_v27, %v6445_v35  ;;  %v3455_v60 = vmul.f32 1.442695, %v3441_v55 }
 0x992   : > { %v3956_v57 = vpop.eup %3955  ;;  %3558 = vst [vmem:[%s6459_s22 + $0x18] sm:$0xff] %v3550_v37  ;;  %v3504_v28 = vadd.f32 1.0, %v3954_v51  ;;  %v3507_v13 = vmul.f32 -0.5, %v3954_v51  ;;  %v3510_v17 = vand.u32 2147483647, %v3954_v51 }
 0x993   : > { %v3497_v56 = vmul.f32 0.6931472, %v3956_v57  ;;  %3957 = vpow2.f32 %v3455_v60 }
 0x994   : > { %3959 = vlog2.f32 %v3504_v28  ;;  %v3508_v9 = vadd.f32 1.0, %v3507_v13  ;;  %vm3511_vm15 = vcmp.lt.f32.partialorder %v3510_v17, 0.0004427343 }
 0x995   : > { %v3503_v15 = vsel %vm3502_vm13, %v3500_v46, %v3497_v56 }
 0x996   : > { %v3535_v10 = vadd.f32 %v3503_v15, %v3407_v0  ;;  %v3509_v24 = vmul.f32 %v3954_v51, %v3508_v9 }
 0x998   : > { %v3543_v35 = vsel %vm3415_vm14, %v6466_v59, %v3535_v10 }
 0x999   : > { %v3958_v34 = vpop.eup %3957  ;;  %v3551_v25 = vsel %vm6450_vm7, %v3543_v35, %v6466_v59 }
 0x99a   : > { %v3960_v44 = vpop.eup %3959  ;;  %3559 = vst [vmem:[%s6459_s22 + $0x20] sm:$0xff] %v3551_v25  ;;  %v3513_v1 = vadd.f32 1.0, %v3958_v34  ;;  %v3516_v19 = vmul.f32 -0.5, %v3958_v34  ;;  %v3519_v14 = vand.u32 2147483647, %v3958_v34 }
 0x99b   : > { %v3506_v49 = vmul.f32 0.6931472, %v3960_v44 }
 0x99c   : > { %3961 = vlog2.f32 %v3513_v1  ;;  %v3517_v41 = vadd.f32 1.0, %v3516_v19  ;;  %vm3520_vm1 = vcmp.lt.f32.partialorder %v3519_v14, 0.0004427343 }
 0x99d   : > { %v3512_v12 = vsel %vm3511_vm15, %v3509_v24, %v3506_v49 }
 0x99e   : > { %v3536_v42 = vadd.f32 %v3512_v12, %v3408_v53  ;;  %v3518_v23 = vmul.f32 %v3958_v34, %v3517_v41 }
 0x9a0   : > { %v3544_v59 = vsel %vm3416_vm0, %v6479_v52, %v3536_v42 }
 0x9a1   : > { %v3552_v31 = vsel %vm6450_vm7, %v3544_v59, %v6479_v52 }
 0x9a2   : > { %v3962_v32 = vpop.eup %3961  ;;  %3560 = vst [vmem:[%s6459_s22 + $0x28] sm:$0xff] %v3552_v31 }
 0x9a3   : > { %v3515_v58 = vmul.f32 0.6931472, %v3962_v32 }
 0x9a5   : > { %v3521_v4 = vsel %vm3520_vm1, %v3518_v23, %v3515_v58 }
 0x9a6   : > { %v3537_v36 = vadd.f32 %v3521_v4, %v3409_v38 }
 0x9a8   : > { %v3545_v2 = vsel %vm3417_vm2, %v3396_v45, %v3537_v36 }
 0x9a9   : > { %v3553_v21 = vsel %vm6450_vm7, %v3545_v2, %v3396_v45 }
 0x9aa   : > { %3561 = vst [vmem:[%s6459_s22 + $0x30] sm:$0xff] %v3553_v21 }
 0xa01   : > { %v3398_v62 = vpop.f32.mrf.mxu2 }
 0xa02   : > { %v3399_v63 = vadd.f32 %v6432_v33, %v3398_v62 }
 0xa04   : > { %v3434_v54 = vand.u32 2147483647, %v3399_v63  ;;  %v3410_v26 = vmax.f32 %v3399_v63, 0.0  ;;  %vm3418_vm6 = vcmp.ne.f32.partialorder %v3399_v63, %v3399_v63 }
 0xa06   : > { %v3442_v16 = vsub.f32 0.0, %v3434_v54 }
 0xa08   : > { %v3457_v52 = vmul.f32 1.442695, %v3442_v16 }
 0xa0a   : > { %3963 = vpow2.f32 %v3457_v52 }
 0xa10   : > { %v3964_v3 = vpop.eup %3963 }
 0xa11   : > { %v3522_v18 = vadd.f32 1.0, %v3964_v3  ;;  %v3525_v48 = vmul.f32 -0.5, %v3964_v3  ;;  %v3528_v11 = vand.u32 2147483647, %v3964_v3 }
 0xa13   : > { %3965 = vlog2.f32 %v3522_v18  ;;  %v3526_v43 = vadd.f32 1.0, %v3525_v48  ;;  %vm3529_vm5 = vcmp.lt.f32.partialorder %v3528_v11, 0.0004427343 }
 0xa15   : > { %v3527_v61 = vmul.f32 %v3964_v3, %v3526_v43 }
 0xa19   : > { %v3966_v8 = vpop.eup %3965 }
 0xa1a   : > { %v3524_v22 = vmul.f32 0.6931472, %v3966_v8 }
 0xa1c   : > { %v3530_v5 = vsel %vm3529_vm5, %v3527_v61, %v3524_v22 }
 0xa1d   : > { %v3538_v7 = vadd.f32 %v3530_v5, %v3410_v26 }
 0xa1f   : > { %v3546_v33 = vsel %vm3418_vm6, %v3399_v63, %v3538_v7 }
 0xa20   : > { %v3554_v40 = vsel %vm6450_vm7, %v3546_v33, %v3399_v63 }
 0xa21   : > { %3562 = vst [vmem:[%s6459_s22 + $0x38] sm:$0xff] %v3554_v40 }
 0xa22 PF: > { %s26_s21 = sadd.s32 1, %s3973_s21  }
 0xa23   : > { %p23_p4 = scmp.ge.s32.totalorder %s26_s21, 4  }
 0xa25   :  { %25 = sbr.rel (!%p23_p4) target bundleno = 2 (0x2), region = 129 }

</bundles_post_ra>
